<compile_context>
chip_gen: v7x
topology: tpu7x:2x2x1
jax: 0.10.0
libtpu: 0.0.40
codegen_flags: <defaults>
</compile_context>

<pallas_src>
import jax
import jax.numpy as jnp
import numpy as np
from jax import lax
from jax.experimental import pallas as pl
from jax.experimental.pallas import tpu as pltpu


def forecast_kernel(src_ref, dec_in_ref,
                    e_wih_ref, e_whh_ref, e_b_ref,
                    d_whh_ref, w_seed_ref, b_seed_ref,
                    d_wrec_ref, d_brec_ref,
                    fc_w_ref, fc_b_ref,
                    out_ref, gx_ref):
    """One batch tile (batch on lanes): LSTM encoder + folded AR decoder.

    Shapes (TB = batch tile, on the 128-lane axis):
      src_ref    (T, F, TB)   time-major encoder inputs
      dec_in_ref (O, TB)      decoder seed  src[:, -1, [0, 2]]^T
      e_wih_ref  (4H, F)   e_whh_ref (4H, H)   e_b_ref (4H, 1)
      d_whh_ref  (4H, H)   w_seed_ref (4H, O)  b_seed_ref (4H, 1)
      d_wrec_ref (4H, H)   d_brec_ref (4H, 1)
      fc_w_ref   (O, H)    fc_b_ref (O, 1)
      out_ref    (W, O, TB)   predictions (lane-dense on TB)
      gx_ref     (T, 4H, TB)  VMEM scratch: hoisted encoder input projection
    Weight rows are pre-permuted (wrapper) to gate order [i, f, o, g].
    """
    T, F, TB = src_ref.shape
    H4, H = e_whh_ref.shape
    H3 = H4 - H
    W = out_ref.shape[0]
    O = out_ref.shape[1]
    cdt = e_whh_ref.dtype          # MXU operand dtype (f32, or bf16 on v6e/v7x)

    # ---- hoisted weight loads / bias lane-broadcasts (not CSE'd by JAX) ----
    e_wih = e_wih_ref[...]
    e_whh = e_whh_ref[...]
    d_whh = d_whh_ref[...]
    w_seed = w_seed_ref[...]
    d_wrec = d_wrec_ref[...]
    fc_w = fc_w_ref[...]
    e_b_b = jnp.broadcast_to(e_b_ref[...], (H4, TB))
    b_seed_b = jnp.broadcast_to(b_seed_ref[...], (H4, TB))
    d_brec_b = jnp.broadcast_to(d_brec_ref[...], (H4, TB))
    fc_b_b = jnp.broadcast_to(fc_b_ref[...], (O, TB))

    def sigmoid(x):
        # one EUP tanh push; avoids exp + divide on the serial feedback chain
        return 0.5 * jnp.tanh(0.5 * x) + 0.5

    def activate(gates, c):
        # gate rows [ i | f | o | g ]: splits land on sublane-tile boundaries.
        ifo = sigmoid(gates[:H3, :])
        g = jnp.tanh(gates[H3:, :])
        i = ifo[:H, :]
        f = ifo[H:2 * H, :]
        o = ifo[2 * H:, :]
        c_new = f * c + i * g
        h_new = o * jnp.tanh(c_new)
        return h_new, c_new

    # ---- encoder input projection, hoisted out of the recurrence -----------
    def proj_body(t, carry):
        x_t = src_ref[t].astype(cdt)                                  # (F, TB)
        gx_ref[t] = (jnp.dot(e_wih, x_t, preferred_element_type=jnp.float32)
                     + e_b_b)
        return carry

    lax.fori_loop(0, T, proj_body, 0, unroll=True)

    # ---- encoder recurrence: ONE (4H,H)@(H,TB) matmul per step -------------
    def enc_body(t, hc):
        h, c = hc
        gates = gx_ref[t] + jnp.dot(e_whh, h.astype(cdt),
                                    preferred_element_type=jnp.float32)
        return activate(gates, c)

    h0 = jnp.zeros((H, TB), jnp.float32)
    c0 = jnp.zeros((H, TB), jnp.float32)
    h, c = lax.fori_loop(0, T, enc_body, (h0, c0), unroll=True)

    # ---- decoder step 0: seed path (proj folded into w_seed) ---------------
    gates = (jnp.dot(w_seed, dec_in_ref[...].astype(cdt),
                     preferred_element_type=jnp.float32)
             + jnp.dot(d_whh, h.astype(cdt),
                       preferred_element_type=jnp.float32)
             + b_seed_b)
    h, c = activate(gates, c)
    out_ref[0] = (jnp.dot(fc_w, h.astype(cdt),
                          preferred_element_type=jnp.float32)
                  + fc_b_b).astype(out_ref.dtype)

    # ---- decoder rollout: feedback folded => ONE matmul per step; the fc
    #      head is a side branch streamed into the lane-dense output block ----
    def dec_body(w, hc):
        h, c = hc
        gates = (jnp.dot(d_wrec, h.astype(cdt),
                         preferred_element_type=jnp.float32) + d_brec_b)
        h, c = activate(gates, c)
        out_ref[w] = (jnp.dot(fc_w, h.astype(cdt),
                              preferred_element_type=jnp.float32)
                      + fc_b_b).astype(out_ref.dtype)
        return (h, c)

    lax.fori_loop(1, W, dec_body, (h, c), unroll=True)


def _ceil_to(x, m):
    return ((x + m - 1) // m) * m


def forecast_net_forward(src, params, output_window, block_b=None,
                         use_bf16_weights=False):
    """ForecastNet forward.  One-time parameter prep (gate permutation,
    fc->proj->decoder folding, transposes) in XLA; hot path in Pallas."""
    B, T, F = src.shape
    H = params["e_whh"].shape[1]
    O = params["fc_w"].shape[0]
    W = output_window

    # decoder seed = src[:, -1, [0, 2]]: fail loudly on unsupported configs.
    assert O == 2, "pred is fed back via src-style features [0, 2] => output_dim must be 2"
    assert F >= 3, "decoder seed indexes features [0, 2] => num_features must be >= 3"
    # TODO(synk): num_layers > 1 stacked LSTMs not supported by this kernel.

    # PyTorch gate row order [i, f, g, o] -> [i, f, o, g] so the kernel does
    # one sigmoid over rows [0, 3H) and one tanh over rows [3H, 4H).
    perm = np.concatenate([np.arange(0, 2 * H),
                           np.arange(3 * H, 4 * H),
                           np.arange(2 * H, 3 * H)])

    def prep_lstm(w_ih, w_hh, b_ih, b_hh):
        w_ih_p = jnp.asarray(w_ih, jnp.float32)[perm, :]               # (4H, in)
        w_hh_p = jnp.asarray(w_hh, jnp.float32)[perm, :]               # (4H, H)
        b_p = (jnp.asarray(b_ih, jnp.float32)
               + jnp.asarray(b_bh := b_hh, jnp.float32))[perm][:, None]  # (4H, 1)
        return w_ih_p, w_hh_p, b_p

    e_wih, e_whh, e_b = prep_lstm(params["e_wih"], params["e_whh"],
                                  params["e_bih"], params["e_bhh"])
    d_wih, d_whh, d_b = prep_lstm(params["d_wih"], params["d_whh"],
                                  params["d_bih"], params["d_bhh"])

    fc_w = jnp.asarray(params["fc_w"], jnp.float32)                    # (O, H)
    fc_b = jnp.asarray(params["fc_b"], jnp.float32)[:, None]           # (O, 1)
    pj_w = jnp.asarray(params["pj_w"], jnp.float32)                    # (F, O)
    pj_b = jnp.asarray(params["pj_b"], jnp.float32)[:, None]           # (F, 1)

    # Fold fc -> proj -> decoder input projection so the autoregressive
    # feedback gates are d_wrec @ h_t + d_brec (ONE matmul per step).
    w_hx = pj_w @ fc_w                               # (F, H)
    b_hx = pj_w @ fc_b + pj_b                        # (F, 1)
    d_wrec = d_wih @ w_hx + d_whh                    # (4H, H)
    d_brec = d_wih @ b_hx + d_b                      # (4H, 1)
    # step-0 seed path: proj folded into the decoder input weights.
    w_seed = d_wih @ pj_w                            # (4H, O)
    b_seed = d_wih @ pj_b + d_b                      # (4H, 1)

    if use_bf16_weights:
        # v6e/v7x: halve MXU operand push bandwidth on the latency-bound
        # recurrence; biases and accumulation stay f32.
        cast = lambda a: a.astype(jnp.bfloat16)
        e_wih, e_whh, d_whh = cast(e_wih), cast(e_whh), cast(d_whh)
        w_seed, d_wrec, fc_w = cast(w_seed), cast(d_wrec), cast(fc_w)

    # ---- batch tiling: batch lives on the 128-lane axis ---------------------
    if block_b is not None:
        TB = block_b
    else:
        B128 = _ceil_to(B, 128)
        if B128 <= 128:
            TB = 128        # single tile; padded lanes stay zero (finite math)
        elif B128 < 512:
            TB = 128        # >= 2 tiles so v7x can split across its 2 TCs
        else:
            TB = 256        # big batch: amortize ~0.35us/grid-step overhead
    B_pad = _ceil_to(max(B, TB), TB)
    n_tiles = B_pad // TB

    # (B, T, F) -> (T, F, B_pad); seed -> (O, B_pad).  Padding stays zeros.
    src_t = jnp.transpose(src.astype(jnp.float32), (1, 2, 0))
    dec_in0 = jnp.transpose(src[:, -1, :][:, jnp.array([0, 2])]).astype(jnp.float32)
    if B_pad != B:
        src_t = jnp.pad(src_t, ((0, 0), (0, 0), (0, B_pad - B)))
        dec_in0 = jnp.pad(dec_in0, ((0, 0), (0, B_pad - B)))

    weights = (e_wih, e_whh, e_b, d_whh, w_seed, b_seed, d_wrec, d_brec,
               fc_w, fc_b)
    weight_bytes = sum(int(np.prod(a.shape)) * a.dtype.itemsize for a in weights)
    # Explicit scoped-VMEM budget (v5e default is only 16 MiB; v7x has 64 MiB
    # physical): double-buffered src/seed/out blocks + enc_gx scratch + weights.
    need = (2 * T * F * TB * 4 + 2 * O * TB * 4 + 2 * W * O * TB * 4
            + T * 4 * H * TB * 4 + 2 * weight_bytes)
    vmem_limit = int(min(max(need + (4 << 20), 32 << 20), 64 << 20))

    def full_spec(a):
        return pl.BlockSpec(a.shape, lambda b, _nd=a.ndim: (0,) * _nd)

    out = pl.pallas_call(
        forecast_kernel,
        out_shape=jax.ShapeDtypeStruct((W, O, B_pad), jnp.float32),
        grid=(n_tiles,),
        in_specs=[
            pl.BlockSpec((T, F, TB), lambda b: (0, 0, b)),   # src (time-major)
            pl.BlockSpec((O, TB), lambda b: (0, b)),         # decoder seed
            full_spec(e_wih), full_spec(e_whh), full_spec(e_b),
            full_spec(d_whh), full_spec(w_seed), full_spec(b_seed),
            full_spec(d_wrec), full_spec(d_brec),
            full_spec(fc_w), full_spec(fc_b),
        ],
        out_specs=pl.BlockSpec((W, O, TB), lambda b: (0, 0, b)),
        scratch_shapes=[pltpu.VMEM((T, 4 * H, TB), jnp.float32)],
        compiler_params=pltpu.CompilerParams(
            dimension_semantics=("parallel",),   # batch tiles across TCs (v7x)
            vmem_limit_bytes=vmem_limit),
    )(src_t, dec_in0, *weights)

    # (W, O, B_pad) -> (B, W, O)
    return jnp.transpose(out[:, :, :B], (2, 0, 1))


def reference_forward(src, params, output_window):
    """Pure-JAX reference with identical math (mirrors the PyTorch module)."""
    B, T, F = src.shape
    H = params["e_whh"].shape[1]

    def lstm_step(x, h, c, w_ih, w_hh, b_ih, b_hh):
        gates = x @ w_ih.T + b_ih + h @ w_hh.T + b_hh
        i = jax.nn.sigmoid(gates[:, :H])
        f = jax.nn.sigmoid(gates[:, H:2 * H])
        g = jnp.tanh(gates[:, 2 * H:3 * H])
        o = jax.nn.sigmoid(gates[:, 3 * H:])
        c = f * c + i * g
        h = o * jnp.tanh(c)
        return h, c

    h = jnp.zeros((B, H), jnp.float32)
    c = jnp.zeros((B, H), jnp.float32)
    for t in range(T):
        h, c = lstm_step(src[:, t, :], h, c,
                         params["e_wih"], params["e_whh"],
                         params["e_bih"], params["e_bhh"])

    dec_in = src[:, -1, :][:, jnp.array([0, 2])]
    outs = []
    for _ in range(output_window):
        x = dec_in @ params["pj_w"].T + params["pj_b"]
        h, c = lstm_step(x, h, c,
                         params["d_wih"], params["d_whh"],
                         params["d_bih"], params["d_bhh"])
        pred = h @ params["fc_w"].T + params["fc_b"]
        outs.append(pred[:, None, :])
        dec_in = pred
    return jnp.concatenate(outs, axis=1)


if __name__ == "__main__":
    # Small shapes consistent with the module's forward pass.
    B, T = 2, 8
    F, H, O, W = 4, 32, 2, 4   # num_features, hidden_size, output_dim, output_window

    key = jax.random.PRNGKey(0)
    keys = jax.random.split(key, 13)
    k_lstm = 1.0 / np.sqrt(H)

    def u(kk, shape, bound):
        return jax.random.uniform(kk, shape, jnp.float32, -bound, bound)

    params = dict(
        e_wih=u(keys[0], (4 * H, F), k_lstm), e_whh=u(keys[1], (4 * H, H), k_lstm),
        e_bih=u(keys[2], (4 * H,), k_lstm),   e_bhh=u(keys[3], (4 * H,), k_lstm),
        d_wih=u(keys[4], (4 * H, F), k_lstm), d_whh=u(keys[5], (4 * H, H), k_lstm),
        d_bih=u(keys[6], (4 * H,), k_lstm),   d_bhh=u(keys[7], (4 * H,), k_lstm),
        fc_w=u(keys[8], (O, H), 1.0 / np.sqrt(H)),
        fc_b=u(keys[9], (O,), 1.0 / np.sqrt(H)),
        pj_w=u(keys[10], (F, O), 1.0 / np.sqrt(O)),
        pj_b=u(keys[11], (F,), 1.0 / np.sqrt(O)),
    )
    src = jax.random.normal(keys[12], (B, T, F), jnp.float32)

    ref = reference_forward(src, params, W)

    # f32 path: tight tolerance so the fc->proj folding is actually verified.
    out = jax.block_until_ready(forecast_net_forward(src, params, W))
    assert out.shape == (B, W, O)
    np.testing.assert_allclose(np.asarray(out), np.asarray(ref),
                               rtol=1e-3, atol=1e-3)

    # bf16-weight path (v6e/v7x MXU operands; accumulation stays f32).
    out_bf16 = jax.block_until_ready(
        forecast_net_forward(src, params, W, use_bf16_weights=True))
    np.testing.assert_allclose(np.asarray(out_bf16), np.asarray(ref),
                               rtol=5e-2, atol=5e-2)

    print("KERNEL_OK")
</pallas_src>

<mosaic_0001>
module attributes {stable_mosaic.version = 11 : i64} {
  func.func @forecast_kernel(%arg0: i32, %arg1: memref<8x4x128xf32, #tpu.memory_space<vmem>>, %arg2: memref<2x128xf32, #tpu.memory_space<vmem>>, %arg3: memref<128x4xf32, #tpu.memory_space<vmem>>, %arg4: memref<128x32xf32, #tpu.memory_space<vmem>>, %arg5: memref<128x1xf32, #tpu.memory_space<vmem>>, %arg6: memref<128x32xf32, #tpu.memory_space<vmem>>, %arg7: memref<128x2xf32, #tpu.memory_space<vmem>>, %arg8: memref<128x1xf32, #tpu.memory_space<vmem>>, %arg9: memref<128x32xf32, #tpu.memory_space<vmem>>, %arg10: memref<128x1xf32, #tpu.memory_space<vmem>>, %arg11: memref<2x32xf32, #tpu.memory_space<vmem>>, %arg12: memref<2x1xf32, #tpu.memory_space<vmem>>, %arg13: memref<4x2x128xf32, #tpu.memory_space<vmem>>, %arg14: memref<8x128x128xf32, #tpu.memory_space<vmem>>) attributes {dimension_semantics = [#tpu.dimension_semantics<parallel>], iteration_bounds = array<i64: 1>, scalar_prefetch = 0 : i64, scratch_operands = 1 : i64, tpu.core_type = #tpu.core_type<tc>, window_params = [{transform_indices = @transform_0, window_bounds = array<i64: 8, 4, 128>}, {transform_indices = @transform_1, window_bounds = array<i64: 2, 128>}, {pipeline_mode = #tpu.pipeline_mode<synchronous>, transform_indices = @transform_2, window_bounds = array<i64: 128, 4>}, {pipeline_mode = #tpu.pipeline_mode<synchronous>, transform_indices = @transform_3, window_bounds = array<i64: 128, 32>}, {pipeline_mode = #tpu.pipeline_mode<synchronous>, transform_indices = @transform_4, window_bounds = array<i64: 128, 1>}, {pipeline_mode = #tpu.pipeline_mode<synchronous>, transform_indices = @transform_5, window_bounds = array<i64: 128, 32>}, {pipeline_mode = #tpu.pipeline_mode<synchronous>, transform_indices = @transform_6, window_bounds = array<i64: 128, 2>}, {pipeline_mode = #tpu.pipeline_mode<synchronous>, transform_indices = @transform_7, window_bounds = array<i64: 128, 1>}, {pipeline_mode = #tpu.pipeline_mode<synchronous>, transform_indices = @transform_8, window_bounds = array<i64: 128, 32>}, {pipeline_mode = #tpu.pipeline_mode<synchronous>, transform_indices = @transform_9, window_bounds = array<i64: 128, 1>}, {pipeline_mode = #tpu.pipeline_mode<synchronous>, transform_indices = @transform_10, window_bounds = array<i64: 2, 32>}, {pipeline_mode = #tpu.pipeline_mode<synchronous>, transform_indices = @transform_11, window_bounds = array<i64: 2, 1>}, {transform_indices = @transform_12, window_bounds = array<i64: 4, 2, 128>}]} {
    %c0 = arith.constant 0 : index
    %c0_0 = arith.constant 0 : index
    %0 = vector.load %arg3[%c0, %c0_0] : memref<128x4xf32, #tpu.memory_space<vmem>>, vector<128x4xf32>
    %c0_1 = arith.constant 0 : index
    %c0_2 = arith.constant 0 : index
    %1 = vector.load %arg4[%c0_1, %c0_2] : memref<128x32xf32, #tpu.memory_space<vmem>>, vector<128x32xf32>
    %c0_3 = arith.constant 0 : index
    %c0_4 = arith.constant 0 : index
    %2 = vector.load %arg6[%c0_3, %c0_4] : memref<128x32xf32, #tpu.memory_space<vmem>>, vector<128x32xf32>
    %c0_5 = arith.constant 0 : index
    %c0_6 = arith.constant 0 : index
    %3 = vector.load %arg7[%c0_5, %c0_6] : memref<128x2xf32, #tpu.memory_space<vmem>>, vector<128x2xf32>
    %c0_7 = arith.constant 0 : index
    %c0_8 = arith.constant 0 : index
    %4 = vector.load %arg9[%c0_7, %c0_8] : memref<128x32xf32, #tpu.memory_space<vmem>>, vector<128x32xf32>
    %c0_9 = arith.constant 0 : index
    %c0_10 = arith.constant 0 : index
    %5 = vector.load %arg11[%c0_9, %c0_10] : memref<2x32xf32, #tpu.memory_space<vmem>>, vector<2x32xf32>
    %c0_11 = arith.constant 0 : index
    %c0_12 = arith.constant 0 : index
    %6 = vector.load %arg5[%c0_11, %c0_12] : memref<128x1xf32, #tpu.memory_space<vmem>>, vector<128x1xf32>
    %7 = vector.shape_cast %6 : vector<128x1xf32> to vector<128x1xf32>
    %8 = vector.broadcast %7 : vector<128x1xf32> to vector<128x128xf32>
    %c0_13 = arith.constant 0 : index
    %c0_14 = arith.constant 0 : index
    %9 = vector.load %arg8[%c0_13, %c0_14] : memref<128x1xf32, #tpu.memory_space<vmem>>, vector<128x1xf32>
    %10 = vector.shape_cast %9 : vector<128x1xf32> to vector<128x1xf32>
    %11 = vector.broadcast %10 : vector<128x1xf32> to vector<128x128xf32>
    %c0_15 = arith.constant 0 : index
    %c0_16 = arith.constant 0 : index
    %12 = vector.load %arg10[%c0_15, %c0_16] : memref<128x1xf32, #tpu.memory_space<vmem>>, vector<128x1xf32>
    %13 = vector.shape_cast %12 : vector<128x1xf32> to vector<128x1xf32>
    %14 = vector.broadcast %13 : vector<128x1xf32> to vector<128x128xf32>
    %c0_17 = arith.constant 0 : index
    %c0_18 = arith.constant 0 : index
    %15 = vector.load %arg12[%c0_17, %c0_18] : memref<2x1xf32, #tpu.memory_space<vmem>>, vector<2x1xf32>
    %16 = vector.shape_cast %15 : vector<2x1xf32> to vector<2x1xf32>
    %17 = vector.broadcast %16 : vector<2x1xf32> to vector<2x128xf32>
    %c0_i32 = arith.constant 0 : i32
    %18 = arith.index_cast %c0_i32 : i32 to index
    %c0_19 = arith.constant 0 : index
    %c0_20 = arith.constant 0 : index
    %19 = vector.load %arg1[%18, %c0_19, %c0_20] : memref<8x4x128xf32, #tpu.memory_space<vmem>>, vector<1x4x128xf32>
    %20 = vector.shape_cast %19 : vector<1x4x128xf32> to vector<4x128xf32>
    %cst = arith.constant dense<0.000000e+00> : vector<128x128xf32>
    %21 = tpu.matmul %0, %20, %cst {dimension_numbers = #tpu.dot_dimension_numbers<[1], [0], [0], [1], [0, 0, 1, 1], [], []>} : vector<128x4xf32>, vector<4x128xf32>, vector<128x128xf32> -> vector<128x128xf32>
    %22 = arith.addf %21, %8 : vector<128x128xf32>
    %23 = arith.index_cast %c0_i32 : i32 to index
    %c0_21 = arith.constant 0 : index
    %c0_22 = arith.constant 0 : index
    %24 = vector.load %arg14[%23, %c0_21, %c0_22] : memref<8x128x128xf32, #tpu.memory_space<vmem>>, vector<1x128x128xf32>
    %25 = vector.shape_cast %24 : vector<1x128x128xf32> to vector<128x128xf32>
    %26 = vector.shape_cast %22 : vector<128x128xf32> to vector<1x128x128xf32>
    tpu.vector_store %arg14[%23, %c0_21, %c0_22], %26 {strides = array<i32>} : memref<8x128x128xf32, #tpu.memory_space<vmem>>, vector<1x128x128xf32>,
    %c1_i32 = arith.constant 1 : i32
    %27 = arith.index_cast %c1_i32 : i32 to index
    %c0_23 = arith.constant 0 : index
    %c0_24 = arith.constant 0 : index
    %28 = vector.load %arg1[%27, %c0_23, %c0_24] : memref<8x4x128xf32, #tpu.memory_space<vmem>>, vector<1x4x128xf32>
    %29 = vector.shape_cast %28 : vector<1x4x128xf32> to vector<4x128xf32>
    %cst_25 = arith.constant dense<0.000000e+00> : vector<128x128xf32>
    %30 = tpu.matmul %0, %29, %cst_25 {dimension_numbers = #tpu.dot_dimension_numbers<[1], [0], [0], [1], [0, 0, 1, 1], [], []>} : vector<128x4xf32>, vector<4x128xf32>, vector<128x128xf32> -> vector<128x128xf32>
    %31 = arith.addf %30, %8 : vector<128x128xf32>
    %32 = arith.index_cast %c1_i32 : i32 to index
    %c0_26 = arith.constant 0 : index
    %c0_27 = arith.constant 0 : index
    %33 = vector.load %arg14[%32, %c0_26, %c0_27] : memref<8x128x128xf32, #tpu.memory_space<vmem>>, vector<1x128x128xf32>
    %34 = vector.shape_cast %33 : vector<1x128x128xf32> to vector<128x128xf32>
    %35 = vector.shape_cast %31 : vector<128x128xf32> to vector<1x128x128xf32>
    tpu.vector_store %arg14[%32, %c0_26, %c0_27], %35 {strides = array<i32>} : memref<8x128x128xf32, #tpu.memory_space<vmem>>, vector<1x128x128xf32>,
    %c2_i32 = arith.constant 2 : i32
    %36 = arith.index_cast %c2_i32 : i32 to index
    %c0_28 = arith.constant 0 : index
    %c0_29 = arith.constant 0 : index
    %37 = vector.load %arg1[%36, %c0_28, %c0_29] : memref<8x4x128xf32, #tpu.memory_space<vmem>>, vector<1x4x128xf32>
    %38 = vector.shape_cast %37 : vector<1x4x128xf32> to vector<4x128xf32>
    %cst_30 = arith.constant dense<0.000000e+00> : vector<128x128xf32>
    %39 = tpu.matmul %0, %38, %cst_30 {dimension_numbers = #tpu.dot_dimension_numbers<[1], [0], [0], [1], [0, 0, 1, 1], [], []>} : vector<128x4xf32>, vector<4x128xf32>, vector<128x128xf32> -> vector<128x128xf32>
    %40 = arith.addf %39, %8 : vector<128x128xf32>
    %41 = arith.index_cast %c2_i32 : i32 to index
    %c0_31 = arith.constant 0 : index
    %c0_32 = arith.constant 0 : index
    %42 = vector.load %arg14[%41, %c0_31, %c0_32] : memref<8x128x128xf32, #tpu.memory_space<vmem>>, vector<1x128x128xf32>
    %43 = vector.shape_cast %42 : vector<1x128x128xf32> to vector<128x128xf32>
    %44 = vector.shape_cast %40 : vector<128x128xf32> to vector<1x128x128xf32>
    tpu.vector_store %arg14[%41, %c0_31, %c0_32], %44 {strides = array<i32>} : memref<8x128x128xf32, #tpu.memory_space<vmem>>, vector<1x128x128xf32>,
    %c3_i32 = arith.constant 3 : i32
    %45 = arith.index_cast %c3_i32 : i32 to index
    %c0_33 = arith.constant 0 : index
    %c0_34 = arith.constant 0 : index
    %46 = vector.load %arg1[%45, %c0_33, %c0_34] : memref<8x4x128xf32, #tpu.memory_space<vmem>>, vector<1x4x128xf32>
    %47 = vector.shape_cast %46 : vector<1x4x128xf32> to vector<4x128xf32>
    %cst_35 = arith.constant dense<0.000000e+00> : vector<128x128xf32>
    %48 = tpu.matmul %0, %47, %cst_35 {dimension_numbers = #tpu.dot_dimension_numbers<[1], [0], [0], [1], [0, 0, 1, 1], [], []>} : vector<128x4xf32>, vector<4x128xf32>, vector<128x128xf32> -> vector<128x128xf32>
    %49 = arith.addf %48, %8 : vector<128x128xf32>
    %50 = arith.index_cast %c3_i32 : i32 to index
    %c0_36 = arith.constant 0 : index
    %c0_37 = arith.constant 0 : index
    %51 = vector.load %arg14[%50, %c0_36, %c0_37] : memref<8x128x128xf32, #tpu.memory_space<vmem>>, vector<1x128x128xf32>
    %52 = vector.shape_cast %51 : vector<1x128x128xf32> to vector<128x128xf32>
    %53 = vector.shape_cast %49 : vector<128x128xf32> to vector<1x128x128xf32>
    tpu.vector_store %arg14[%50, %c0_36, %c0_37], %53 {strides = array<i32>} : memref<8x128x128xf32, #tpu.memory_space<vmem>>, vector<1x128x128xf32>,
    %c4_i32 = arith.constant 4 : i32
    %54 = arith.index_cast %c4_i32 : i32 to index
    %c0_38 = arith.constant 0 : index
    %c0_39 = arith.constant 0 : index
    %55 = vector.load %arg1[%54, %c0_38, %c0_39] : memref<8x4x128xf32, #tpu.memory_space<vmem>>, vector<1x4x128xf32>
    %56 = vector.shape_cast %55 : vector<1x4x128xf32> to vector<4x128xf32>
    %cst_40 = arith.constant dense<0.000000e+00> : vector<128x128xf32>
    %57 = tpu.matmul %0, %56, %cst_40 {dimension_numbers = #tpu.dot_dimension_numbers<[1], [0], [0], [1], [0, 0, 1, 1], [], []>} : vector<128x4xf32>, vector<4x128xf32>, vector<128x128xf32> -> vector<128x128xf32>
    %58 = arith.addf %57, %8 : vector<128x128xf32>
    %59 = arith.index_cast %c4_i32 : i32 to index
    %c0_41 = arith.constant 0 : index
    %c0_42 = arith.constant 0 : index
    %60 = vector.load %arg14[%59, %c0_41, %c0_42] : memref<8x128x128xf32, #tpu.memory_space<vmem>>, vector<1x128x128xf32>
    %61 = vector.shape_cast %60 : vector<1x128x128xf32> to vector<128x128xf32>
    %62 = vector.shape_cast %58 : vector<128x128xf32> to vector<1x128x128xf32>
    tpu.vector_store %arg14[%59, %c0_41, %c0_42], %62 {strides = array<i32>} : memref<8x128x128xf32, #tpu.memory_space<vmem>>, vector<1x128x128xf32>,
    %c5_i32 = arith.constant 5 : i32
    %63 = arith.index_cast %c5_i32 : i32 to index
    %c0_43 = arith.constant 0 : index
    %c0_44 = arith.constant 0 : index
    %64 = vector.load %arg1[%63, %c0_43, %c0_44] : memref<8x4x128xf32, #tpu.memory_space<vmem>>, vector<1x4x128xf32>
    %65 = vector.shape_cast %64 : vector<1x4x128xf32> to vector<4x128xf32>
    %cst_45 = arith.constant dense<0.000000e+00> : vector<128x128xf32>
    %66 = tpu.matmul %0, %65, %cst_45 {dimension_numbers = #tpu.dot_dimension_numbers<[1], [0], [0], [1], [0, 0, 1, 1], [], []>} : vector<128x4xf32>, vector<4x128xf32>, vector<128x128xf32> -> vector<128x128xf32>
    %67 = arith.addf %66, %8 : vector<128x128xf32>
    %68 = arith.index_cast %c5_i32 : i32 to index
    %c0_46 = arith.constant 0 : index
    %c0_47 = arith.constant 0 : index
    %69 = vector.load %arg14[%68, %c0_46, %c0_47] : memref<8x128x128xf32, #tpu.memory_space<vmem>>, vector<1x128x128xf32>
    %70 = vector.shape_cast %69 : vector<1x128x128xf32> to vector<128x128xf32>
    %71 = vector.shape_cast %67 : vector<128x128xf32> to vector<1x128x128xf32>
    tpu.vector_store %arg14[%68, %c0_46, %c0_47], %71 {strides = array<i32>} : memref<8x128x128xf32, #tpu.memory_space<vmem>>, vector<1x128x128xf32>,
    %c6_i32 = arith.constant 6 : i32
    %72 = arith.index_cast %c6_i32 : i32 to index
    %c0_48 = arith.constant 0 : index
    %c0_49 = arith.constant 0 : index
    %73 = vector.load %arg1[%72, %c0_48, %c0_49] : memref<8x4x128xf32, #tpu.memory_space<vmem>>, vector<1x4x128xf32>
    %74 = vector.shape_cast %73 : vector<1x4x128xf32> to vector<4x128xf32>
    %cst_50 = arith.constant dense<0.000000e+00> : vector<128x128xf32>
    %75 = tpu.matmul %0, %74, %cst_50 {dimension_numbers = #tpu.dot_dimension_numbers<[1], [0], [0], [1], [0, 0, 1, 1], [], []>} : vector<128x4xf32>, vector<4x128xf32>, vector<128x128xf32> -> vector<128x128xf32>
    %76 = arith.addf %75, %8 : vector<128x128xf32>
    %77 = arith.index_cast %c6_i32 : i32 to index
    %c0_51 = arith.constant 0 : index
    %c0_52 = arith.constant 0 : index
    %78 = vector.load %arg14[%77, %c0_51, %c0_52] : memref<8x128x128xf32, #tpu.memory_space<vmem>>, vector<1x128x128xf32>
    %79 = vector.shape_cast %78 : vector<1x128x128xf32> to vector<128x128xf32>
    %80 = vector.shape_cast %76 : vector<128x128xf32> to vector<1x128x128xf32>
    tpu.vector_store %arg14[%77, %c0_51, %c0_52], %80 {strides = array<i32>} : memref<8x128x128xf32, #tpu.memory_space<vmem>>, vector<1x128x128xf32>,
    %c7_i32 = arith.constant 7 : i32
    %81 = arith.index_cast %c7_i32 : i32 to index
    %c0_53 = arith.constant 0 : index
    %c0_54 = arith.constant 0 : index
    %82 = vector.load %arg1[%81, %c0_53, %c0_54] : memref<8x4x128xf32, #tpu.memory_space<vmem>>, vector<1x4x128xf32>
    %83 = vector.shape_cast %82 : vector<1x4x128xf32> to vector<4x128xf32>
    %cst_55 = arith.constant dense<0.000000e+00> : vector<128x128xf32>
    %84 = tpu.matmul %0, %83, %cst_55 {dimension_numbers = #tpu.dot_dimension_numbers<[1], [0], [0], [1], [0, 0, 1, 1], [], []>} : vector<128x4xf32>, vector<4x128xf32>, vector<128x128xf32> -> vector<128x128xf32>
    %85 = arith.addf %84, %8 : vector<128x128xf32>
    %86 = arith.index_cast %c7_i32 : i32 to index
    %c0_56 = arith.constant 0 : index
    %c0_57 = arith.constant 0 : index
    %87 = vector.load %arg14[%86, %c0_56, %c0_57] : memref<8x128x128xf32, #tpu.memory_space<vmem>>, vector<1x128x128xf32>
    %88 = vector.shape_cast %87 : vector<1x128x128xf32> to vector<128x128xf32>
    %89 = vector.shape_cast %85 : vector<128x128xf32> to vector<1x128x128xf32>
    tpu.vector_store %arg14[%86, %c0_56, %c0_57], %89 {strides = array<i32>} : memref<8x128x128xf32, #tpu.memory_space<vmem>>, vector<1x128x128xf32>,
    %c8_i32 = arith.constant 8 : i32
    %cst_58 = arith.constant 0.000000e+00 : f32
    %90 = vector.broadcast %cst_58 : f32 to vector<32x128xf32>
    %cst_59 = arith.constant 0.000000e+00 : f32
    %91 = vector.broadcast %cst_59 : f32 to vector<32x128xf32>
    %c0_i32_60 = arith.constant 0 : i32
    %92 = arith.index_cast %c0_i32_60 : i32 to index
    %c0_61 = arith.constant 0 : index
    %c0_62 = arith.constant 0 : index
    %93 = vector.load %arg14[%92, %c0_61, %c0_62] : memref<8x128x128xf32, #tpu.memory_space<vmem>>, vector<1x128x128xf32>
    %94 = vector.shape_cast %93 : vector<1x128x128xf32> to vector<128x128xf32>
    %cst_63 = arith.constant dense<0.000000e+00> : vector<128x128xf32>
    %95 = tpu.matmul %1, %90, %cst_63 {dimension_numbers = #tpu.dot_dimension_numbers<[1], [0], [0], [1], [0, 0, 1, 1], [], []>} : vector<128x32xf32>, vector<32x128xf32>, vector<128x128xf32> -> vector<128x128xf32>
    %96 = arith.addf %94, %95 : vector<128x128xf32>
    %97 = vector.extract_strided_slice %96 {offsets = [0, 0], sizes = [96, 128], strides = [1, 1]} : vector<128x128xf32> to vector<96x128xf32>
    %cst_64 = arith.constant 5.000000e-01 : f32
    %98 = vector.broadcast %cst_64 : f32 to vector<96x128xf32>
    %99 = arith.mulf %98, %97 : vector<96x128xf32>
    %100 = math.tanh %99 : vector<96x128xf32>
    %cst_65 = arith.constant 5.000000e-01 : f32
    %101 = vector.broadcast %cst_65 : f32 to vector<96x128xf32>
    %102 = arith.mulf %101, %100 : vector<96x128xf32>
    %cst_66 = arith.constant 5.000000e-01 : f32
    %103 = vector.broadcast %cst_66 : f32 to vector<96x128xf32>
    %104 = arith.addf %102, %103 : vector<96x128xf32>
    %105 = vector.extract_strided_slice %96 {offsets = [96, 0], sizes = [32, 128], strides = [1, 1]} : vector<128x128xf32> to vector<32x128xf32>
    %106 = math.tanh %105 : vector<32x128xf32>
    %107 = vector.extract_strided_slice %104 {offsets = [0, 0], sizes = [32, 128], strides = [1, 1]} : vector<96x128xf32> to vector<32x128xf32>
    %108 = vector.extract_strided_slice %104 {offsets = [32, 0], sizes = [32, 128], strides = [1, 1]} : vector<96x128xf32> to vector<32x128xf32>
    %109 = vector.extract_strided_slice %104 {offsets = [64, 0], sizes = [32, 128], strides = [1, 1]} : vector<96x128xf32> to vector<32x128xf32>
    %110 = arith.mulf %108, %91 : vector<32x128xf32>
    %111 = arith.mulf %107, %106 : vector<32x128xf32>
    %112 = arith.addf %110, %111 : vector<32x128xf32>
    %113 = math.tanh %112 : vector<32x128xf32>
    %114 = arith.mulf %109, %113 : vector<32x128xf32>
    %c1_i32_67 = arith.constant 1 : i32
    %115 = arith.index_cast %c1_i32_67 : i32 to index
    %c0_68 = arith.constant 0 : index
    %c0_69 = arith.constant 0 : index
    %116 = vector.load %arg14[%115, %c0_68, %c0_69] : memref<8x128x128xf32, #tpu.memory_space<vmem>>, vector<1x128x128xf32>
    %117 = vector.shape_cast %116 : vector<1x128x128xf32> to vector<128x128xf32>
    %cst_70 = arith.constant dense<0.000000e+00> : vector<128x128xf32>
    %118 = tpu.matmul %1, %114, %cst_70 {dimension_numbers = #tpu.dot_dimension_numbers<[1], [0], [0], [1], [0, 0, 1, 1], [], []>} : vector<128x32xf32>, vector<32x128xf32>, vector<128x128xf32> -> vector<128x128xf32>
    %119 = arith.addf %117, %118 : vector<128x128xf32>
    %120 = vector.extract_strided_slice %119 {offsets = [0, 0], sizes = [96, 128], strides = [1, 1]} : vector<128x128xf32> to vector<96x128xf32>
    %cst_71 = arith.constant 5.000000e-01 : f32
    %121 = vector.broadcast %cst_71 : f32 to vector<96x128xf32>
    %122 = arith.mulf %121, %120 : vector<96x128xf32>
    %123 = math.tanh %122 : vector<96x128xf32>
    %cst_72 = arith.constant 5.000000e-01 : f32
    %124 = vector.broadcast %cst_72 : f32 to vector<96x128xf32>
    %125 = arith.mulf %124, %123 : vector<96x128xf32>
    %cst_73 = arith.constant 5.000000e-01 : f32
    %126 = vector.broadcast %cst_73 : f32 to vector<96x128xf32>
    %127 = arith.addf %125, %126 : vector<96x128xf32>
    %128 = vector.extract_strided_slice %119 {offsets = [96, 0], sizes = [32, 128], strides = [1, 1]} : vector<128x128xf32> to vector<32x128xf32>
    %129 = math.tanh %128 : vector<32x128xf32>
    %130 = vector.extract_strided_slice %127 {offsets = [0, 0], sizes = [32, 128], strides = [1, 1]} : vector<96x128xf32> to vector<32x128xf32>
    %131 = vector.extract_strided_slice %127 {offsets = [32, 0], sizes = [32, 128], strides = [1, 1]} : vector<96x128xf32> to vector<32x128xf32>
    %132 = vector.extract_strided_slice %127 {offsets = [64, 0], sizes = [32, 128], strides = [1, 1]} : vector<96x128xf32> to vector<32x128xf32>
    %133 = arith.mulf %131, %112 : vector<32x128xf32>
    %134 = arith.mulf %130, %129 : vector<32x128xf32>
    %135 = arith.addf %133, %134 : vector<32x128xf32>
    %136 = math.tanh %135 : vector<32x128xf32>
    %137 = arith.mulf %132, %136 : vector<32x128xf32>
    %c2_i32_74 = arith.constant 2 : i32
    %138 = arith.index_cast %c2_i32_74 : i32 to index
    %c0_75 = arith.constant 0 : index
    %c0_76 = arith.constant 0 : index
    %139 = vector.load %arg14[%138, %c0_75, %c0_76] : memref<8x128x128xf32, #tpu.memory_space<vmem>>, vector<1x128x128xf32>
    %140 = vector.shape_cast %139 : vector<1x128x128xf32> to vector<128x128xf32>
    %cst_77 = arith.constant dense<0.000000e+00> : vector<128x128xf32>
    %141 = tpu.matmul %1, %137, %cst_77 {dimension_numbers = #tpu.dot_dimension_numbers<[1], [0], [0], [1], [0, 0, 1, 1], [], []>} : vector<128x32xf32>, vector<32x128xf32>, vector<128x128xf32> -> vector<128x128xf32>
    %142 = arith.addf %140, %141 : vector<128x128xf32>
    %143 = vector.extract_strided_slice %142 {offsets = [0, 0], sizes = [96, 128], strides = [1, 1]} : vector<128x128xf32> to vector<96x128xf32>
    %cst_78 = arith.constant 5.000000e-01 : f32
    %144 = vector.broadcast %cst_78 : f32 to vector<96x128xf32>
    %145 = arith.mulf %144, %143 : vector<96x128xf32>
    %146 = math.tanh %145 : vector<96x128xf32>
    %cst_79 = arith.constant 5.000000e-01 : f32
    %147 = vector.broadcast %cst_79 : f32 to vector<96x128xf32>
    %148 = arith.mulf %147, %146 : vector<96x128xf32>
    %cst_80 = arith.constant 5.000000e-01 : f32
    %149 = vector.broadcast %cst_80 : f32 to vector<96x128xf32>
    %150 = arith.addf %148, %149 : vector<96x128xf32>
    %151 = vector.extract_strided_slice %142 {offsets = [96, 0], sizes = [32, 128], strides = [1, 1]} : vector<128x128xf32> to vector<32x128xf32>
    %152 = math.tanh %151 : vector<32x128xf32>
    %153 = vector.extract_strided_slice %150 {offsets = [0, 0], sizes = [32, 128], strides = [1, 1]} : vector<96x128xf32> to vector<32x128xf32>
    %154 = vector.extract_strided_slice %150 {offsets = [32, 0], sizes = [32, 128], strides = [1, 1]} : vector<96x128xf32> to vector<32x128xf32>
    %155 = vector.extract_strided_slice %150 {offsets = [64, 0], sizes = [32, 128], strides = [1, 1]} : vector<96x128xf32> to vector<32x128xf32>
    %156 = arith.mulf %154, %135 : vector<32x128xf32>
    %157 = arith.mulf %153, %152 : vector<32x128xf32>
    %158 = arith.addf %156, %157 : vector<32x128xf32>
    %159 = math.tanh %158 : vector<32x128xf32>
    %160 = arith.mulf %155, %159 : vector<32x128xf32>
    %c3_i32_81 = arith.constant 3 : i32
    %161 = arith.index_cast %c3_i32_81 : i32 to index
    %c0_82 = arith.constant 0 : index
    %c0_83 = arith.constant 0 : index
    %162 = vector.load %arg14[%161, %c0_82, %c0_83] : memref<8x128x128xf32, #tpu.memory_space<vmem>>, vector<1x128x128xf32>
    %163 = vector.shape_cast %162 : vector<1x128x128xf32> to vector<128x128xf32>
    %cst_84 = arith.constant dense<0.000000e+00> : vector<128x128xf32>
    %164 = tpu.matmul %1, %160, %cst_84 {dimension_numbers = #tpu.dot_dimension_numbers<[1], [0], [0], [1], [0, 0, 1, 1], [], []>} : vector<128x32xf32>, vector<32x128xf32>, vector<128x128xf32> -> vector<128x128xf32>
    %165 = arith.addf %163, %164 : vector<128x128xf32>
    %166 = vector.extract_strided_slice %165 {offsets = [0, 0], sizes = [96, 128], strides = [1, 1]} : vector<128x128xf32> to vector<96x128xf32>
    %cst_85 = arith.constant 5.000000e-01 : f32
    %167 = vector.broadcast %cst_85 : f32 to vector<96x128xf32>
    %168 = arith.mulf %167, %166 : vector<96x128xf32>
    %169 = math.tanh %168 : vector<96x128xf32>
    %cst_86 = arith.constant 5.000000e-01 : f32
    %170 = vector.broadcast %cst_86 : f32 to vector<96x128xf32>
    %171 = arith.mulf %170, %169 : vector<96x128xf32>
    %cst_87 = arith.constant 5.000000e-01 : f32
    %172 = vector.broadcast %cst_87 : f32 to vector<96x128xf32>
    %173 = arith.addf %171, %172 : vector<96x128xf32>
    %174 = vector.extract_strided_slice %165 {offsets = [96, 0], sizes = [32, 128], strides = [1, 1]} : vector<128x128xf32> to vector<32x128xf32>
    %175 = math.tanh %174 : vector<32x128xf32>
    %176 = vector.extract_strided_slice %173 {offsets = [0, 0], sizes = [32, 128], strides = [1, 1]} : vector<96x128xf32> to vector<32x128xf32>
    %177 = vector.extract_strided_slice %173 {offsets = [32, 0], sizes = [32, 128], strides = [1, 1]} : vector<96x128xf32> to vector<32x128xf32>
    %178 = vector.extract_strided_slice %173 {offsets = [64, 0], sizes = [32, 128], strides = [1, 1]} : vector<96x128xf32> to vector<32x128xf32>
    %179 = arith.mulf %177, %158 : vector<32x128xf32>
    %180 = arith.mulf %176, %175 : vector<32x128xf32>
    %181 = arith.addf %179, %180 : vector<32x128xf32>
    %182 = math.tanh %181 : vector<32x128xf32>
    %183 = arith.mulf %178, %182 : vector<32x128xf32>
    %c4_i32_88 = arith.constant 4 : i32
    %184 = arith.index_cast %c4_i32_88 : i32 to index
    %c0_89 = arith.constant 0 : index
    %c0_90 = arith.constant 0 : index
    %185 = vector.load %arg14[%184, %c0_89, %c0_90] : memref<8x128x128xf32, #tpu.memory_space<vmem>>, vector<1x128x128xf32>
    %186 = vector.shape_cast %185 : vector<1x128x128xf32> to vector<128x128xf32>
    %cst_91 = arith.constant dense<0.000000e+00> : vector<128x128xf32>
    %187 = tpu.matmul %1, %183, %cst_91 {dimension_numbers = #tpu.dot_dimension_numbers<[1], [0], [0], [1], [0, 0, 1, 1], [], []>} : vector<128x32xf32>, vector<32x128xf32>, vector<128x128xf32> -> vector<128x128xf32>
    %188 = arith.addf %186, %187 : vector<128x128xf32>
    %189 = vector.extract_strided_slice %188 {offsets = [0, 0], sizes = [96, 128], strides = [1, 1]} : vector<128x128xf32> to vector<96x128xf32>
    %cst_92 = arith.constant 5.000000e-01 : f32
    %190 = vector.broadcast %cst_92 : f32 to vector<96x128xf32>
    %191 = arith.mulf %190, %189 : vector<96x128xf32>
    %192 = math.tanh %191 : vector<96x128xf32>
    %cst_93 = arith.constant 5.000000e-01 : f32
    %193 = vector.broadcast %cst_93 : f32 to vector<96x128xf32>
    %194 = arith.mulf %193, %192 : vector<96x128xf32>
    %cst_94 = arith.constant 5.000000e-01 : f32
    %195 = vector.broadcast %cst_94 : f32 to vector<96x128xf32>
    %196 = arith.addf %194, %195 : vector<96x128xf32>
    %197 = vector.extract_strided_slice %188 {offsets = [96, 0], sizes = [32, 128], strides = [1, 1]} : vector<128x128xf32> to vector<32x128xf32>
    %198 = math.tanh %197 : vector<32x128xf32>
    %199 = vector.extract_strided_slice %196 {offsets = [0, 0], sizes = [32, 128], strides = [1, 1]} : vector<96x128xf32> to vector<32x128xf32>
    %200 = vector.extract_strided_slice %196 {offsets = [32, 0], sizes = [32, 128], strides = [1, 1]} : vector<96x128xf32> to vector<32x128xf32>
    %201 = vector.extract_strided_slice %196 {offsets = [64, 0], sizes = [32, 128], strides = [1, 1]} : vector<96x128xf32> to vector<32x128xf32>
    %202 = arith.mulf %200, %181 : vector<32x128xf32>
    %203 = arith.mulf %199, %198 : vector<32x128xf32>
    %204 = arith.addf %202, %203 : vector<32x128xf32>
    %205 = math.tanh %204 : vector<32x128xf32>
    %206 = arith.mulf %201, %205 : vector<32x128xf32>
    %c5_i32_95 = arith.constant 5 : i32
    %207 = arith.index_cast %c5_i32_95 : i32 to index
    %c0_96 = arith.constant 0 : index
    %c0_97 = arith.constant 0 : index
    %208 = vector.load %arg14[%207, %c0_96, %c0_97] : memref<8x128x128xf32, #tpu.memory_space<vmem>>, vector<1x128x128xf32>
    %209 = vector.shape_cast %208 : vector<1x128x128xf32> to vector<128x128xf32>
    %cst_98 = arith.constant dense<0.000000e+00> : vector<128x128xf32>
    %210 = tpu.matmul %1, %206, %cst_98 {dimension_numbers = #tpu.dot_dimension_numbers<[1], [0], [0], [1], [0, 0, 1, 1], [], []>} : vector<128x32xf32>, vector<32x128xf32>, vector<128x128xf32> -> vector<128x128xf32>
    %211 = arith.addf %209, %210 : vector<128x128xf32>
    %212 = vector.extract_strided_slice %211 {offsets = [0, 0], sizes = [96, 128], strides = [1, 1]} : vector<128x128xf32> to vector<96x128xf32>
    %cst_99 = arith.constant 5.000000e-01 : f32
    %213 = vector.broadcast %cst_99 : f32 to vector<96x128xf32>
    %214 = arith.mulf %213, %212 : vector<96x128xf32>
    %215 = math.tanh %214 : vector<96x128xf32>
    %cst_100 = arith.constant 5.000000e-01 : f32
    %216 = vector.broadcast %cst_100 : f32 to vector<96x128xf32>
    %217 = arith.mulf %216, %215 : vector<96x128xf32>
    %cst_101 = arith.constant 5.000000e-01 : f32
    %218 = vector.broadcast %cst_101 : f32 to vector<96x128xf32>
    %219 = arith.addf %217, %218 : vector<96x128xf32>
    %220 = vector.extract_strided_slice %211 {offsets = [96, 0], sizes = [32, 128], strides = [1, 1]} : vector<128x128xf32> to vector<32x128xf32>
    %221 = math.tanh %220 : vector<32x128xf32>
    %222 = vector.extract_strided_slice %219 {offsets = [0, 0], sizes = [32, 128], strides = [1, 1]} : vector<96x128xf32> to vector<32x128xf32>
    %223 = vector.extract_strided_slice %219 {offsets = [32, 0], sizes = [32, 128], strides = [1, 1]} : vector<96x128xf32> to vector<32x128xf32>
    %224 = vector.extract_strided_slice %219 {offsets = [64, 0], sizes = [32, 128], strides = [1, 1]} : vector<96x128xf32> to vector<32x128xf32>
    %225 = arith.mulf %223, %204 : vector<32x128xf32>
    %226 = arith.mulf %222, %221 : vector<32x128xf32>
    %227 = arith.addf %225, %226 : vector<32x128xf32>
    %228 = math.tanh %227 : vector<32x128xf32>
    %229 = arith.mulf %224, %228 : vector<32x128xf32>
    %c6_i32_102 = arith.constant 6 : i32
    %230 = arith.index_cast %c6_i32_102 : i32 to index
    %c0_103 = arith.constant 0 : index
    %c0_104 = arith.constant 0 : index
    %231 = vector.load %arg14[%230, %c0_103, %c0_104] : memref<8x128x128xf32, #tpu.memory_space<vmem>>, vector<1x128x128xf32>
    %232 = vector.shape_cast %231 : vector<1x128x128xf32> to vector<128x128xf32>
    %cst_105 = arith.constant dense<0.000000e+00> : vector<128x128xf32>
    %233 = tpu.matmul %1, %229, %cst_105 {dimension_numbers = #tpu.dot_dimension_numbers<[1], [0], [0], [1], [0, 0, 1, 1], [], []>} : vector<128x32xf32>, vector<32x128xf32>, vector<128x128xf32> -> vector<128x128xf32>
    %234 = arith.addf %232, %233 : vector<128x128xf32>
    %235 = vector.extract_strided_slice %234 {offsets = [0, 0], sizes = [96, 128], strides = [1, 1]} : vector<128x128xf32> to vector<96x128xf32>
    %cst_106 = arith.constant 5.000000e-01 : f32
    %236 = vector.broadcast %cst_106 : f32 to vector<96x128xf32>
    %237 = arith.mulf %236, %235 : vector<96x128xf32>
    %238 = math.tanh %237 : vector<96x128xf32>
    %cst_107 = arith.constant 5.000000e-01 : f32
    %239 = vector.broadcast %cst_107 : f32 to vector<96x128xf32>
    %240 = arith.mulf %239, %238 : vector<96x128xf32>
    %cst_108 = arith.constant 5.000000e-01 : f32
    %241 = vector.broadcast %cst_108 : f32 to vector<96x128xf32>
    %242 = arith.addf %240, %241 : vector<96x128xf32>
    %243 = vector.extract_strided_slice %234 {offsets = [96, 0], sizes = [32, 128], strides = [1, 1]} : vector<128x128xf32> to vector<32x128xf32>
    %244 = math.tanh %243 : vector<32x128xf32>
    %245 = vector.extract_strided_slice %242 {offsets = [0, 0], sizes = [32, 128], strides = [1, 1]} : vector<96x128xf32> to vector<32x128xf32>
    %246 = vector.extract_strided_slice %242 {offsets = [32, 0], sizes = [32, 128], strides = [1, 1]} : vector<96x128xf32> to vector<32x128xf32>
    %247 = vector.extract_strided_slice %242 {offsets = [64, 0], sizes = [32, 128], strides = [1, 1]} : vector<96x128xf32> to vector<32x128xf32>
    %248 = arith.mulf %246, %227 : vector<32x128xf32>
    %249 = arith.mulf %245, %244 : vector<32x128xf32>
    %250 = arith.addf %248, %249 : vector<32x128xf32>
    %251 = math.tanh %250 : vector<32x128xf32>
    %252 = arith.mulf %247, %251 : vector<32x128xf32>
    %c7_i32_109 = arith.constant 7 : i32
    %253 = arith.index_cast %c7_i32_109 : i32 to index
    %c0_110 = arith.constant 0 : index
    %c0_111 = arith.constant 0 : index
    %254 = vector.load %arg14[%253, %c0_110, %c0_111] : memref<8x128x128xf32, #tpu.memory_space<vmem>>, vector<1x128x128xf32>
    %255 = vector.shape_cast %254 : vector<1x128x128xf32> to vector<128x128xf32>
    %cst_112 = arith.constant dense<0.000000e+00> : vector<128x128xf32>
    %256 = tpu.matmul %1, %252, %cst_112 {dimension_numbers = #tpu.dot_dimension_numbers<[1], [0], [0], [1], [0, 0, 1, 1], [], []>} : vector<128x32xf32>, vector<32x128xf32>, vector<128x128xf32> -> vector<128x128xf32>
    %257 = arith.addf %255, %256 : vector<128x128xf32>
    %258 = vector.extract_strided_slice %257 {offsets = [0, 0], sizes = [96, 128], strides = [1, 1]} : vector<128x128xf32> to vector<96x128xf32>
    %cst_113 = arith.constant 5.000000e-01 : f32
    %259 = vector.broadcast %cst_113 : f32 to vector<96x128xf32>
    %260 = arith.mulf %259, %258 : vector<96x128xf32>
    %261 = math.tanh %260 : vector<96x128xf32>
    %cst_114 = arith.constant 5.000000e-01 : f32
    %262 = vector.broadcast %cst_114 : f32 to vector<96x128xf32>
    %263 = arith.mulf %262, %261 : vector<96x128xf32>
    %cst_115 = arith.constant 5.000000e-01 : f32
    %264 = vector.broadcast %cst_115 : f32 to vector<96x128xf32>
    %265 = arith.addf %263, %264 : vector<96x128xf32>
    %266 = vector.extract_strided_slice %257 {offsets = [96, 0], sizes = [32, 128], strides = [1, 1]} : vector<128x128xf32> to vector<32x128xf32>
    %267 = math.tanh %266 : vector<32x128xf32>
    %268 = vector.extract_strided_slice %265 {offsets = [0, 0], sizes = [32, 128], strides = [1, 1]} : vector<96x128xf32> to vector<32x128xf32>
    %269 = vector.extract_strided_slice %265 {offsets = [32, 0], sizes = [32, 128], strides = [1, 1]} : vector<96x128xf32> to vector<32x128xf32>
    %270 = vector.extract_strided_slice %265 {offsets = [64, 0], sizes = [32, 128], strides = [1, 1]} : vector<96x128xf32> to vector<32x128xf32>
    %271 = arith.mulf %269, %250 : vector<32x128xf32>
    %272 = arith.mulf %268, %267 : vector<32x128xf32>
    %273 = arith.addf %271, %272 : vector<32x128xf32>
    %274 = math.tanh %273 : vector<32x128xf32>
    %275 = arith.mulf %270, %274 : vector<32x128xf32>
    %c8_i32_116 = arith.constant 8 : i32
    %c0_117 = arith.constant 0 : index
    %c0_118 = arith.constant 0 : index
    %276 = vector.load %arg2[%c0_117, %c0_118] : memref<2x128xf32, #tpu.memory_space<vmem>>, vector<2x128xf32>
    %cst_119 = arith.constant dense<0.000000e+00> : vector<128x128xf32>
    %277 = tpu.matmul %3, %276, %cst_119 {dimension_numbers = #tpu.dot_dimension_numbers<[1], [0], [0], [1], [0, 0, 1, 1], [], []>} : vector<128x2xf32>, vector<2x128xf32>, vector<128x128xf32> -> vector<128x128xf32>
    %cst_120 = arith.constant dense<0.000000e+00> : vector<128x128xf32>
    %278 = tpu.matmul %2, %275, %cst_120 {dimension_numbers = #tpu.dot_dimension_numbers<[1], [0], [0], [1], [0, 0, 1, 1], [], []>} : vector<128x32xf32>, vector<32x128xf32>, vector<128x128xf32> -> vector<128x128xf32>
    %279 = arith.addf %277, %278 : vector<128x128xf32>
    %280 = arith.addf %279, %11 : vector<128x128xf32>
    %281 = vector.extract_strided_slice %280 {offsets = [0, 0], sizes = [96, 128], strides = [1, 1]} : vector<128x128xf32> to vector<96x128xf32>
    %cst_121 = arith.constant 5.000000e-01 : f32
    %282 = vector.broadcast %cst_121 : f32 to vector<96x128xf32>
    %283 = arith.mulf %282, %281 : vector<96x128xf32>
    %284 = math.tanh %283 : vector<96x128xf32>
    %cst_122 = arith.constant 5.000000e-01 : f32
    %285 = vector.broadcast %cst_122 : f32 to vector<96x128xf32>
    %286 = arith.mulf %285, %284 : vector<96x128xf32>
    %cst_123 = arith.constant 5.000000e-01 : f32
    %287 = vector.broadcast %cst_123 : f32 to vector<96x128xf32>
    %288 = arith.addf %286, %287 : vector<96x128xf32>
    %289 = vector.extract_strided_slice %280 {offsets = [96, 0], sizes = [32, 128], strides = [1, 1]} : vector<128x128xf32> to vector<32x128xf32>
    %290 = math.tanh %289 : vector<32x128xf32>
    %291 = vector.extract_strided_slice %288 {offsets = [0, 0], sizes = [32, 128], strides = [1, 1]} : vector<96x128xf32> to vector<32x128xf32>
    %292 = vector.extract_strided_slice %288 {offsets = [32, 0], sizes = [32, 128], strides = [1, 1]} : vector<96x128xf32> to vector<32x128xf32>
    %293 = vector.extract_strided_slice %288 {offsets = [64, 0], sizes = [32, 128], strides = [1, 1]} : vector<96x128xf32> to vector<32x128xf32>
    %294 = arith.mulf %292, %273 : vector<32x128xf32>
    %295 = arith.mulf %291, %290 : vector<32x128xf32>
    %296 = arith.addf %294, %295 : vector<32x128xf32>
    %297 = math.tanh %296 : vector<32x128xf32>
    %298 = arith.mulf %293, %297 : vector<32x128xf32>
    %cst_124 = arith.constant dense<0.000000e+00> : vector<2x128xf32>
    %299 = tpu.matmul %5, %298, %cst_124 {dimension_numbers = #tpu.dot_dimension_numbers<[1], [0], [0], [1], [0, 0, 1, 1], [], []>} : vector<2x32xf32>, vector<32x128xf32>, vector<2x128xf32> -> vector<2x128xf32>
    %300 = arith.addf %299, %17 : vector<2x128xf32>
    %c0_125 = arith.constant 0 : index
    %c0_126 = arith.constant 0 : index
    %c0_127 = arith.constant 0 : index
    %301 = vector.load %arg13[%c0_125, %c0_126, %c0_127] : memref<4x2x128xf32, #tpu.memory_space<vmem>>, vector<1x2x128xf32>
    %302 = vector.shape_cast %301 : vector<1x2x128xf32> to vector<2x128xf32>
    %303 = vector.shape_cast %300 : vector<2x128xf32> to vector<1x2x128xf32>
    tpu.vector_store %arg13[%c0_125, %c0_126, %c0_127], %303 {strides = array<i32>} : memref<4x2x128xf32, #tpu.memory_space<vmem>>, vector<1x2x128xf32>,
    %c1_i32_128 = arith.constant 1 : i32
    %cst_129 = arith.constant dense<0.000000e+00> : vector<128x128xf32>
    %304 = tpu.matmul %4, %298, %cst_129 {dimension_numbers = #tpu.dot_dimension_numbers<[1], [0], [0], [1], [0, 0, 1, 1], [], []>} : vector<128x32xf32>, vector<32x128xf32>, vector<128x128xf32> -> vector<128x128xf32>
    %305 = arith.addf %304, %14 : vector<128x128xf32>
    %306 = vector.extract_strided_slice %305 {offsets = [0, 0], sizes = [96, 128], strides = [1, 1]} : vector<128x128xf32> to vector<96x128xf32>
    %cst_130 = arith.constant 5.000000e-01 : f32
    %307 = vector.broadcast %cst_130 : f32 to vector<96x128xf32>
    %308 = arith.mulf %307, %306 : vector<96x128xf32>
    %309 = math.tanh %308 : vector<96x128xf32>
    %cst_131 = arith.constant 5.000000e-01 : f32
    %310 = vector.broadcast %cst_131 : f32 to vector<96x128xf32>
    %311 = arith.mulf %310, %309 : vector<96x128xf32>
    %cst_132 = arith.constant 5.000000e-01 : f32
    %312 = vector.broadcast %cst_132 : f32 to vector<96x128xf32>
    %313 = arith.addf %311, %312 : vector<96x128xf32>
    %314 = vector.extract_strided_slice %305 {offsets = [96, 0], sizes = [32, 128], strides = [1, 1]} : vector<128x128xf32> to vector<32x128xf32>
    %315 = math.tanh %314 : vector<32x128xf32>
    %316 = vector.extract_strided_slice %313 {offsets = [0, 0], sizes = [32, 128], strides = [1, 1]} : vector<96x128xf32> to vector<32x128xf32>
    %317 = vector.extract_strided_slice %313 {offsets = [32, 0], sizes = [32, 128], strides = [1, 1]} : vector<96x128xf32> to vector<32x128xf32>
    %318 = vector.extract_strided_slice %313 {offsets = [64, 0], sizes = [32, 128], strides = [1, 1]} : vector<96x128xf32> to vector<32x128xf32>
    %319 = arith.mulf %317, %296 : vector<32x128xf32>
    %320 = arith.mulf %316, %315 : vector<32x128xf32>
    %321 = arith.addf %319, %320 : vector<32x128xf32>
    %322 = math.tanh %321 : vector<32x128xf32>
    %323 = arith.mulf %318, %322 : vector<32x128xf32>
    %cst_133 = arith.constant dense<0.000000e+00> : vector<2x128xf32>
    %324 = tpu.matmul %5, %323, %cst_133 {dimension_numbers = #tpu.dot_dimension_numbers<[1], [0], [0], [1], [0, 0, 1, 1], [], []>} : vector<2x32xf32>, vector<32x128xf32>, vector<2x128xf32> -> vector<2x128xf32>
    %325 = arith.addf %324, %17 : vector<2x128xf32>
    %326 = arith.index_cast %c1_i32_128 : i32 to index
    %c0_134 = arith.constant 0 : index
    %c0_135 = arith.constant 0 : index
    %327 = vector.load %arg13[%326, %c0_134, %c0_135] : memref<4x2x128xf32, #tpu.memory_space<vmem>>, vector<1x2x128xf32>
    %328 = vector.shape_cast %327 : vector<1x2x128xf32> to vector<2x128xf32>
    %329 = vector.shape_cast %325 : vector<2x128xf32> to vector<1x2x128xf32>
    tpu.vector_store %arg13[%326, %c0_134, %c0_135], %329 {strides = array<i32>} : memref<4x2x128xf32, #tpu.memory_space<vmem>>, vector<1x2x128xf32>,
    %c2_i32_136 = arith.constant 2 : i32
    %cst_137 = arith.constant dense<0.000000e+00> : vector<128x128xf32>
    %330 = tpu.matmul %4, %323, %cst_137 {dimension_numbers = #tpu.dot_dimension_numbers<[1], [0], [0], [1], [0, 0, 1, 1], [], []>} : vector<128x32xf32>, vector<32x128xf32>, vector<128x128xf32> -> vector<128x128xf32>
    %331 = arith.addf %330, %14 : vector<128x128xf32>
    %332 = vector.extract_strided_slice %331 {offsets = [0, 0], sizes = [96, 128], strides = [1, 1]} : vector<128x128xf32> to vector<96x128xf32>
    %cst_138 = arith.constant 5.000000e-01 : f32
    %333 = vector.broadcast %cst_138 : f32 to vector<96x128xf32>
    %334 = arith.mulf %333, %332 : vector<96x128xf32>
    %335 = math.tanh %334 : vector<96x128xf32>
    %cst_139 = arith.constant 5.000000e-01 : f32
    %336 = vector.broadcast %cst_139 : f32 to vector<96x128xf32>
    %337 = arith.mulf %336, %335 : vector<96x128xf32>
    %cst_140 = arith.constant 5.000000e-01 : f32
    %338 = vector.broadcast %cst_140 : f32 to vector<96x128xf32>
    %339 = arith.addf %337, %338 : vector<96x128xf32>
    %340 = vector.extract_strided_slice %331 {offsets = [96, 0], sizes = [32, 128], strides = [1, 1]} : vector<128x128xf32> to vector<32x128xf32>
    %341 = math.tanh %340 : vector<32x128xf32>
    %342 = vector.extract_strided_slice %339 {offsets = [0, 0], sizes = [32, 128], strides = [1, 1]} : vector<96x128xf32> to vector<32x128xf32>
    %343 = vector.extract_strided_slice %339 {offsets = [32, 0], sizes = [32, 128], strides = [1, 1]} : vector<96x128xf32> to vector<32x128xf32>
    %344 = vector.extract_strided_slice %339 {offsets = [64, 0], sizes = [32, 128], strides = [1, 1]} : vector<96x128xf32> to vector<32x128xf32>
    %345 = arith.mulf %343, %321 : vector<32x128xf32>
    %346 = arith.mulf %342, %341 : vector<32x128xf32>
    %347 = arith.addf %345, %346 : vector<32x128xf32>
    %348 = math.tanh %347 : vector<32x128xf32>
    %349 = arith.mulf %344, %348 : vector<32x128xf32>
    %cst_141 = arith.constant dense<0.000000e+00> : vector<2x128xf32>
    %350 = tpu.matmul %5, %349, %cst_141 {dimension_numbers = #tpu.dot_dimension_numbers<[1], [0], [0], [1], [0, 0, 1, 1], [], []>} : vector<2x32xf32>, vector<32x128xf32>, vector<2x128xf32> -> vector<2x128xf32>
    %351 = arith.addf %350, %17 : vector<2x128xf32>
    %352 = arith.index_cast %c2_i32_136 : i32 to index
    %c0_142 = arith.constant 0 : index
    %c0_143 = arith.constant 0 : index
    %353 = vector.load %arg13[%352, %c0_142, %c0_143] : memref<4x2x128xf32, #tpu.memory_space<vmem>>, vector<1x2x128xf32>
    %354 = vector.shape_cast %353 : vector<1x2x128xf32> to vector<2x128xf32>
    %355 = vector.shape_cast %351 : vector<2x128xf32> to vector<1x2x128xf32>
    tpu.vector_store %arg13[%352, %c0_142, %c0_143], %355 {strides = array<i32>} : memref<4x2x128xf32, #tpu.memory_space<vmem>>, vector<1x2x128xf32>,
    %c3_i32_144 = arith.constant 3 : i32
    %cst_145 = arith.constant dense<0.000000e+00> : vector<128x128xf32>
    %356 = tpu.matmul %4, %349, %cst_145 {dimension_numbers = #tpu.dot_dimension_numbers<[1], [0], [0], [1], [0, 0, 1, 1], [], []>} : vector<128x32xf32>, vector<32x128xf32>, vector<128x128xf32> -> vector<128x128xf32>
    %357 = arith.addf %356, %14 : vector<128x128xf32>
    %358 = vector.extract_strided_slice %357 {offsets = [0, 0], sizes = [96, 128], strides = [1, 1]} : vector<128x128xf32> to vector<96x128xf32>
    %cst_146 = arith.constant 5.000000e-01 : f32
    %359 = vector.broadcast %cst_146 : f32 to vector<96x128xf32>
    %360 = arith.mulf %359, %358 : vector<96x128xf32>
    %361 = math.tanh %360 : vector<96x128xf32>
    %cst_147 = arith.constant 5.000000e-01 : f32
    %362 = vector.broadcast %cst_147 : f32 to vector<96x128xf32>
    %363 = arith.mulf %362, %361 : vector<96x128xf32>
    %cst_148 = arith.constant 5.000000e-01 : f32
    %364 = vector.broadcast %cst_148 : f32 to vector<96x128xf32>
    %365 = arith.addf %363, %364 : vector<96x128xf32>
    %366 = vector.extract_strided_slice %357 {offsets = [96, 0], sizes = [32, 128], strides = [1, 1]} : vector<128x128xf32> to vector<32x128xf32>
    %367 = math.tanh %366 : vector<32x128xf32>
    %368 = vector.extract_strided_slice %365 {offsets = [0, 0], sizes = [32, 128], strides = [1, 1]} : vector<96x128xf32> to vector<32x128xf32>
    %369 = vector.extract_strided_slice %365 {offsets = [32, 0], sizes = [32, 128], strides = [1, 1]} : vector<96x128xf32> to vector<32x128xf32>
    %370 = vector.extract_strided_slice %365 {offsets = [64, 0], sizes = [32, 128], strides = [1, 1]} : vector<96x128xf32> to vector<32x128xf32>
    %371 = arith.mulf %369, %347 : vector<32x128xf32>
    %372 = arith.mulf %368, %367 : vector<32x128xf32>
    %373 = arith.addf %371, %372 : vector<32x128xf32>
    %374 = math.tanh %373 : vector<32x128xf32>
    %375 = arith.mulf %370, %374 : vector<32x128xf32>
    %cst_149 = arith.constant dense<0.000000e+00> : vector<2x128xf32>
    %376 = tpu.matmul %5, %375, %cst_149 {dimension_numbers = #tpu.dot_dimension_numbers<[1], [0], [0], [1], [0, 0, 1, 1], [], []>} : vector<2x32xf32>, vector<32x128xf32>, vector<2x128xf32> -> vector<2x128xf32>
    %377 = arith.addf %376, %17 : vector<2x128xf32>
    %378 = arith.index_cast %c3_i32_144 : i32 to index
    %c0_150 = arith.constant 0 : index
    %c0_151 = arith.constant 0 : index
    %379 = vector.load %arg13[%378, %c0_150, %c0_151] : memref<4x2x128xf32, #tpu.memory_space<vmem>>, vector<1x2x128xf32>
    %380 = vector.shape_cast %379 : vector<1x2x128xf32> to vector<2x128xf32>
    %381 = vector.shape_cast %377 : vector<2x128xf32> to vector<1x2x128xf32>
    tpu.vector_store %arg13[%378, %c0_150, %c0_151], %381 {strides = array<i32>} : memref<4x2x128xf32, #tpu.memory_space<vmem>>, vector<1x2x128xf32>,
    %c3_i32_152 = arith.constant 3 : i32
    return
  }
  func.func @transform_0(%arg0: i32) -> (i32, i32, i32) {
    %c0_i32 = arith.constant 0 : i32
    %c0_i32_0 = arith.constant 0 : i32
    %c0_i32_1 = arith.constant 0 : i32
    return %c0_i32, %c0_i32_0, %arg0 : i32, i32, i32
  }
  func.func @transform_1(%arg0: i32) -> (i32, i32) {
    %c0_i32 = arith.constant 0 : i32
    %c0_i32_0 = arith.constant 0 : i32
    return %c0_i32, %arg0 : i32, i32
  }
  func.func @transform_2(%arg0: i32) -> (i32, i32) {
    %c0_i32 = arith.constant 0 : i32
    %c0_i32_0 = arith.constant 0 : i32
    %c0_i32_1 = arith.constant 0 : i32
    return %c0_i32, %c0_i32_0 : i32, i32
  }
  func.func @transform_3(%arg0: i32) -> (i32, i32) {
    %c0_i32 = arith.constant 0 : i32
    %c0_i32_0 = arith.constant 0 : i32
    %c0_i32_1 = arith.constant 0 : i32
    return %c0_i32, %c0_i32_0 : i32, i32
  }
  func.func @transform_4(%arg0: i32) -> (i32, i32) {
    %c0_i32 = arith.constant 0 : i32
    %c0_i32_0 = arith.constant 0 : i32
    %c0_i32_1 = arith.constant 0 : i32
    return %c0_i32, %c0_i32_0 : i32, i32
  }
  func.func @transform_5(%arg0: i32) -> (i32, i32) {
    %c0_i32 = arith.constant 0 : i32
    %c0_i32_0 = arith.constant 0 : i32
    %c0_i32_1 = arith.constant 0 : i32
    return %c0_i32, %c0_i32_0 : i32, i32
  }
  func.func @transform_6(%arg0: i32) -> (i32, i32) {
    %c0_i32 = arith.constant 0 : i32
    %c0_i32_0 = arith.constant 0 : i32
    %c0_i32_1 = arith.constant 0 : i32
    return %c0_i32, %c0_i32_0 : i32, i32
  }
  func.func @transform_7(%arg0: i32) -> (i32, i32) {
    %c0_i32 = arith.constant 0 : i32
    %c0_i32_0 = arith.constant 0 : i32
    %c0_i32_1 = arith.constant 0 : i32
    return %c0_i32, %c0_i32_0 : i32, i32
  }
  func.func @transform_8(%arg0: i32) -> (i32, i32) {
    %c0_i32 = arith.constant 0 : i32
    %c0_i32_0 = arith.constant 0 : i32
    %c0_i32_1 = arith.constant 0 : i32
    return %c0_i32, %c0_i32_0 : i32, i32
  }
  func.func @transform_9(%arg0: i32) -> (i32, i32) {
    %c0_i32 = arith.constant 0 : i32
    %c0_i32_0 = arith.constant 0 : i32
    %c0_i32_1 = arith.constant 0 : i32
    return %c0_i32, %c0_i32_0 : i32, i32
  }
  func.func @transform_10(%arg0: i32) -> (i32, i32) {
    %c0_i32 = arith.constant 0 : i32
    %c0_i32_0 = arith.constant 0 : i32
    %c0_i32_1 = arith.constant 0 : i32
    return %c0_i32, %c0_i32_0 : i32, i32
  }
  func.func @transform_11(%arg0: i32) -> (i32, i32) {
    %c0_i32 = arith.constant 0 : i32
    %c0_i32_0 = arith.constant 0 : i32
    %c0_i32_1 = arith.constant 0 : i32
    return %c0_i32, %c0_i32_0 : i32, i32
  }
  func.func @transform_12(%arg0: i32) -> (i32, i32, i32) {
    %c0_i32 = arith.constant 0 : i32
    %c0_i32_0 = arith.constant 0 : i32
    %c0_i32_1 = arith.constant 0 : i32
    return %c0_i32, %c0_i32_0, %arg0 : i32, i32, i32
  }
}

</mosaic_0001>

<bundles_post_ra>
// kernel: tpu_custom_call.1
= control target key start
LH: loop header
LB: loop body
LE: loop exit
PB: predicated region body
PF: predicated region fallthrough
CT: control target
= control target key end

     0   :  { %vm467_vm0 = vcmask 1043456   ;;  %vm418_vm1 = vcmask 31744   ;;  %v7664_v4 = vmov 0   ;;  %s9465_s0 = inlined_call_operand.vmem [shape: f32[8,4,128], index: 0, kind: input, shape index: {}]   ;;  %s9466_s1 = inlined_call_operand.vmem [shape: f32[2,128], index: 1, kind: input, shape index: {}]   ;;  %s9467_s2 = inlined_call_operand.vmem [shape: f32[128,4], index: 2, kind: input, shape index: {}]   ;;  %s9468_s3 = inlined_call_operand.vmem [shape: f32[128,32], index: 3, kind: input, shape index: {}]   ;;  %s9469_s4 = inlined_call_operand.vmem [shape: f32[128,1], index: 4, kind: input, shape index: {}]   ;;  %s9470_s5 = inlined_call_operand.vmem [shape: f32[128,32], index: 5, kind: input, shape index: {}]   ;;  %s9471_s6 = inlined_call_operand.vmem [shape: f32[128,2], index: 6, kind: input, shape index: {}]   ;;  %s9472_s7 = inlined_call_operand.vmem [shape: f32[128,1], index: 7, kind: input, shape index: {}]   ;;  %s9473_s8 = inlined_call_operand.vmem [shape: f32[128,32], index: 8, kind: input, shape index: {}]   ;;  %s9474_s9 = inlined_call_operand.vmem [shape: f32[128,1], index: 9, kind: input, shape index: {}]   ;;  %s9475_s10 = inlined_call_operand.vmem [shape: f32[2,32], index: 10, kind: input, shape index: {}]   ;;  %s9476_s11 = inlined_call_operand.vmem [shape: f32[2,1], index: 11, kind: input, shape index: {}]   ;;  %s9477_s12 = inlined_call_operand.hbm [shape: f32[4,2,128], index: 12, kind: output, shape index: {}]  }
   0x1   :  { %v417_v0 = vld [vmem:[%s9465_s0] sm:$0xf]  ;;  %v7747_v2 = vld [vmem:[%s9467_s2 + $0x8] sm:$0xff]  ;;  %v7755_v3 = vld [vmem:[%s9467_s2 + $0x10] sm:$0xff]  ;;  %7142 = vset.pattern.permute.xlu0 %v7664_v4  ;;  %7143 = vset.pattern.permute.xlu1 %v7664_v4 }
   0x2   :  { %v7742_v1 = vld [vmem:[%s9467_s2] sm:$0xff]  ;;  %6093 = vmatprep.subr.msk.mxu0 %vm467_vm0, %v417_v0  ;;  %v7765_v5 = vld [vmem:[%s9467_s2 + $0x18] sm:$0xff]  ;;  %v5362_v6 = vld [vmem:[%s9465_s0 + $0x8] sm:$0xf]  ;;  %6861 = vmatprep.subr.msk.mxu1 %vm467_vm0, %v417_v0 }
   0x3   :  { %6095 = vmatprep.mubr.msk.f32.mxu0 %vm418_vm1, %v7742_v1  ;;  %6094 = vmatpush3.msk.msra.mxu0 %vm467_vm0, %v417_v0  ;;  %v7774_v7 = vld [vmem:[%s9467_s2 + $0x20] sm:$0xff]  ;;  %v5398_v9 = vld [vmem:[%s9465_s0 + $0x10] sm:$0xf]  ;;  %v7803_v12 = vld [vmem:[%s9467_s2 + $0x28] sm:$0xff] }
   0x4   :  { %6096 = vmatmul.mubr.msk.f32.vlgmr.msra.gmra.mrb[0].mxu0 %vm418_vm1, %v7747_v2  ;;  %6145 = vmatprep.subr.msk.mxu0 %vm467_vm0, %v5362_v6  ;;  %v7780_v8 = vld [vmem:[%s9467_s2 + $0x60] sm:$0xff]  ;;  %v7808_v13 = vld [vmem:[%s9467_s2 + $0x68] sm:$0xff]  ;;  %v7813_v14 = vld [vmem:[%s9467_s2 + $0x30] sm:$0xff] }
   0x5   :  { %6098 = vmatprep.mubr.msk.f32.mxu0 %vm418_vm1, %v7755_v3  ;;  %6862 = vmatpush3.msk.msra.mxu1 %vm467_vm0, %v417_v0  ;;  %v123_v10 = vld [vmem:[%s9469_s4] sm:$0xff]  ;;  %v7818_v15 = vld [vmem:[%s9467_s2 + $0x70] sm:$0xff]  ;;  %v124_v16 = vld [vmem:[%s9469_s4 + $0x8] sm:$0xff] }
   0x6   :  { %6146 = vmatpush3.msk.msra.mxu0 %vm467_vm0, %v5362_v6  ;;  %6113 = vmatprep.mubr.msk.f32.mxu1 %vm418_vm1, %v7780_v8  ;;  %v127_v11 = vld [vmem:[%s9469_s4 + $0x20] sm:$0xff]  ;;  %v128_v17 = vld [vmem:[%s9469_s4 + $0x28] sm:$0xff]  ;;  %v7837_v18 = vld [vmem:[%s9467_s2 + $0x38] sm:$0xff] }
   0x7   :  { %6197 = vmatprep.subr.msk.mxu0 %vm467_vm0, %v5398_v9  ;;  %141 = vperm.xlu0 %7142, %v123_v10   ;;  %v7842_v19 = vld [vmem:[%s9467_s2 + $0x78] sm:$0xff]  ;;  %v7847_v20 = vld [vmem:[%s9467_s2 + $0x40] sm:$0xff]  ;;  %v125_v21 = vld [vmem:[%s9469_s4 + $0x10] sm:$0xff] }
   0x8   :  { %6099 = vmatmul.mubr.msk.f32.gmra.mrb[2].mxu0 %vm418_vm1, %v7765_v5  ;;  %161 = vperm.xlu1 %7143, %v127_v11   ;;  %v126_v22 = vld [vmem:[%s9469_s4 + $0x18] sm:$0xff]  ;;  %v7866_v23 = vld [vmem:[%s9467_s2 + $0x48] sm:$0xff] }
   0x9   :  { %6101 = vmatprep.mubr.msk.f32.mxu0 %vm418_vm1, %v7774_v7  ;;  %6114 = vmatmul.mubr.msk.f32.vlgmr.msra.gmra.mrb[0].mxu1 %vm418_vm1, %v7808_v13 }
   0xa   :  { %6116 = vmatprep.mubr.msk.f32.mxu1 %vm418_vm1, %v7818_v15 }
   0xb   :  { %146 = vperm.xlu0 %7142, %v124_v16  }
   0xc   :  { %6102 = vmatmul.mubr.msk.f32.gmra.mrb[4].mxu0 %vm418_vm1, %v7803_v12  ;;  %166 = vperm.xlu1 %7143, %v128_v17  }
   0xd   :  { %6104 = vmatprep.mubr.msk.f32.mxu0 %vm418_vm1, %v7813_v14  ;;  %6117 = vmatmul.mubr.msk.f32.gmra.mrb[2].mxu1 %vm418_vm1, %v7842_v19 }
   0xe   :  { %6121 = vmatprep.mubr.msk.f32.mxu1 %vm418_vm1, %v7742_v1 }
   0xf   :  { %151 = vperm.xlu0 %7142, %v125_v21  }
  0x10   :  { %6105 = vmatmul.mubr.msk.f32.gmra.mrb[6].mxu0 %vm418_vm1, %v7837_v18 }
  0x11   :  { %6107 = vmatprep.mubr.msk.f32.mxu0 %vm418_vm1, %v7847_v20 }
  0x12   :  { %17 = vsyncpa [#allocation4], 0  ;;  %v7871_v24 = vld [vmem:[%s9467_s2 + $0x50] sm:$0xff]  ;;  %156 = vperm.xlu1 %7143, %v126_v22   ;;  %v130_v26 = vld [vmem:[%s9469_s4 + $0x38] sm:$0xff]  ;;  %v9478_v51 = vmov 0.0   ;;  %vm1817_vm2 = vcmask 261120  }
  0x13   :  { %v129_v25 = vld [vmem:[%s9469_s4 + $0x30] sm:$0xff]  ;;  %v7886_v27 = vld [vmem:[%s9467_s2 + $0x58] sm:$0xff]  ;;  %v135_v28 = vld [vmem:[%s9469_s4 + $0x60] sm:$0xff]  ;;  %vm4085_vm3 = vcmask 1041408   ;;  %vm4036_vm4 = vcmask 15360   ;;  %vm7667_vm5 = vmmov 0  }
  0x14   :  { %6108 = vmatmul.mubr.msk.f32.gmra.mrb[8].mxu0 %vm418_vm1, %v7866_v23  ;;  %171 = vperm.xlu0 %7142, %v129_v25   ;;  %v136_v29 = vld [vmem:[%s9469_s4 + $0x68] sm:$0xff]  ;;  %v7901_v30 = vld [vmem:[%s9465_s0 + $0x18] sm:$0xf]  ;;  %v137_v31 = vld [vmem:[%s9469_s4 + $0x70] sm:$0xff] }
  0x15   :  { %6110 = vmatprep.mubr.msk.f32.mxu0 %vm418_vm1, %v7871_v24  ;;  %v138_v32 = vld [vmem:[%s9469_s4 + $0x78] sm:$0xff]  ;;  %v131_v33 = vld [vmem:[%s9469_s4 + $0x40] sm:$0xff]  ;;  %v132_v34 = vld [vmem:[%s9469_s4 + $0x48] sm:$0xff] }
  0x16   :  { %176 = vperm.xlu1 %7143, %v130_v26   ;;  %v5344_v35 = vld [vmem:[%s9465_s0 + $0x4] sm:$0xf]  ;;  %v133_v36 = vld [vmem:[%s9469_s4 + $0x50] sm:$0xff]  ;;  %v134_v37 = vld [vmem:[%s9469_s4 + $0x58] sm:$0xff] }
  0x17   :  { %6119 = vmatprep.subr.msk.mxu1 %vm467_vm0, %v5344_v35  ;;  %v219_v38 = vld [vmem:[%s9472_s7] sm:$0xff]  ;;  %v220_v39 = vld [vmem:[%s9472_s7 + $0x8] sm:$0xff]  ;;  %v221_v42 = vld [vmem:[%s9472_s7 + $0x10] sm:$0xff] }
  0x18   :  { %6111 = vmatmul.mubr.msk.f32.gmra.mrb[10].mxu0 %vm418_vm1, %v7886_v27  ;;  %201 = vperm.xlu0 %7142, %v135_v28   ;;  %v223_v40 = vld [vmem:[%s9472_s7 + $0x20] sm:$0xff]  ;;  %v224_v41 = vld [vmem:[%s9472_s7 + $0x28] sm:$0xff]  ;;  %v222_v43 = vld [vmem:[%s9472_s7 + $0x18] sm:$0xff] }
  0x19   :  { %6147 = vmatprep.mubr.msk.f32.mxu0 %vm418_vm1, %v7742_v1  ;;  %6120 = vmatpush3.msk.msra.mxu1 %vm467_vm0, %v5344_v35  ;;  %v225_v44 = vld [vmem:[%s9472_s7 + $0x30] sm:$0xff]  ;;  %v226_v45 = vld [vmem:[%s9472_s7 + $0x38] sm:$0xff]  ;;  %v231_v46 = vld [vmem:[%s9472_s7 + $0x60] sm:$0xff] }
  0x1a   :  { %206 = vperm.xlu1 %7143, %v136_v29   ;;  %6122 = vmatmul.mubr.msk.f32.vlgmr.msra.gmra.mrb[4].mxu1 %vm418_vm1, %v7747_v2  ;;  %v232_v47 = vld [vmem:[%s9472_s7 + $0x68] sm:$0xff]  ;;  %v233_v49 = vld [vmem:[%s9472_s7 + $0x70] sm:$0xff]  ;;  %v234_v50 = vld [vmem:[%s9472_s7 + $0x78] sm:$0xff] }
  0x1b   :  { %6124 = vmatprep.mubr.msk.f32.mxu1 %vm418_vm1, %v7755_v3  ;;  %v5380_v48 = vld [vmem:[%s9465_s0 + $0xc] sm:$0xf]  ;;  %v227_v52 = vld [vmem:[%s9472_s7 + $0x40] sm:$0xff]  ;;  %v229_v54 = vld [vmem:[%s9472_s7 + $0x50] sm:$0xff] }
  0x1c   :  { %6148 = vmatmul.mubr.msk.f32.vlgmr.msra.gmra.mrb[12].mxu0 %vm418_vm1, %v7747_v2  ;;  %211 = vperm.xlu0 %7142, %v137_v31   ;;  %v228_v53 = vld [vmem:[%s9472_s7 + $0x48] sm:$0xff]  ;;  %v230_v55 = vld [vmem:[%s9472_s7 + $0x58] sm:$0xff]  ;;  %v315_v56 = vld [vmem:[%s9474_s9] sm:$0xff] }
  0x1d   :  { %6150 = vmatprep.mubr.msk.f32.mxu0 %vm418_vm1, %v7755_v3  ;;  %6198 = vmatpush3.msk.msra.mxu0 %vm467_vm0, %v5398_v9  ;;  %v316_v57 = vld [vmem:[%s9474_s9 + $0x8] sm:$0xff]  ;;  %v319_v58 = vld [vmem:[%s9474_s9 + $0x20] sm:$0xff]  ;;  %v317_v60 = vld [vmem:[%s9474_s9 + $0x10] sm:$0xff] }
  0x1e   :  { %6249 = vmatprep.subr.msk.mxu0 %vm467_vm0, %v7901_v30  ;;  %216 = vperm.xlu1 %7143, %v138_v32   ;;  %v320_v59 = vld [vmem:[%s9474_s9 + $0x28] sm:$0xff]  ;;  %v318_v61 = vld [vmem:[%s9474_s9 + $0x18] sm:$0xff]  ;;  %v321_v62 = vld [vmem:[%s9474_s9 + $0x30] sm:$0xff] }
  0x1f   :  { %6125 = vmatmul.mubr.msk.f32.gmra.mrb[6].mxu1 %vm418_vm1, %v7765_v5  ;;  %6171 = vmatprep.subr.msk.mxu1 %vm467_vm0, %v5380_v48  ;;  %v322_v63 = vld [vmem:[%s9474_s9 + $0x38] sm:$0xff]  ;;  %v327_v0 = vld [vmem:[%s9474_s9 + $0x60] sm:$0xff]  ;;  %v328_v4 = vld [vmem:[%s9474_s9 + $0x68] sm:$0xff] }
  0x20   :  { %6151 = vmatmul.mubr.msk.f32.gmra.mrb[14].mxu0 %vm418_vm1, %v7765_v5  ;;  %181 = vperm.xlu0 %7142, %v131_v33   ;;  %v5416_v6 = vld [vmem:[%s9465_s0 + $0x14] sm:$0xf]  ;;  %v330_v10 = vld [vmem:[%s9474_s9 + $0x78] sm:$0xff]  ;;  %v323_v11 = vld [vmem:[%s9474_s9 + $0x40] sm:$0xff] }
  0x21   :  { %6153 = vmatprep.mubr.msk.f32.mxu0 %vm418_vm1, %v7774_v7  ;;  %6127 = vmatprep.mubr.msk.f32.mxu1 %vm418_vm1, %v7774_v7  ;;  %v329_v9 = vld [vmem:[%s9474_s9 + $0x70] sm:$0xff]  ;;  %v324_v16 = vld [vmem:[%s9474_s9 + $0x48] sm:$0xff]  ;;  %v326_v21 = vld [vmem:[%s9474_s9 + $0x58] sm:$0xff] }
  0x22   :  { %186 = vperm.xlu1 %7143, %v132_v34   ;;  %6172 = vmatpush3.msk.msra.mxu1 %vm467_vm0, %v5380_v48  ;;  %v325_v17 = vld [vmem:[%s9474_s9 + $0x50] sm:$0xff]  ;;  %v411_v22 = vld [vmem:[%s9476_s11] sm:$0x3]  ;;  %v8230_v26 = vld [vmem:[%s9468_s3 + $0x8] sm:$0xff] }
  0x23   :  { %6128 = vmatmul.mubr.msk.f32.gmra.mrb[8].mxu1 %vm418_vm1, %v7803_v12  ;;  %6223 = vmatprep.subr.msk.mxu1 %vm467_vm0, %v5416_v6  ;;  %v8217_v25 = vld [vmem:[%s9468_s3] sm:$0xff]  ;;  %v8235_v28 = vld [vmem:[%s9468_s3 + $0x10] sm:$0xff]  ;;  %v8248_v29 = vld [vmem:[%s9468_s3 + $0x18] sm:$0xff] }
  0x24   :  { %6154 = vmatmul.mubr.msk.f32.gmra.mrb[16].mxu0 %vm418_vm1, %v7803_v12  ;;  %191 = vperm.xlu0 %7142, %v133_v36   ;;  %v8266_v31 = vld [vmem:[%s9468_s3 + $0x28] sm:$0xff]  ;;  %v8271_v32 = vld [vmem:[%s9468_s3 + $0x30] sm:$0xff]  ;;  %v8284_v33 = vld [vmem:[%s9468_s3 + $0x38] sm:$0xff] }
  0x25   :  { %6156 = vmatprep.mubr.msk.f32.mxu0 %vm418_vm1, %v7813_v14  ;;  %6130 = vmatprep.mubr.msk.f32.mxu1 %vm418_vm1, %v7813_v14  ;;  %v8289_v34 = vld [vmem:[%s9468_s3 + $0x40] sm:$0xff]  ;;  %v8303_v35 = vld [vmem:[%s9468_s3 + $0x50] sm:$0xff]  ;;  %v8312_v36 = vld [vmem:[%s9468_s3 + $0x58] sm:$0xff] }
  0x26   :  { %196 = vperm.xlu1 %7143, %v134_v37   ;;  %v8317_v37 = vld [vmem:[%s9468_s3 + $0x60] sm:$0xff] }
  0x27   :  { %6131 = vmatmul.mubr.msk.f32.gmra.mrb[10].mxu1 %vm418_vm1, %v7837_v18 }
  0x28   :  { %6157 = vmatmul.mubr.msk.f32.gmra.mrb[18].mxu0 %vm418_vm1, %v7837_v18  ;;  %237 = vperm.xlu0 %7142, %v219_v38   ;;  %v8326_v38 = vld [vmem:[%s9468_s3 + $0x68] sm:$0xff] }
  0x29   :  { %6159 = vmatprep.mubr.msk.f32.mxu0 %vm418_vm1, %v7847_v20  ;;  %6133 = vmatprep.mubr.msk.f32.mxu1 %vm418_vm1, %v7847_v20 }
  0x2a   :  { %242 = vperm.xlu1 %7143, %v220_v39   ;;  %v8331_v39 = vld [vmem:[%s9468_s3 + $0x70] sm:$0xff] }
  0x2b   :  { %6134 = vmatmul.mubr.msk.f32.gmra.mrb[12].mxu1 %vm418_vm1, %v7866_v23 }
  0x2c   :  { %6160 = vmatmul.mubr.msk.f32.gmra.mrb[20].mxu0 %vm418_vm1, %v7866_v23  ;;  %257 = vperm.xlu0 %7142, %v223_v40   ;;  %v8340_v40 = vld [vmem:[%s9468_s3 + $0x78] sm:$0xff] }
  0x2d   :  { %6162 = vmatprep.mubr.msk.f32.mxu0 %vm418_vm1, %v7871_v24  ;;  %6136 = vmatprep.mubr.msk.f32.mxu1 %vm418_vm1, %v7871_v24 }
  0x2e   :  { %262 = vperm.xlu1 %7143, %v224_v41  }
  0x2f   :  { %6137 = vmatmul.mubr.msk.f32.gmra.mrb[14].mxu1 %vm418_vm1, %v7886_v27 }
  0x30   :  { %6163 = vmatmul.mubr.msk.f32.gmra.mrb[22].mxu0 %vm418_vm1, %v7886_v27  ;;  %247 = vperm.xlu0 %7142, %v221_v42  }
  0x31   :  { %6165 = vmatprep.mubr.msk.f32.mxu0 %vm418_vm1, %v7780_v8  ;;  %6139 = vmatprep.mubr.msk.f32.mxu1 %vm418_vm1, %v7780_v8 }
  0x32   :  { %252 = vperm.xlu1 %7143, %v222_v43  }
  0x33   :  { %6140 = vmatmul.mubr.msk.f32.gmra.mrb[16].mxu1 %vm418_vm1, %v7808_v13 }
  0x34   :  { %6166 = vmatmul.mubr.msk.f32.gmra.mrb[24].mxu0 %vm418_vm1, %v7808_v13  ;;  %267 = vperm.xlu0 %7142, %v225_v44  }
  0x35   :  { %6168 = vmatprep.mubr.msk.f32.mxu0 %vm418_vm1, %v7818_v15  ;;  %6142 = vmatprep.mubr.msk.f32.mxu1 %vm418_vm1, %v7818_v15 }
  0x36   :  { %272 = vperm.xlu1 %7143, %v226_v45   ;;  %v5452_v45 = vld [vmem:[%s9465_s0 + $0x1c] sm:$0xf] }
  0x37   :  { %6143 = vmatmul.mubr.msk.f32.gmra.mrb[18].mxu1 %vm418_vm1, %v7842_v19 }
  0x38   :  { %6169 = vmatmul.mubr.msk.f32.gmra.mrb[26].mxu0 %vm418_vm1, %v7842_v19  ;;  %297 = vperm.xlu0 %7142, %v231_v46  }
  0x39   :  { %6199 = vmatprep.mubr.msk.f32.mxu0 %vm418_vm1, %v7742_v1  ;;  %6173 = vmatprep.mubr.msk.f32.mxu1 %vm418_vm1, %v7742_v1 }
  0x3a   :  { %302 = vperm.xlu1 %7143, %v232_v47  }
  0x3b   :  { %6174 = vmatmul.mubr.msk.f32.vlgmr.msra.gmra.mrb[20].mxu1 %vm418_vm1, %v7747_v2 }
  0x3c   :  { %6200 = vmatmul.mubr.msk.f32.vlgmr.msra.gmra.mrb[28].mxu0 %vm418_vm1, %v7747_v2  ;;  %307 = vperm.xlu0 %7142, %v233_v49  }
  0x3d   :  { %6202 = vmatprep.mubr.msk.f32.mxu0 %vm418_vm1, %v7755_v3  ;;  %6250 = vmatpush3.msk.msra.mxu0 %vm467_vm0, %v7901_v30  ;;  %v8253_v30 = vld [vmem:[%s9468_s3 + $0x20] sm:$0xff] }
  0x3e   :  { %6301 = vmatprep.subr.mxu0 %v9478_v51  ;;  %312 = vperm.xlu1 %7143, %v234_v50  }
  0x3f   :  { %6176 = vmatprep.mubr.msk.f32.mxu1 %vm418_vm1, %v7755_v3  ;;  %6224 = vmatpush3.msk.msra.mxu1 %vm467_vm0, %v5416_v6 }
  0x40   :  { %6203 = vmatmul.mubr.msk.f32.gmra.mrb[30].mxu0 %vm418_vm1, %v7765_v5  ;;  %277 = vperm.xlu0 %7142, %v227_v52  }
  0x41   :  { %6205 = vmatprep.mubr.msk.f32.mxu0 %vm418_vm1, %v7774_v7  ;;  %6177 = vmatmul.mubr.msk.f32.gmra.mrb[22].mxu1 %vm418_vm1, %v7765_v5 }
  0x42   :  { %282 = vperm.xlu1 %7143, %v228_v53   ;;  %6179 = vmatprep.mubr.msk.f32.mxu1 %vm418_vm1, %v7774_v7 }
  0x43   :  { %6275 = vmatprep.subr.msk.mxu1 %vm467_vm0, %v5452_v45 }
  0x44   :  { %6206 = vmatmul.mubr.msk.f32.gmra.mrb[32].mxu0 %vm418_vm1, %v7803_v12  ;;  %287 = vperm.xlu0 %7142, %v229_v54  }
  0x45   :  { %6208 = vmatprep.mubr.msk.f32.mxu0 %vm418_vm1, %v7813_v14  ;;  %6180 = vmatmul.mubr.msk.f32.gmra.mrb[24].mxu1 %vm418_vm1, %v7803_v12 }
  0x46   :  { %292 = vperm.xlu1 %7143, %v230_v55   ;;  %6182 = vmatprep.mubr.msk.f32.mxu1 %vm418_vm1, %v7813_v14 }
  0x48   :  { %6209 = vmatmul.mubr.msk.f32.gmra.mrb[34].mxu0 %vm418_vm1, %v7837_v18  ;;  %333 = vperm.xlu0 %7142, %v315_v56  }
  0x49   :  { %6211 = vmatprep.mubr.msk.f32.mxu0 %vm418_vm1, %v7847_v20  ;;  %6183 = vmatmul.mubr.msk.f32.gmra.mrb[26].mxu1 %vm418_vm1, %v7837_v18 }
  0x4a   :  { %338 = vperm.xlu1 %7143, %v316_v57   ;;  %6185 = vmatprep.mubr.msk.f32.mxu1 %vm418_vm1, %v7847_v20 }
  0x4c   :  { %6212 = vmatmul.mubr.msk.f32.gmra.mrb[36].mxu0 %vm418_vm1, %v7866_v23  ;;  %353 = vperm.xlu0 %7142, %v319_v58  }
  0x4d   :  { %6214 = vmatprep.mubr.msk.f32.mxu0 %vm418_vm1, %v7871_v24  ;;  %6186 = vmatmul.mubr.msk.f32.gmra.mrb[28].mxu1 %vm418_vm1, %v7866_v23 }
  0x4e   :  { %358 = vperm.xlu1 %7143, %v320_v59   ;;  %6188 = vmatprep.mubr.msk.f32.mxu1 %vm418_vm1, %v7871_v24 }
  0x50   :  { %6215 = vmatmul.mubr.msk.f32.gmra.mrb[38].mxu0 %vm418_vm1, %v7886_v27  ;;  %343 = vperm.xlu0 %7142, %v317_v60  }
  0x51   :  { %6217 = vmatprep.mubr.msk.f32.mxu0 %vm418_vm1, %v7780_v8  ;;  %6189 = vmatmul.mubr.msk.f32.gmra.mrb[30].mxu1 %vm418_vm1, %v7886_v27 }
  0x52   :  { %348 = vperm.xlu1 %7143, %v318_v61   ;;  %6191 = vmatprep.mubr.msk.f32.mxu1 %vm418_vm1, %v7780_v8 }
  0x54   :  { %6218 = vmatmul.mubr.msk.f32.gmra.mrb[40].mxu0 %vm418_vm1, %v7808_v13  ;;  %363 = vperm.xlu0 %7142, %v321_v62  }
  0x55   :  { %6220 = vmatprep.mubr.msk.f32.mxu0 %vm418_vm1, %v7818_v15  ;;  %6192 = vmatmul.mubr.msk.f32.gmra.mrb[32].mxu1 %vm418_vm1, %v7808_v13 }
  0x56   :  { %368 = vperm.xlu1 %7143, %v322_v63   ;;  %6194 = vmatprep.mubr.msk.f32.mxu1 %vm418_vm1, %v7818_v15 }
  0x58   :  { %6221 = vmatmul.mubr.msk.f32.gmra.mrb[42].mxu0 %vm418_vm1, %v7842_v19  ;;  %393 = vperm.xlu0 %7142, %v327_v0  }
  0x59   :  { %6251 = vmatprep.mubr.msk.f32.mxu0 %vm418_vm1, %v7742_v1  ;;  %6195 = vmatmul.mubr.msk.f32.gmra.mrb[34].mxu1 %vm418_vm1, %v7842_v19 }
  0x5a   :  { %398 = vperm.xlu1 %7143, %v328_v4   ;;  %6225 = vmatprep.mubr.msk.f32.mxu1 %vm418_vm1, %v7742_v1 }
  0x5c   :  { %6252 = vmatmul.mubr.msk.f32.vlgmr.msra.gmra.mrb[44].mxu0 %vm418_vm1, %v7747_v2  ;;  %403 = vperm.xlu0 %7142, %v329_v9  }
  0x5d   :  { %6254 = vmatprep.mubr.msk.f32.mxu0 %vm418_vm1, %v7755_v3  ;;  %6302 = vmatpush3.msra.mxu0 %v9478_v51 }
  0x5e   :  { %408 = vperm.xlu1 %7143, %v330_v10   ;;  %6226 = vmatmul.mubr.msk.f32.vlgmr.msra.gmra.mrb[36].mxu1 %vm418_vm1, %v7747_v2 }
  0x5f   :  { %6228 = vmatprep.mubr.msk.f32.mxu1 %vm418_vm1, %v7755_v3  ;;  %6276 = vmatpush3.msk.msra.mxu1 %vm467_vm0, %v5452_v45 }
  0x60   :  { %6255 = vmatmul.mubr.msk.f32.gmra.mrb[46].mxu0 %vm418_vm1, %v7765_v5  ;;  %373 = vperm.xlu0 %7142, %v323_v11  }
  0x61   :  { %6257 = vmatprep.mubr.msk.f32.mxu0 %vm418_vm1, %v7774_v7 }
  0x62   :  { %378 = vperm.xlu1 %7143, %v324_v16   ;;  %6229 = vmatmul.mubr.msk.f32.gmra.mrb[38].mxu1 %vm418_vm1, %v7765_v5 }
  0x63   :  { %6231 = vmatprep.mubr.msk.f32.mxu1 %vm418_vm1, %v7774_v7 }
  0x64   :  { %6258 = vmatmul.mubr.msk.f32.gmra.mrb[48].mxu0 %vm418_vm1, %v7803_v12  ;;  %383 = vperm.xlu0 %7142, %v325_v17  }
  0x65   :  { %6260 = vmatprep.mubr.msk.f32.mxu0 %vm418_vm1, %v7813_v14 }
  0x66   :  { %388 = vperm.xlu1 %7143, %v326_v21   ;;  %6232 = vmatmul.mubr.msk.f32.gmra.mrb[40].mxu1 %vm418_vm1, %v7803_v12 }
  0x67   :  { %6234 = vmatprep.mubr.msk.f32.mxu1 %vm418_vm1, %v7813_v14 }
  0x68   :  { %6261 = vmatmul.mubr.msk.f32.gmra.mrb[50].mxu0 %vm418_vm1, %v7837_v18  ;;  %414 = vperm.xlu0 %7142, %v411_v22  }
  0x69   :  { %6263 = vmatprep.mubr.msk.f32.mxu0 %vm418_vm1, %v7847_v20 }
  0x6a   :  { %6235 = vmatmul.mubr.msk.f32.gmra.mrb[42].mxu1 %vm418_vm1, %v7837_v18 }
  0x6b   :  { %6237 = vmatprep.mubr.msk.f32.mxu1 %vm418_vm1, %v7847_v20 }
  0x6c   :  { %6264 = vmatmul.mubr.msk.f32.gmra.mrb[52].mxu0 %vm418_vm1, %v7866_v23 }
  0x6d   :  { %6266 = vmatprep.mubr.msk.f32.mxu0 %vm418_vm1, %v7871_v24 }
  0x6e   :  { %6238 = vmatmul.mubr.msk.f32.gmra.mrb[44].mxu1 %vm418_vm1, %v7866_v23 }
  0x6f   :  { %6240 = vmatprep.mubr.msk.f32.mxu1 %vm418_vm1, %v7871_v24 }
  0x70   :  { %6267 = vmatmul.mubr.msk.f32.gmra.mrb[54].mxu0 %vm418_vm1, %v7886_v27 }
  0x71   :  { %6269 = vmatprep.mubr.msk.f32.mxu0 %vm418_vm1, %v7780_v8 }
  0x72   :  { %6241 = vmatmul.mubr.msk.f32.gmra.mrb[46].mxu1 %vm418_vm1, %v7886_v27 }
  0x73   :  { %6243 = vmatprep.mubr.msk.f32.mxu1 %vm418_vm1, %v7780_v8 }
  0x74   :  { %6270 = vmatmul.mubr.msk.f32.gmra.mrb[56].mxu0 %vm418_vm1, %v7808_v13 }
  0x75   :  { %6272 = vmatprep.mubr.msk.f32.mxu0 %vm418_vm1, %v7818_v15 }
  0x76   :  { %6244 = vmatmul.mubr.msk.f32.gmra.mrb[48].mxu1 %vm418_vm1, %v7808_v13 }
  0x77   :  { %6246 = vmatprep.mubr.msk.f32.mxu1 %vm418_vm1, %v7818_v15 }
  0x78   :  { %6273 = vmatmul.mubr.msk.f32.gmra.mrb[58].mxu0 %vm418_vm1, %v7842_v19 }
  0x79   :  { %6303 = vmatprep.mubr.msk.f32.mxu0 %vm1817_vm2, %v8217_v25 }
  0x7a   :  { %6247 = vmatmul.mubr.msk.f32.gmra.mrb[50].mxu1 %vm418_vm1, %v7842_v19 }
  0x7b   :  { %6277 = vmatprep.mubr.msk.f32.mxu1 %vm418_vm1, %v7742_v1  ;;  %v8298_v1 = vld [vmem:[%s9468_s3 + $0x48] sm:$0xff] }
  0x7c   :  { %6304 = vmatmul.mubr.msk.f32.vlgmr.msra.gmra.mrb[0].mxu0 %vm1817_vm2, %v8230_v26 }
  0x7d   :  { %6306 = vmatprep.mubr.msk.f32.mxu0 %vm1817_vm2, %v8235_v28 }
  0x7e   :  { %6278 = vmatmul.mubr.msk.f32.vlgmr.msra.gmra.mrb[52].mxu1 %vm418_vm1, %v7747_v2 }
  0x7f   :  { %6280 = vmatprep.mubr.msk.f32.mxu1 %vm418_vm1, %v7755_v3 }
  0x80   :  { %6307 = vmatmul.mubr.msk.f32.gmra.mrb[2].mxu0 %vm1817_vm2, %v8248_v29 }
  0x81   :  { %6309 = vmatprep.mubr.msk.f32.mxu0 %vm1817_vm2, %v8253_v30 }
  0x82   :  { %6281 = vmatmul.mubr.msk.f32.gmra.mrb[54].mxu1 %vm418_vm1, %v7765_v5 }
  0x83   :  { %6283 = vmatprep.mubr.msk.f32.mxu1 %vm418_vm1, %v7774_v7 }
  0x84   :  { %6310 = vmatmul.mubr.msk.f32.gmra.mrb[4].mxu0 %vm1817_vm2, %v8266_v31 }
  0x85   :  { %6312 = vmatprep.mubr.msk.f32.mxu0 %vm1817_vm2, %v8271_v32 }
  0x86   :  { %6284 = vmatmul.mubr.msk.f32.gmra.mrb[56].mxu1 %vm418_vm1, %v7803_v12  ;;  %v8393_v3 = vpop.permute.xlu0 %141 }
  0x87   :  { %6286 = vmatprep.mubr.msk.f32.mxu1 %vm418_vm1, %v7813_v14  ;;  %v8391_v2 = vpop.permute.xlu1 %161 }
  0x88   :  { %6313 = vmatmul.mubr.msk.f32.gmra.mrb[6].mxu0 %vm1817_vm2, %v8284_v33 }
  0x89   :  { %6315 = vmatprep.mubr.msk.f32.mxu0 %vm1817_vm2, %v8289_v34 }
  0x8a   :  { %6287 = vmatmul.mubr.msk.f32.gmra.mrb[58].mxu1 %vm418_vm1, %v7837_v18  ;;  %v8397_v7 = vpop.permute.xlu0 %146 }
  0x8b   :  { %6289 = vmatprep.mubr.msk.f32.mxu1 %vm418_vm1, %v7847_v20  ;;  %v8395_v5 = vpop.permute.xlu1 %166 }
  0x8c   :  { %6316 = vmatmul.mubr.msk.f32.gmra.mrb[8].mxu0 %vm1817_vm2, %v8298_v1 }
  0x8d   :  { %6318 = vmatprep.mubr.msk.f32.mxu0 %vm1817_vm2, %v8303_v35 }
  0x8e   :  { %6290 = vmatmul.mubr.msk.f32.gmra.mrb[60].mxu1 %vm418_vm1, %v7866_v23  ;;  %v8401_v12 = vpop.permute.xlu0 %151 }
  0x8f   :  { %6292 = vmatprep.mubr.msk.f32.mxu1 %vm418_vm1, %v7871_v24 }
  0x90   :  { %6319 = vmatmul.mubr.msk.f32.gmra.mrb[10].mxu0 %vm1817_vm2, %v8312_v36 }
  0x91   :  { %6321 = vmatprep.mubr.msk.f32.mxu0 %vm1817_vm2, %v8317_v37 }
  0x92   :  { %6293 = vmatmul.mubr.msk.f32.gmra.mrb[62].mxu1 %vm418_vm1, %v7886_v27 }
  0x93   :  { %6295 = vmatprep.mubr.msk.f32.mxu1 %vm418_vm1, %v7780_v8  ;;  %v8399_v8 = vpop.permute.xlu1 %156  ;;  %v8405_v20 = vpop.permute.xlu0 %171 }
  0x94   :  { %6322 = vmatmul.mubr.msk.f32.gmra.mrb[60].mxu0 %vm1817_vm2, %v8326_v38 }
  0x95   :  { %6324 = vmatprep.mubr.msk.f32.mxu0 %vm1817_vm2, %v8331_v39 }
  0x96   :  { %6296 = vmatmul.mubr.msk.f32.gmra.mrb[64].mxu1 %vm418_vm1, %v7808_v13 }
  0x97   :  { %6298 = vmatprep.mubr.msk.f32.mxu1 %vm418_vm1, %v7818_v15  ;;  %v8403_v18 = vpop.permute.xlu1 %176  ;;  %v8412_v49 = vpop.permute.xlu0 %201 }
  0x98   :  { %6325 = vmatmul.mubr.msk.f32.gmra.mrb[62].mxu0 %vm1817_vm2, %v8340_v40 }
  0x99   :  { %6367 = vmatprep.mubr.msk.f32.mxu0 %vm1817_vm2, %v8217_v25 }
  0x9a   :  { %6299 = vmatmul.mubr.msk.f32.gmra.mrb[66].mxu1 %vm418_vm1, %v7842_v19 }
  0x9b   :  { %6335 = vmatprep.mubr.msk.f32.mxu1 %vm1817_vm2, %v8217_v25  ;;  %v8409_v47 = vpop.permute.xlu1 %206  ;;  %v8421_v6 = vpop.permute.xlu0 %211 }
  0x9f   :  { %v8419_v63 = vpop.permute.xlu1 %216  ;;  %v8427_v45 = vpop.permute.xlu0 %181 }
  0xa3   :  { %v8423_v21 = vpop.permute.xlu1 %186 }
  0xdc   :  { %v8346_v41 = vpop.f32.mrb[0].mxu1 }
  0xdd   :  { %v8348_v42 = vpop.f32.mrb[1].mxu1  ;;  %v603_v22 = vadd.f32 %v8346_v41, %v8409_v47 }
  0xe0   :  { %v8350_v43 = vpop.f32.mrb[2].mxu1 }
  0xe1   :  { %v8352_v44 = vpop.f32.mrb[3].mxu1 }
 0x14f   :  { %v6305_v13 = vpop.f32.mrb[0].mxu0 }
 0x150   :  { %v1932_v14 = vpop.f32.mrb[1].mxu0  ;;  %v6863_v48 = vadd.f32 %v6305_v13, %v8397_v7  ;;  %v598_v13 = vadd.f32 %v8348_v42, %v8412_v49 }
 0x151   :  { %v6864_v50 = vadd.f32 %v1932_v14, %v8393_v3 }
 0x152   :  { %v2028_v58 = vmul.f32 0.5, %v6863_v48 }
 0x153   :  { %v6308_v15 = vpop.f32.mrb[2].mxu0  ;;  %v2027_v60 = vmul.f32 0.5, %v6864_v50  ;;  %v608_v50 = vadd.f32 %v8352_v44, %v8421_v6 }
 0x154   :  { %v1942_v19 = vpop.f32.mrb[3].mxu0  ;;  %v6865_v59 = vadd.f32 %v6308_v15, %v8399_v8 }
 0x155   :  { %v6866_v61 = vadd.f32 %v1942_v19, %v8401_v12 }
 0x156   :  { %v2030_v10 = vmul.f32 0.5, %v6865_v59 }
 0x157   :  { %v6311_v23 = vpop.f32.mrb[4].mxu0  ;;  %v2029_v11 = vmul.f32 0.5, %v6866_v61 }
 0x158   :  { %v6867_v24 = vadd.f32 %v6311_v23, %v8395_v5  ;;  %v1952_v27 = vpop.f32.mrb[5].mxu0 }
 0x159   :  { %v6868_v46 = vadd.f32 %v1952_v27, %v8391_v2 }
 0x15a   :  { %v2032_v53 = vmul.f32 0.5, %v6867_v24 }
 0x15b   :  { %v6314_v52 = vpop.f32.mrb[6].mxu0  ;;  %v2031_v56 = vmul.f32 0.5, %v6868_v46  ;;  %v613_v46 = vadd.f32 %v8350_v43, %v8419_v63 }
 0x15c   :  { %v6869_v54 = vadd.f32 %v6314_v52, %v8403_v18  ;;  %v1962_v55 = vpop.f32.mrb[7].mxu0  ;;  %7144 = vtanh.f32 %v2032_v53  ;;  %v8437_v53 = vpop.permute.xlu1 %196 }
 0x15d   :  { %v6870_v57 = vadd.f32 %v1962_v55, %v8405_v20  ;;  %7146 = vtanh.f32 %v2031_v56 }
 0x15e   :  { %v2034_v0 = vmul.f32 0.5, %v6869_v54  ;;  %7148 = vtanh.f32 %v2028_v58 }
 0x15f   :  { %v6317_v62 = vpop.f32.mrb[8].mxu0  ;;  %v2033_v9 = vmul.f32 0.5, %v6870_v57  ;;  %7150 = vtanh.f32 %v2027_v60  ;;  %v8439_v57 = vpop.permute.xlu0 %191 }
 0x160   :  { %v1972_v4 = vpop.f32.mrb[9].mxu0  ;;  %7152 = vtanh.f32 %v2034_v0  ;;  %v6871_v23 = vadd.f32 %v6317_v62, %v8423_v21 }
 0x161   :  { %7154 = vtanh.f32 %v2033_v9  ;;  %v6872_v48 = vadd.f32 %v1972_v4, %v8427_v45 }
 0x162   :  { %7156 = vtanh.f32 %v2030_v10  ;;  %v2036_v59 = vmul.f32 0.5, %v6871_v23 }
 0x163   :  { %v6320_v16 = vpop.f32.mrb[10].mxu0  ;;  %7158 = vtanh.f32 %v2029_v11  ;;  %v2035_v0 = vmul.f32 0.5, %v6872_v48 }
 0x164   :  { %v1982_v17 = vpop.f32.mrb[11].mxu0  ;;  %v6873_v43 = vadd.f32 %v6320_v16, %v8437_v53 }
 0x165   :  { %v6874_v44 = vadd.f32 %v1982_v17, %v8439_v57 }
 0x166   :  { %v7145_v27 = vpop.eup %7144 }
 0x167   :  { %v6323_v14 = vpop.f32.mrb[60].mxu0  ;;  %v7147_v41 = vpop.eup %7146  ;;  %v2056_v58 = vmul.f32 0.5, %v7145_v27  ;;  %v2037_v16 = vmul.f32 0.5, %v6874_v44 }
 0x168   :  { %v2024_v15 = vadd.f32 %v6323_v14, %v603_v22  ;;  %v1992_v19 = vpop.f32.mrb[61].mxu0  ;;  %v7149_v52 = vpop.eup %7148  ;;  %v2055_v62 = vmul.f32 0.5, %v7147_v41 }
 0x169   :  { %v2023_v24 = vadd.f32 %v1992_v19, %v598_v13  ;;  %v7151_v56 = vpop.eup %7150  ;;  %v2052_v9 = vmul.f32 0.5, %v7149_v52  ;;  %v2068_v13 = vadd.f32 0.5, %v2056_v58 }
 0x16a   :  { %7160 = vtanh.f32 %v2024_v15  ;;  %v7153_v61 = vpop.eup %7152  ;;  %v2051_v11 = vmul.f32 0.5, %v7151_v56  ;;  %v2038_v15 = vmul.f32 0.5, %v6873_v43  ;;  %v2067_v19 = vadd.f32 0.5, %v2055_v62 }
 0x16b   :  { %7162 = vtanh.f32 %v2023_v24  ;;  %v6326_v42 = vpop.f32.mrb[62].mxu0  ;;  %v7155_v4 = vpop.eup %7154  ;;  %v2058_v14 = vmul.f32 0.5, %v7153_v61  ;;  %v2064_v24 = vadd.f32 0.5, %v2052_v9 }
 0x16c   :  { %v2026_v54 = vadd.f32 %v6326_v42, %v613_v46  ;;  %v2002_v55 = vpop.f32.mrb[63].mxu0  ;;  %v7157_v10 = vpop.eup %7156  ;;  %v2057_v23 = vmul.f32 0.5, %v7155_v4  ;;  %v2063_v48 = vadd.f32 0.5, %v2051_v11 }
 0x16d   :  { %v2025_v60 = vadd.f32 %v2002_v55, %v608_v50  ;;  %v7159_v22 = vpop.eup %7158  ;;  %v2054_v27 = vmul.f32 0.5, %v7157_v10  ;;  %v2080_v50 = vmul.f32 0.0, %v2068_v13  ;;  %v2070_v42 = vadd.f32 0.5, %v2058_v14 }
 0x16e   :  { %7164 = vtanh.f32 %v2026_v54  ;;  %v2053_v17 = vmul.f32 0.5, %v7159_v22  ;;  %v2079_v54 = vmul.f32 0.0, %v2067_v19  ;;  %v2069_v55 = vadd.f32 0.5, %v2057_v23 }
 0x16f   :  { %7166 = vtanh.f32 %v2025_v60  ;;  %v2066_v58 = vadd.f32 0.5, %v2054_v27 }
 0x170   :  { %7168 = vtanh.f32 %v2036_v59  ;;  %v2065_v60 = vadd.f32 0.5, %v2053_v17  ;;  %v2081_v4 = vmul.f32 0.0, %v2069_v55 }
 0x171   :  { %7170 = vtanh.f32 %v2035_v0  ;;  %v2082_v0 = vmul.f32 0.0, %v2070_v42 }
 0x172   :  { %7172 = vtanh.f32 %v2038_v15 }
 0x173   :  { %7174 = vtanh.f32 %v2037_v16 }
 0x174   :  { %v7161_v46 = vpop.eup %7160 }
 0x175   :  { %v7163_v41 = vpop.eup %7162  ;;  %v2084_v52 = vmul.f32 %v7161_v46, %v2064_v24 }
 0x176   :  { %v2083_v56 = vmul.f32 %v7163_v41, %v2063_v48 }
 0x177   :  { %v8443_v59 = vadd.f32 %v2084_v52, %v2080_v50 }
 0x178   :  { %v7165_v43 = vpop.eup %7164  ;;  %v8445_v61 = vadd.f32 %v2083_v56, %v2079_v54 }
 0x179   :  { %v7167_v62 = vpop.eup %7166  ;;  %7176 = vtanh.f32 %v8443_v59  ;;  %v2086_v44 = vmul.f32 %v7165_v43, %v2066_v58 }
 0x17a   :  { %7178 = vtanh.f32 %v8445_v61  ;;  %v2085_v9 = vmul.f32 %v7167_v62, %v2065_v60  ;;  %v7169_v10 = vpop.eup %7168 }
 0x17b   :  { %v8449_v11 = vadd.f32 %v2086_v44, %v2082_v0  ;;  %v7171_v22 = vpop.eup %7170  ;;  %v2060_v14 = vmul.f32 0.5, %v7169_v10 }
 0x17c   :  { %v8451_v13 = vadd.f32 %v2085_v9, %v2081_v4  ;;  %v7173_v15 = vpop.eup %7172  ;;  %v2059_v19 = vmul.f32 0.5, %v7171_v22 }
 0x17d   :  { %7180 = vtanh.f32 %v8449_v11  ;;  %v7175_v23 = vpop.eup %7174  ;;  %v2072_v16 = vadd.f32 0.5, %v2060_v14  ;;  %v2062_v24 = vmul.f32 0.5, %v7173_v15 }
 0x17e   :  { %7182 = vtanh.f32 %v8451_v13  ;;  %v2071_v46 = vadd.f32 0.5, %v2059_v19  ;;  %v2061_v48 = vmul.f32 0.5, %v7175_v23 }
 0x17f   :  { %v2074_v42 = vadd.f32 0.5, %v2062_v24 }
 0x180   :  { %v2073_v54 = vadd.f32 0.5, %v2061_v48 }
 0x183   :  { %v7177_v27 = vpop.eup %7176 }
 0x184   :  { %v7179_v17 = vpop.eup %7178  ;;  %v2096_v41 = vmul.f32 %v7177_v27, %v2072_v16 }
 0x185   :  { %v2095_v50 = vmul.f32 %v7179_v17, %v2071_v46 }
 0x187   :  { %v7181_v52 = vpop.eup %7180  ;;  %v6749_v55 = vpack.c.bf16 %v2096_v41, %v2095_v50 }
 0x188   :  { %v7183_v56 = vpop.eup %7182  ;;  %v2098_v58 = vmul.f32 %v7181_v52, %v2074_v42 }
 0x189   :  { %6750 = vmatprep.subr.bf16.mxu1 %v6749_v55  ;;  %v2097_v43 = vmul.f32 %v7183_v56, %v2073_v54 }
 0x18a   :  { %6752 = vmatpush3.bf16.msra.mxu1 %v6749_v55 }
 0x18b   :  { %v6753_v60 = vpack.c.bf16 %v2098_v58, %v2097_v43 }
 0x18d   :  { %6754 = vmatprep.subr.bf16.mxu1 %v6753_v60 }
 0x18e   :  { %6756 = vmatpush3.bf16.msra.mxu1 %v6753_v60 }
 0x191   :  { %6336 = vmatmul.mubr.msk.f32.vlgmr.msra.gmra.mrb[4].mxu1 %vm1817_vm2, %v8230_v26 }
 0x192   :  { %6338 = vmatprep.mubr.msk.f32.mxu1 %vm1817_vm2, %v8235_v28 }
 0x195   :  { %6339 = vmatmul.mubr.msk.f32.gmra.mrb[6].mxu1 %vm1817_vm2, %v8248_v29 }
 0x196   :  { %6341 = vmatprep.mubr.msk.f32.mxu1 %vm1817_vm2, %v8253_v30 }
 0x199   :  { %6342 = vmatmul.mubr.msk.f32.gmra.mrb[8].mxu1 %vm1817_vm2, %v8266_v31 }
 0x19a   :  { %6344 = vmatprep.mubr.msk.f32.mxu1 %vm1817_vm2, %v8271_v32 }
 0x19d   :  { %6345 = vmatmul.mubr.msk.f32.gmra.mrb[10].mxu1 %vm1817_vm2, %v8284_v33 }
 0x19e   :  { %6347 = vmatprep.mubr.msk.f32.mxu1 %vm1817_vm2, %v8289_v34 }
 0x1a1   :  { %6348 = vmatmul.mubr.msk.f32.gmra.mrb[12].mxu1 %vm1817_vm2, %v8298_v1 }
 0x1a2   :  { %6350 = vmatprep.mubr.msk.f32.mxu1 %vm1817_vm2, %v8303_v35 }
 0x1a5   :  { %6351 = vmatmul.mubr.msk.f32.gmra.mrb[14].mxu1 %vm1817_vm2, %v8312_v36 }
 0x1a6   :  { %6353 = vmatprep.mubr.msk.f32.mxu1 %vm1817_vm2, %v8317_v37 }
 0x1a9   :  { %6354 = vmatmul.mubr.msk.f32.gmra.mrb[16].mxu1 %vm1817_vm2, %v8326_v38 }
 0x1aa   :  { %6356 = vmatprep.mubr.msk.f32.mxu1 %vm1817_vm2, %v8331_v39 }
 0x1ad   :  { %6357 = vmatmul.mubr.msk.f32.gmra.mrb[18].mxu1 %vm1817_vm2, %v8340_v40 }
 0x1ae   :  { %6399 = vmatprep.mubr.msk.f32.mxu1 %vm1817_vm2, %v8217_v25 }
 0x264   :  { %v6337_v62 = vpop.f32.mrb[4].mxu1 }
 0x265   :  { %v2181_v0 = vpop.f32.mrb[5].mxu1  ;;  %v6883_v15 = vadd.f32 %v6337_v62, %v8397_v7 }
 0x266   :  { %v6884_v19 = vadd.f32 %v2181_v0, %v8393_v3 }
 0x267   :  { %v2277_v17 = vmul.f32 0.5, %v6883_v15 }
 0x268   :  { %v6340_v44 = vpop.f32.mrb[6].mxu1  ;;  %v2276_v50 = vmul.f32 0.5, %v6884_v19 }
 0x269   :  { %v2191_v4 = vpop.f32.mrb[7].mxu1  ;;  %v6885_v41 = vadd.f32 %v6340_v44, %v8399_v8 }
 0x26a   :  { %v6886_v42 = vadd.f32 %v2191_v4, %v8401_v12 }
 0x26b   :  { %v2279_v58 = vmul.f32 0.5, %v6885_v41 }
 0x26c   :  { %v6343_v9 = vpop.f32.mrb[8].mxu1  ;;  %v2278_v43 = vmul.f32 0.5, %v6886_v42 }
 0x26d   :  { %v6887_v10 = vadd.f32 %v6343_v9, %v8395_v5  ;;  %v2201_v22 = vpop.f32.mrb[9].mxu1 }
 0x26e   :  { %v6888_v14 = vadd.f32 %v2201_v22, %v8391_v2 }
 0x26f   :  { %v2281_v16 = vmul.f32 0.5, %v6887_v10 }
 0x270   :  { %v6346_v23 = vpop.f32.mrb[10].mxu1  ;;  %v2280_v46 = vmul.f32 0.5, %v6888_v14 }
 0x271   :  { %v6889_v24 = vadd.f32 %v6346_v23, %v8403_v18  ;;  %v2211_v27 = vpop.f32.mrb[11].mxu1  ;;  %7184 = vtanh.f32 %v2281_v16 }
 0x272   :  { %v6890_v48 = vadd.f32 %v2211_v27, %v8405_v20  ;;  %7186 = vtanh.f32 %v2280_v46 }
 0x273   :  { %v2283_v54 = vmul.f32 0.5, %v6889_v24  ;;  %7188 = vtanh.f32 %v2277_v17 }
 0x274   :  { %v6349_v52 = vpop.f32.mrb[12].mxu1  ;;  %v2282_v56 = vmul.f32 0.5, %v6890_v48  ;;  %7190 = vtanh.f32 %v2276_v50 }
 0x275   :  { %v2221_v55 = vpop.f32.mrb[13].mxu1  ;;  %7192 = vtanh.f32 %v2283_v54  ;;  %v6891_v9 = vadd.f32 %v6349_v52, %v8423_v21 }
 0x276   :  { %7194 = vtanh.f32 %v2282_v56  ;;  %v6892_v14 = vadd.f32 %v2221_v55, %v8427_v45 }
 0x277   :  { %7196 = vtanh.f32 %v2279_v58  ;;  %v2285_v48 = vmul.f32 0.5, %v6891_v9 }
 0x278   :  { %v6352_v60 = vpop.f32.mrb[14].mxu1  ;;  %7198 = vtanh.f32 %v2278_v43  ;;  %v2284_v52 = vmul.f32 0.5, %v6892_v14 }
 0x279   :  { %v2231_v62 = vpop.f32.mrb[15].mxu1  ;;  %v6893_v17 = vadd.f32 %v6352_v60, %v8437_v53 }
 0x27a   :  { %v6894_v54 = vadd.f32 %v2231_v62, %v8439_v57 }
 0x27b   :  { %v7185_v22 = vpop.eup %7184  ;;  %v2287_v9 = vmul.f32 0.5, %v6893_v17 }
 0x27c   :  { %v6355_v0 = vpop.f32.mrb[16].mxu1  ;;  %v7187_v15 = vpop.eup %7186  ;;  %v2305_v46 = vmul.f32 0.5, %v7185_v22  ;;  %v2286_v22 = vmul.f32 0.5, %v6894_v54 }
 0x27d   :  { %v6895_v44 = vadd.f32 %v6355_v0, %v8409_v47  ;;  %v2241_v4 = vpop.f32.mrb[17].mxu1  ;;  %v7189_v23 = vpop.eup %7188  ;;  %v2304_v42 = vmul.f32 0.5, %v7187_v15 }
 0x27e   :  { %v6896_v10 = vadd.f32 %v2241_v4, %v8412_v49  ;;  %v7191_v27 = vpop.eup %7190  ;;  %v2301_v56 = vmul.f32 0.5, %v7189_v23 }
 0x27f   :  { %7200 = vtanh.f32 %v6895_v44  ;;  %v7193_v50 = vpop.eup %7192  ;;  %v2300_v43 = vmul.f32 0.5, %v7191_v27  ;;  %v2317_v44 = vadd.f32 0.5, %v2305_v46 }
 0x280   :  { %7202 = vtanh.f32 %v6896_v10  ;;  %v6358_v19 = vpop.f32.mrb[18].mxu1  ;;  %v7195_v55 = vpop.eup %7194  ;;  %v2307_v4 = vmul.f32 0.5, %v7193_v50  ;;  %v2316_v10 = vadd.f32 0.5, %v2304_v42 }
 0x281   :  { %v6897_v16 = vadd.f32 %v6358_v19, %v8419_v63  ;;  %v2251_v24 = vpop.f32.mrb[19].mxu1  ;;  %v7197_v58 = vpop.eup %7196  ;;  %v2306_v60 = vmul.f32 0.5, %v7195_v55  ;;  %v2313_v19 = vadd.f32 0.5, %v2301_v56  ;;  %v2329_v23 = vmul.f32 %v2317_v44, %v8443_v59 }
 0x282   :  { %v6898_v41 = vadd.f32 %v2251_v24, %v8421_v6  ;;  %v7199_v0 = vpop.eup %7198  ;;  %v2303_v15 = vmul.f32 0.5, %v7197_v58  ;;  %v2312_v24 = vadd.f32 0.5, %v2300_v43  ;;  %v2328_v46 = vmul.f32 %v2316_v10, %v8445_v61 }
 0x283   :  { %7204 = vtanh.f32 %v6897_v16  ;;  %v2302_v62 = vmul.f32 0.5, %v7199_v0  ;;  %v2318_v50 = vadd.f32 0.5, %v2306_v60 }
 0x284   :  { %7206 = vtanh.f32 %v6898_v41  ;;  %v2319_v41 = vadd.f32 0.5, %v2307_v4  ;;  %v2315_v17 = vadd.f32 0.5, %v2303_v15 }
 0x285   :  { %7208 = vtanh.f32 %v2285_v48  ;;  %v2314_v54 = vadd.f32 0.5, %v2302_v62  ;;  %v2330_v43 = vmul.f32 %v2318_v50, %v8451_v13 }
 0x286   :  { %7210 = vtanh.f32 %v2284_v52  ;;  %v2331_v58 = vmul.f32 %v2319_v41, %v8449_v11 }
 0x287   :  { %7212 = vtanh.f32 %v2287_v9 }
 0x288   :  { %7214 = vtanh.f32 %v2286_v22 }
 0x289   :  { %v7201_v14 = vpop.eup %7200 }
 0x28a   :  { %v7203_v16 = vpop.eup %7202  ;;  %v2333_v27 = vmul.f32 %v7201_v14, %v2313_v19 }
 0x28b   :  { %v2332_v48 = vmul.f32 %v7203_v16, %v2312_v24 }
 0x28c   :  { %v8505_v42 = vadd.f32 %v2333_v27, %v2329_v23 }
 0x28d   :  { %v7205_v52 = vpop.eup %7204  ;;  %v8507_v55 = vadd.f32 %v2332_v48, %v2328_v46 }
 0x28e   :  { %v7207_v56 = vpop.eup %7206  ;;  %7216 = vtanh.f32 %v8505_v42  ;;  %v2335_v59 = vmul.f32 %v7205_v52, %v2315_v17 }
 0x28f   :  { %7218 = vtanh.f32 %v8507_v55  ;;  %v2334_v61 = vmul.f32 %v7207_v56, %v2314_v54  ;;  %v7209_v0 = vpop.eup %7208 }
 0x290   :  { %v8513_v44 = vadd.f32 %v2335_v59, %v2331_v58  ;;  %v7211_v4 = vpop.eup %7210  ;;  %v2309_v10 = vmul.f32 0.5, %v7209_v0 }
 0x291   :  { %v8515_v9 = vadd.f32 %v2334_v61, %v2330_v43  ;;  %v7213_v11 = vpop.eup %7212  ;;  %v2308_v60 = vmul.f32 0.5, %v7211_v4 }
 0x292   :  { %7220 = vtanh.f32 %v8513_v44  ;;  %v7215_v22 = vpop.eup %7214  ;;  %v2321_v19 = vadd.f32 0.5, %v2309_v10  ;;  %v2311_v15 = vmul.f32 0.5, %v7213_v11 }
 0x293   :  { %7222 = vtanh.f32 %v8515_v9  ;;  %v2320_v14 = vadd.f32 0.5, %v2308_v60  ;;  %v2310_v24 = vmul.f32 0.5, %v7215_v22 }
 0x294   :  { %v2323_v41 = vadd.f32 0.5, %v2311_v15 }
 0x295   :  { %v2322_v46 = vadd.f32 0.5, %v2310_v24 }
 0x298   :  { %v7217_v13 = vpop.eup %7216 }
 0x299   :  { %v7219_v62 = vpop.eup %7218  ;;  %v2345_v16 = vmul.f32 %v7217_v13, %v2321_v19 }
 0x29a   :  { %v2344_v23 = vmul.f32 %v7219_v62, %v2320_v14 }
 0x29c   :  { %v7221_v27 = vpop.eup %7220  ;;  %v6757_v50 = vpack.c.bf16 %v2345_v16, %v2344_v23 }
 0x29d   :  { %v7223_v48 = vpop.eup %7222  ;;  %v2347_v17 = vmul.f32 %v7221_v27, %v2323_v41 }
 0x29e   :  { %6758 = vmatprep.subr.bf16.mxu0 %v6757_v50  ;;  %v2346_v52 = vmul.f32 %v7223_v48, %v2322_v46 }
 0x29f   :  { %6760 = vmatpush3.bf16.msra.mxu0 %v6757_v50 }
 0x2a0   :  { %v6761_v54 = vpack.c.bf16 %v2347_v17, %v2346_v52 }
 0x2a2   :  { %6762 = vmatprep.subr.bf16.mxu0 %v6761_v54 }
 0x2a3   :  { %6764 = vmatpush3.bf16.msra.mxu0 %v6761_v54 }
 0x2a6   :  { %6368 = vmatmul.mubr.msk.f32.vlgmr.msra.gmra.mrb[12].mxu0 %vm1817_vm2, %v8230_v26 }
 0x2a7   :  { %6370 = vmatprep.mubr.msk.f32.mxu0 %vm1817_vm2, %v8235_v28 }
 0x2aa   :  { %6371 = vmatmul.mubr.msk.f32.gmra.mrb[14].mxu0 %vm1817_vm2, %v8248_v29 }
 0x2ab   :  { %6373 = vmatprep.mubr.msk.f32.mxu0 %vm1817_vm2, %v8253_v30 }
 0x2ae   :  { %6374 = vmatmul.mubr.msk.f32.gmra.mrb[16].mxu0 %vm1817_vm2, %v8266_v31 }
 0x2af   :  { %6376 = vmatprep.mubr.msk.f32.mxu0 %vm1817_vm2, %v8271_v32 }
 0x2b2   :  { %6377 = vmatmul.mubr.msk.f32.gmra.mrb[18].mxu0 %vm1817_vm2, %v8284_v33 }
 0x2b3   :  { %6379 = vmatprep.mubr.msk.f32.mxu0 %vm1817_vm2, %v8289_v34 }
 0x2b6   :  { %6380 = vmatmul.mubr.msk.f32.gmra.mrb[20].mxu0 %vm1817_vm2, %v8298_v1 }
 0x2b7   :  { %6382 = vmatprep.mubr.msk.f32.mxu0 %vm1817_vm2, %v8303_v35 }
 0x2ba   :  { %6383 = vmatmul.mubr.msk.f32.gmra.mrb[22].mxu0 %vm1817_vm2, %v8312_v36 }
 0x2bb   :  { %6385 = vmatprep.mubr.msk.f32.mxu0 %vm1817_vm2, %v8317_v37 }
 0x2be   :  { %6386 = vmatmul.mubr.msk.f32.gmra.mrb[24].mxu0 %vm1817_vm2, %v8326_v38 }
 0x2bf   :  { %6388 = vmatprep.mubr.msk.f32.mxu0 %vm1817_vm2, %v8331_v39 }
 0x2c2   :  { %6389 = vmatmul.mubr.msk.f32.gmra.mrb[26].mxu0 %vm1817_vm2, %v8340_v40 }
 0x2c3   :  { %6431 = vmatprep.mubr.msk.f32.mxu0 %vm1817_vm2, %v8217_v25 }
 0x379   :  { %v6369_v56 = vpop.f32.mrb[12].mxu0 }
 0x37a   :  { %v2430_v58 = vpop.f32.mrb[13].mxu0  ;;  %v6899_v11 = vadd.f32 %v6369_v56, %v8397_v7 }
 0x37b   :  { %v6900_v60 = vadd.f32 %v2430_v58, %v8393_v3 }
 0x37c   :  { %v2526_v24 = vmul.f32 0.5, %v6899_v11 }
 0x37d   :  { %v6372_v59 = vpop.f32.mrb[14].mxu0  ;;  %v2525_v16 = vmul.f32 0.5, %v6900_v60 }
 0x37e   :  { %v2440_v43 = vpop.f32.mrb[15].mxu0  ;;  %v6901_v62 = vadd.f32 %v6372_v59, %v8399_v8 }
 0x37f   :  { %v6902_v23 = vadd.f32 %v2440_v43, %v8401_v12 }
 0x380   :  { %v2528_v48 = vmul.f32 0.5, %v6901_v62 }
 0x381   :  { %v6375_v61 = vpop.f32.mrb[16].mxu0  ;;  %v2527_v17 = vmul.f32 0.5, %v6902_v23 }
 0x382   :  { %v6903_v0 = vadd.f32 %v6375_v61, %v8395_v5  ;;  %v2450_v4 = vpop.f32.mrb[17].mxu0 }
 0x383   :  { %v6904_v10 = vadd.f32 %v2450_v4, %v8391_v2 }
 0x384   :  { %v2530_v19 = vmul.f32 0.5, %v6903_v0 }
 0x385   :  { %v6378_v22 = vpop.f32.mrb[18].mxu0  ;;  %v2529_v25 = vmul.f32 0.5, %v6904_v10 }
 0x386   :  { %v6905_v15 = vadd.f32 %v6378_v22, %v8403_v18  ;;  %v2460_v13 = vpop.f32.mrb[19].mxu0  ;;  %7224 = vtanh.f32 %v2530_v19 }
 0x387   :  { %v6906_v14 = vadd.f32 %v2460_v13, %v8405_v20  ;;  %7226 = vtanh.f32 %v2529_v25 }
 0x388   :  { %v2532_v27 = vmul.f32 0.5, %v6905_v15  ;;  %7228 = vtanh.f32 %v2526_v24 }
 0x389   :  { %v6381_v41 = vpop.f32.mrb[20].mxu0  ;;  %v2531_v50 = vmul.f32 0.5, %v6906_v14  ;;  %7230 = vtanh.f32 %v2525_v16 }
 0x38a   :  { %v2470_v46 = vpop.f32.mrb[21].mxu0  ;;  %7232 = vtanh.f32 %v2532_v27  ;;  %v6907_v43 = vadd.f32 %v6381_v41, %v8423_v21 }
 0x38b   :  { %7234 = vtanh.f32 %v2531_v50  ;;  %v6908_v4 = vadd.f32 %v2470_v46, %v8427_v45 }
 0x38c   :  { %7236 = vtanh.f32 %v2528_v48  ;;  %v2534_v25 = vmul.f32 0.5, %v6907_v43 }
 0x38d   :  { %v6384_v52 = vpop.f32.mrb[22].mxu0  ;;  %7238 = vtanh.f32 %v2527_v17  ;;  %v2533_v23 = vmul.f32 0.5, %v6908_v4 }
 0x38e   :  { %v2480_v54 = vpop.f32.mrb[23].mxu0  ;;  %v6909_v14 = vadd.f32 %v6384_v52, %v8437_v53 }
 0x38f   :  { %v6910_v41 = vadd.f32 %v2480_v54, %v8439_v57 }
 0x390   :  { %v7225_v0 = vpop.eup %7224 }
 0x391   :  { %v6387_v56 = vpop.f32.mrb[24].mxu0  ;;  %v7227_v10 = vpop.eup %7226  ;;  %v2554_v13 = vmul.f32 0.5, %v7225_v0 }
 0x392   :  { %v6911_v58 = vadd.f32 %v6387_v56, %v8409_v47  ;;  %v2490_v59 = vpop.f32.mrb[25].mxu0  ;;  %v7229_v60 = vpop.eup %7228  ;;  %v2553_v16 = vmul.f32 0.5, %v7227_v10 }
 0x393   :  { %v6912_v61 = vadd.f32 %v2490_v59, %v8412_v49  ;;  %v7231_v15 = vpop.eup %7230  ;;  %v2550_v46 = vmul.f32 0.5, %v7229_v60  ;;  %v2566_v56 = vadd.f32 0.5, %v2554_v13  ;;  %v2536_v59 = vmul.f32 0.5, %v6909_v14 }
 0x394   :  { %7240 = vtanh.f32 %v6911_v58  ;;  %v7233_v62 = vpop.eup %7232  ;;  %v2549_v48 = vmul.f32 0.5, %v7231_v15  ;;  %v2565_v43 = vadd.f32 0.5, %v2553_v16 }
 0x395   :  { %7242 = vtanh.f32 %v6912_v61  ;;  %v6390_v11 = vpop.f32.mrb[26].mxu0  ;;  %v7235_v27 = vpop.eup %7234  ;;  %v2556_v58 = vmul.f32 0.5, %v7233_v62  ;;  %v2535_v61 = vmul.f32 0.5, %v6910_v41  ;;  %v2562_v0 = vadd.f32 0.5, %v2550_v46 }
 0x396   :  { %v6913_v22 = vadd.f32 %v6390_v11, %v8419_v63  ;;  %v2500_v19 = vpop.f32.mrb[27].mxu0  ;;  %v7237_v50 = vpop.eup %7236  ;;  %v2555_v52 = vmul.f32 0.5, %v7235_v27  ;;  %v2561_v11 = vadd.f32 0.5, %v2549_v48  ;;  %v2578_v60 = vmul.f32 %v2566_v56, %v8505_v42 }
 0x397   :  { %v6914_v24 = vadd.f32 %v2500_v19, %v8421_v6  ;;  %v7239_v17 = vpop.eup %7238  ;;  %v2552_v10 = vmul.f32 0.5, %v7237_v50  ;;  %v2568_v19 = vadd.f32 0.5, %v2556_v58  ;;  %v2577_v13 = vmul.f32 %v2565_v43, %v8507_v55 }
 0x398   :  { %7244 = vtanh.f32 %v6913_v22  ;;  %v2551_v54 = vmul.f32 0.5, %v7239_v17 }
 0x399   :  { %7246 = vtanh.f32 %v6914_v24  ;;  %v2567_v24 = vadd.f32 0.5, %v2555_v52  ;;  %v2564_v14 = vadd.f32 0.5, %v2552_v10  ;;  %v2580_v46 = vmul.f32 %v2568_v19, %v8513_v44 }
 0x39a   :  { %7248 = vtanh.f32 %v2534_v25 }
 0x39b   :  { %7250 = vtanh.f32 %v2533_v23  ;;  %v2563_v23 = vadd.f32 0.5, %v2551_v54  ;;  %v2579_v50 = vmul.f32 %v2567_v24, %v8515_v9 }
 0x39c   :  { %7252 = vtanh.f32 %v2536_v59 }
 0x39d   :  { %7254 = vtanh.f32 %v2535_v61 }
 0x39e   :  { %v7241_v4 = vpop.eup %7240 }
 0x39f   :  { %v7243_v22 = vpop.eup %7242  ;;  %v2582_v15 = vmul.f32 %v7241_v4, %v2562_v0 }
 0x3a0   :  { %v2581_v25 = vmul.f32 %v7243_v22, %v2561_v11 }
 0x3a1   :  { %v8569_v62 = vadd.f32 %v2582_v15, %v2578_v60 }
 0x3a2   :  { %v7245_v16 = vpop.eup %7244  ;;  %v8571_v41 = vadd.f32 %v2581_v25, %v2577_v13 }
 0x3a3   :  { %v7247_v27 = vpop.eup %7246  ;;  %7256 = vtanh.f32 %v8569_v62  ;;  %v2584_v42 = vmul.f32 %v7245_v16, %v2564_v14 }
 0x3a4   :  { %7258 = vtanh.f32 %v8571_v41  ;;  %v2583_v55 = vmul.f32 %v7247_v27, %v2563_v23  ;;  %v7249_v48 = vpop.eup %7248 }
 0x3a5   :  { %v8577_v17 = vadd.f32 %v2584_v42, %v2580_v46  ;;  %v7251_v56 = vpop.eup %7250  ;;  %v2558_v59 = vmul.f32 0.5, %v7249_v48 }
 0x3a6   :  { %v8579_v58 = vadd.f32 %v2583_v55, %v2579_v50  ;;  %v7253_v44 = vpop.eup %7252  ;;  %v2557_v43 = vmul.f32 0.5, %v7251_v56 }
 0x3a7   :  { %7260 = vtanh.f32 %v8577_v17  ;;  %v7255_v52 = vpop.eup %7254  ;;  %v2570_v61 = vadd.f32 0.5, %v2558_v59  ;;  %v2560_v0 = vmul.f32 0.5, %v7253_v44 }
 0x3a8   :  { %7262 = vtanh.f32 %v8579_v58  ;;  %v2569_v10 = vadd.f32 0.5, %v2557_v43  ;;  %v2559_v4 = vmul.f32 0.5, %v7255_v52 }
 0x3a9   :  { %v2572_v60 = vadd.f32 0.5, %v2560_v0 }
 0x3aa   :  { %v2571_v15 = vadd.f32 0.5, %v2559_v4 }
 0x3ad   :  { %v7257_v9 = vpop.eup %7256 }
 0x3ae   :  { %v7259_v11 = vpop.eup %7258  ;;  %v2594_v54 = vmul.f32 %v7257_v9, %v2570_v61 }
 0x3af   :  { %v2593_v22 = vmul.f32 %v7259_v11, %v2569_v10 }
 0x3b1   :  { %v7261_v19 = vpop.eup %7260  ;;  %v6765_v13 = vpack.c.bf16 %v2594_v54, %v2593_v22 }
 0x3b2   :  { %v7263_v24 = vpop.eup %7262  ;;  %v2596_v25 = vmul.f32 %v7261_v19, %v2572_v60 }
 0x3b3   :  { %6766 = vmatprep.subr.bf16.mxu1 %v6765_v13  ;;  %v2595_v14 = vmul.f32 %v7263_v24, %v2571_v15 }
 0x3b4   :  { %6768 = vmatpush3.bf16.msra.mxu1 %v6765_v13 }
 0x3b5   :  { %v6769_v16 = vpack.c.bf16 %v2596_v25, %v2595_v14 }
 0x3b7   :  { %6770 = vmatprep.subr.bf16.mxu1 %v6769_v16 }
 0x3b8   :  { %6772 = vmatpush3.bf16.msra.mxu1 %v6769_v16 }
 0x3bb   :  { %6400 = vmatmul.mubr.msk.f32.vlgmr.msra.gmra.mrb[20].mxu1 %vm1817_vm2, %v8230_v26  ;;  %v8616_v26 = vld [vmem:[%s9468_s3] sm:$0xff] }
 0x3bc   :  { %6402 = vmatprep.mubr.msk.f32.mxu1 %vm1817_vm2, %v8235_v28 }
 0x3bf   :  { %6403 = vmatmul.mubr.msk.f32.gmra.mrb[22].mxu1 %vm1817_vm2, %v8248_v29 }
 0x3c0   :  { %6405 = vmatprep.mubr.msk.f32.mxu1 %vm1817_vm2, %v8253_v30 }
 0x3c3   :  { %6406 = vmatmul.mubr.msk.f32.gmra.mrb[24].mxu1 %vm1817_vm2, %v8266_v31 }
 0x3c4   :  { %6408 = vmatprep.mubr.msk.f32.mxu1 %vm1817_vm2, %v8271_v32 }
 0x3c7   :  { %6409 = vmatmul.mubr.msk.f32.gmra.mrb[26].mxu1 %vm1817_vm2, %v8284_v33 }
 0x3c8   :  { %6411 = vmatprep.mubr.msk.f32.mxu1 %vm1817_vm2, %v8289_v34 }
 0x3cb   :  { %6412 = vmatmul.mubr.msk.f32.gmra.mrb[28].mxu1 %vm1817_vm2, %v8298_v1 }
 0x3cc   :  { %6414 = vmatprep.mubr.msk.f32.mxu1 %vm1817_vm2, %v8303_v35 }
 0x3cf   :  { %6415 = vmatmul.mubr.msk.f32.gmra.mrb[30].mxu1 %vm1817_vm2, %v8312_v36 }
 0x3d0   :  { %6417 = vmatprep.mubr.msk.f32.mxu1 %vm1817_vm2, %v8317_v37 }
 0x3d3   :  { %6418 = vmatmul.mubr.msk.f32.gmra.mrb[32].mxu1 %vm1817_vm2, %v8326_v38 }
 0x3d4   :  { %6420 = vmatprep.mubr.msk.f32.mxu1 %vm1817_vm2, %v8331_v39 }
 0x3d7   :  { %6421 = vmatmul.mubr.msk.f32.gmra.mrb[34].mxu1 %vm1817_vm2, %v8340_v40 }
 0x3d8   :  { %6463 = vmatprep.mubr.msk.f32.mxu1 %vm1817_vm2, %v8616_v26 }
 0x48e   :  { %v6401_v28 = vpop.f32.mrb[20].mxu1 }
 0x48f   :  { %v2679_v29 = vpop.f32.mrb[21].mxu1  ;;  %v6915_v35 = vadd.f32 %v6401_v28, %v8397_v7 }
 0x490   :  { %v6916_v36 = vadd.f32 %v2679_v29, %v8393_v3 }
 0x491   :  { %v2775_v46 = vmul.f32 0.5, %v6915_v35 }
 0x492   :  { %v6404_v30 = vpop.f32.mrb[22].mxu1  ;;  %v2774_v50 = vmul.f32 0.5, %v6916_v36 }
 0x493   :  { %v2689_v31 = vpop.f32.mrb[23].mxu1  ;;  %v6917_v42 = vadd.f32 %v6404_v30, %v8399_v8 }
 0x494   :  { %v6918_v55 = vadd.f32 %v2689_v31, %v8401_v12 }
 0x495   :  { %v2777_v43 = vmul.f32 0.5, %v6917_v42 }
 0x496   :  { %v6407_v32 = vpop.f32.mrb[24].mxu1  ;;  %v2776_v52 = vmul.f32 0.5, %v6918_v55 }
 0x497   :  { %v6919_v33 = vadd.f32 %v6407_v32, %v8395_v5  ;;  %v2699_v34 = vpop.f32.mrb[25].mxu1 }
 0x498   :  { %v6920_v1 = vadd.f32 %v2699_v34, %v8391_v2 }
 0x499   :  { %v2779_v38 = vmul.f32 0.5, %v6919_v33 }
 0x49a   :  { %v6410_v37 = vpop.f32.mrb[26].mxu1  ;;  %v2778_v23 = vmul.f32 0.5, %v6920_v1 }
 0x49b   :  { %v6921_v39 = vadd.f32 %v6410_v37, %v8403_v18  ;;  %v2709_v40 = vpop.f32.mrb[27].mxu1  ;;  %7264 = vtanh.f32 %v2779_v38 }
 0x49c   :  { %v6922_v27 = vadd.f32 %v2709_v40, %v8405_v20  ;;  %7266 = vtanh.f32 %v2778_v23 }
 0x49d   :  { %v2781_v56 = vmul.f32 0.5, %v6921_v39  ;;  %7268 = vtanh.f32 %v2775_v46 }
 0x49e   :  { %v6413_v48 = vpop.f32.mrb[28].mxu1  ;;  %v2780_v44 = vmul.f32 0.5, %v6922_v27  ;;  %7270 = vtanh.f32 %v2774_v50 }
 0x49f   :  { %v2719_v59 = vpop.f32.mrb[29].mxu1  ;;  %7272 = vtanh.f32 %v2781_v56  ;;  %v6923_v11 = vadd.f32 %v6413_v48, %v8423_v21 }
 0x4a0   :  { %7274 = vtanh.f32 %v2780_v44  ;;  %v6924_v60 = vadd.f32 %v2719_v59, %v8427_v45 }
 0x4a1   :  { %7276 = vtanh.f32 %v2777_v43  ;;  %v2783_v28 = vmul.f32 0.5, %v6923_v11 }
 0x4a2   :  { %v6416_v61 = vpop.f32.mrb[30].mxu1  ;;  %7278 = vtanh.f32 %v2776_v52  ;;  %v2782_v33 = vmul.f32 0.5, %v6924_v60 }
 0x4a3   :  { %v2729_v0 = vpop.f32.mrb[31].mxu1  ;;  %v6925_v29 = vadd.f32 %v6416_v61, %v8437_v53 }
 0x4a4   :  { %v6926_v34 = vadd.f32 %v2729_v0, %v8439_v57 }
 0x4a5   :  { %v7265_v22 = vpop.eup %7264  ;;  %v2785_v23 = vmul.f32 0.5, %v6925_v29 }
 0x4a6   :  { %v6419_v9 = vpop.f32.mrb[32].mxu1  ;;  %v7267_v19 = vpop.eup %7266  ;;  %v2803_v16 = vmul.f32 0.5, %v7265_v22  ;;  %v2784_v42 = vmul.f32 0.5, %v6926_v34 }
 0x4a7   :  { %v6927_v10 = vadd.f32 %v6419_v9, %v8409_v47  ;;  %v2739_v4 = vpop.f32.mrb[33].mxu1  ;;  %v7269_v13 = vpop.eup %7268  ;;  %v2802_v32 = vmul.f32 0.5, %v7267_v19 }
 0x4a8   :  { %v6928_v54 = vadd.f32 %v2739_v4, %v8412_v49  ;;  %v7271_v14 = vpop.eup %7270  ;;  %v2799_v35 = vmul.f32 0.5, %v7269_v13  ;;  %v2815_v39 = vadd.f32 0.5, %v2803_v16 }
 0x4a9   :  { %7280 = vtanh.f32 %v6927_v10  ;;  %v7273_v31 = vpop.eup %7272  ;;  %v2798_v37 = vmul.f32 0.5, %v7271_v14  ;;  %v2814_v27 = vadd.f32 0.5, %v2802_v32 }
 0x4aa   :  { %7282 = vtanh.f32 %v6928_v54  ;;  %v6422_v15 = vpop.f32.mrb[34].mxu1  ;;  %v7275_v1 = vpop.eup %7274  ;;  %v2805_v40 = vmul.f32 0.5, %v7273_v31  ;;  %v2811_v50 = vadd.f32 0.5, %v2799_v35  ;;  %v2827_v43 = vmul.f32 %v2815_v39, %v8569_v62 }
 0x4ab   :  { %v6929_v24 = vadd.f32 %v6422_v15, %v8419_v63  ;;  %v2749_v25 = vpop.f32.mrb[35].mxu1  ;;  %v7277_v36 = vpop.eup %7276  ;;  %v2804_v46 = vmul.f32 0.5, %v7275_v1  ;;  %v2810_v56 = vadd.f32 0.5, %v2798_v37  ;;  %v2826_v0 = vmul.f32 %v2814_v27, %v8571_v41 }
 0x4ac   :  { %v6930_v30 = vadd.f32 %v2749_v25, %v8421_v6  ;;  %v7279_v38 = vpop.eup %7278  ;;  %v2801_v55 = vmul.f32 0.5, %v7277_v36  ;;  %v2817_v52 = vadd.f32 0.5, %v2805_v40 }
 0x4ad   :  { %7284 = vtanh.f32 %v6929_v24  ;;  %v2800_v59 = vmul.f32 0.5, %v7279_v38  ;;  %v2816_v9 = vadd.f32 0.5, %v2804_v46 }
 0x4ae   :  { %7286 = vtanh.f32 %v6930_v30  ;;  %v2813_v4 = vadd.f32 0.5, %v2801_v55  ;;  %v2829_v15 = vmul.f32 %v2817_v52, %v8577_v17  ;;  %v8662_v55 = vld [vmem:[%s9468_s3 + $0x10] sm:$0xff]  ;;  %v8704_v52 = vld [vmem:[%s9468_s3 + $0x40] sm:$0xff] }
 0x4af   :  { %7288 = vtanh.f32 %v2783_v28  ;;  %v2812_v22 = vadd.f32 0.5, %v2800_v59  ;;  %v2828_v13 = vmul.f32 %v2816_v9, %v8579_v58  ;;  %v8683_v59 = vld [vmem:[%s9468_s3 + $0x28] sm:$0xff]  ;;  %v8725_v9 = vld [vmem:[%s9468_s3 + $0x58] sm:$0xff] }
 0x4b0   :  { %7290 = vtanh.f32 %v2782_v33 }
 0x4b1   :  { %7292 = vtanh.f32 %v2785_v23 }
 0x4b2   :  { %7294 = vtanh.f32 %v2784_v42 }
 0x4b3   :  { %v7281_v48 = vpop.eup %7280 }
 0x4b4   :  { %v7283_v44 = vpop.eup %7282  ;;  %v2831_v61 = vmul.f32 %v7281_v48, %v2811_v50  ;;  %v8655_v50 = vld [vmem:[%s9468_s3 + $0x8] sm:$0xff]  ;;  %v8669_v48 = vld [vmem:[%s9468_s3 + $0x18] sm:$0xff] }
 0x4b5   :  { %v2830_v10 = vmul.f32 %v7283_v44, %v2810_v56  ;;  %v8676_v56 = vld [vmem:[%s9468_s3 + $0x20] sm:$0xff]  ;;  %v8690_v44 = vld [vmem:[%s9468_s3 + $0x30] sm:$0xff] }
 0x4b6   :  { %v8638_v11 = vadd.f32 %v2831_v61, %v2827_v43  ;;  %v8697_v43 = vld [vmem:[%s9468_s3 + $0x38] sm:$0xff]  ;;  %v8711_v61 = vld [vmem:[%s9468_s3 + $0x48] sm:$0xff] }
 0x4b7   :  { %v7285_v54 = vpop.eup %7284  ;;  %v8640_v60 = vadd.f32 %v2830_v10, %v2826_v0  ;;  %v8718_v0 = vld [vmem:[%s9468_s3 + $0x50] sm:$0xff]  ;;  %v8732_v10 = vld [vmem:[%s9468_s3 + $0x60] sm:$0xff] }
 0x4b8   :  { %v7287_v19 = vpop.eup %7286  ;;  %7296 = vtanh.f32 %v8638_v11  ;;  %v2833_v62 = vmul.f32 %v7285_v54, %v2813_v4  ;;  %v8739_v4 = vld [vmem:[%s9468_s3 + $0x68] sm:$0xff]  ;;  %v8746_v54 = vld [vmem:[%s9468_s3 + $0x70] sm:$0xff] }
 0x4b9   :  { %7298 = vtanh.f32 %v8640_v60  ;;  %v2832_v41 = vmul.f32 %v7287_v19, %v2812_v22  ;;  %v7289_v24 = vpop.eup %7288  ;;  %v8753_v22 = vld [vmem:[%s9468_s3 + $0x78] sm:$0xff] }
 0x4ba   :  { %v8646_v25 = vadd.f32 %v2833_v62, %v2829_v15  ;;  %v7291_v14 = vpop.eup %7290  ;;  %v2807_v28 = vmul.f32 0.5, %v7289_v24 }
 0x4bb   :  { %v8648_v16 = vadd.f32 %v2832_v41, %v2828_v13  ;;  %v7293_v17 = vpop.eup %7292  ;;  %v2806_v29 = vmul.f32 0.5, %v7291_v14 }
 0x4bc   :  { %7300 = vtanh.f32 %v8646_v25  ;;  %v7295_v30 = vpop.eup %7294  ;;  %v2819_v31 = vadd.f32 0.5, %v2807_v28  ;;  %v2809_v32 = vmul.f32 0.5, %v7293_v17 }
 0x4bd   :  { %7302 = vtanh.f32 %v8648_v16  ;;  %v2818_v33 = vadd.f32 0.5, %v2806_v29  ;;  %v2808_v34 = vmul.f32 0.5, %v7295_v30 }
 0x4be   :  { %v2821_v37 = vadd.f32 0.5, %v2809_v32 }
 0x4bf   :  { %v2820_v39 = vadd.f32 0.5, %v2808_v34 }
 0x4c2   :  { %v7297_v58 = vpop.eup %7296 }
 0x4c3   :  { %v7299_v1 = vpop.eup %7298  ;;  %v2843_v35 = vmul.f32 %v7297_v58, %v2819_v31 }
 0x4c4   :  { %v2842_v36 = vmul.f32 %v7299_v1, %v2818_v33 }
 0x4c6   :  { %v7301_v38 = vpop.eup %7300  ;;  %v6773_v40 = vpack.c.bf16 %v2843_v35, %v2842_v36 }
 0x4c7   :  { %v7303_v23 = vpop.eup %7302  ;;  %v2845_v27 = vmul.f32 %v7301_v38, %v2821_v37 }
 0x4c8   :  { %6774 = vmatprep.subr.bf16.mxu0 %v6773_v40  ;;  %v2844_v46 = vmul.f32 %v7303_v23, %v2820_v39 }
 0x4c9   :  { %6776 = vmatpush3.bf16.msra.mxu0 %v6773_v40 }
 0x4ca   :  { %v6777_v42 = vpack.c.bf16 %v2845_v27, %v2844_v46 }
 0x4cc   :  { %6778 = vmatprep.subr.bf16.mxu0 %v6777_v42 }
 0x4cd   :  { %6780 = vmatpush3.bf16.msra.mxu0 %v6777_v42 }
 0x4d0   :  { %6432 = vmatmul.mubr.msk.f32.vlgmr.msra.gmra.mrb[28].mxu0 %vm1817_vm2, %v8655_v50 }
 0x4d1   :  { %6434 = vmatprep.mubr.msk.f32.mxu0 %vm1817_vm2, %v8662_v55 }
 0x4d4   :  { %6435 = vmatmul.mubr.msk.f32.gmra.mrb[30].mxu0 %vm1817_vm2, %v8669_v48 }
 0x4d5   :  { %6437 = vmatprep.mubr.msk.f32.mxu0 %vm1817_vm2, %v8676_v56 }
 0x4d8   :  { %6438 = vmatmul.mubr.msk.f32.gmra.mrb[32].mxu0 %vm1817_vm2, %v8683_v59 }
 0x4d9   :  { %6440 = vmatprep.mubr.msk.f32.mxu0 %vm1817_vm2, %v8690_v44 }
 0x4dc   :  { %6441 = vmatmul.mubr.msk.f32.gmra.mrb[34].mxu0 %vm1817_vm2, %v8697_v43 }
 0x4dd   :  { %6443 = vmatprep.mubr.msk.f32.mxu0 %vm1817_vm2, %v8704_v52 }
 0x4e0   :  { %6444 = vmatmul.mubr.msk.f32.gmra.mrb[36].mxu0 %vm1817_vm2, %v8711_v61 }
 0x4e1   :  { %6446 = vmatprep.mubr.msk.f32.mxu0 %vm1817_vm2, %v8718_v0 }
 0x4e4   :  { %6447 = vmatmul.mubr.msk.f32.gmra.mrb[38].mxu0 %vm1817_vm2, %v8725_v9 }
 0x4e5   :  { %6449 = vmatprep.mubr.msk.f32.mxu0 %vm1817_vm2, %v8732_v10 }
 0x4e8   :  { %6450 = vmatmul.mubr.msk.f32.gmra.mrb[40].mxu0 %vm1817_vm2, %v8739_v4 }
 0x4e9   :  { %6452 = vmatprep.mubr.msk.f32.mxu0 %vm1817_vm2, %v8746_v54 }
 0x4ec   :  { %6453 = vmatmul.mubr.msk.f32.gmra.mrb[42].mxu0 %vm1817_vm2, %v8753_v22 }
 0x4ed   :  { %6495 = vmatprep.mubr.msk.f32.mxu0 %vm1817_vm2, %v8616_v26 }
 0x5a3   :  { %v6433_v19 = vpop.f32.mrb[28].mxu0 }
 0x5a4   :  { %v2928_v15 = vpop.f32.mrb[29].mxu0  ;;  %v6931_v17 = vadd.f32 %v6433_v19, %v8397_v7 }
 0x5a5   :  { %v6932_v29 = vadd.f32 %v2928_v15, %v8393_v3 }
 0x5a6   :  { %v3024_v1 = vmul.f32 0.5, %v6931_v17 }
 0x5a7   :  { %v6436_v62 = vpop.f32.mrb[30].mxu0  ;;  %v3023_v36 = vmul.f32 0.5, %v6932_v29 }
 0x5a8   :  { %v2938_v13 = vpop.f32.mrb[31].mxu0  ;;  %v6933_v35 = vadd.f32 %v6436_v62, %v8399_v8 }
 0x5a9   :  { %v6934_v37 = vadd.f32 %v2938_v13, %v8401_v12 }
 0x5aa   :  { %v3026_v27 = vmul.f32 0.5, %v6933_v35 }
 0x5ab   :  { %v6439_v41 = vpop.f32.mrb[32].mxu0  ;;  %v3025_v46 = vmul.f32 0.5, %v6934_v37 }
 0x5ac   :  { %v6935_v24 = vadd.f32 %v6439_v41, %v8395_v5  ;;  %v2948_v14 = vpop.f32.mrb[33].mxu0 }
 0x5ad   :  { %v6936_v28 = vadd.f32 %v2948_v14, %v8391_v2 }
 0x5ae   :  { %v3028_v31 = vmul.f32 0.5, %v6935_v24 }
 0x5af   :  { %v6442_v30 = vpop.f32.mrb[34].mxu0  ;;  %v3027_v33 = vmul.f32 0.5, %v6936_v28 }
 0x5b0   :  { %v6937_v32 = vadd.f32 %v6442_v30, %v8403_v18  ;;  %v2958_v58 = vpop.f32.mrb[35].mxu0  ;;  %7304 = vtanh.f32 %v3028_v31 }
 0x5b1   :  { %v6938_v34 = vadd.f32 %v2958_v58, %v8405_v20  ;;  %7306 = vtanh.f32 %v3027_v33 }
 0x5b2   :  { %v3030_v39 = vmul.f32 0.5, %v6937_v32  ;;  %7308 = vtanh.f32 %v3024_v1 }
 0x5b3   :  { %v6445_v38 = vpop.f32.mrb[36].mxu0  ;;  %v3029_v23 = vmul.f32 0.5, %v6938_v34  ;;  %7310 = vtanh.f32 %v3023_v36 }
 0x5b4   :  { %v2968_v40 = vpop.f32.mrb[37].mxu0  ;;  %7312 = vtanh.f32 %v3030_v39  ;;  %v6939_v41 = vadd.f32 %v6445_v38, %v8423_v21 }
 0x5b5   :  { %7314 = vtanh.f32 %v3029_v23  ;;  %v6940_v28 = vadd.f32 %v2968_v40, %v8427_v45 }
 0x5b6   :  { %7316 = vtanh.f32 %v3026_v27  ;;  %v3032_v34 = vmul.f32 0.5, %v6939_v41 }
 0x5b7   :  { %v6448_v42 = vpop.f32.mrb[38].mxu0  ;;  %7318 = vtanh.f32 %v3025_v46  ;;  %v3031_v38 = vmul.f32 0.5, %v6940_v28 }
 0x5b8   :  { %v2978_v19 = vpop.f32.mrb[39].mxu0  ;;  %v6941_v1 = vadd.f32 %v6448_v42, %v8437_v53 }
 0x5b9   :  { %v6942_v39 = vadd.f32 %v2978_v19, %v8439_v57 }
 0x5ba   :  { %v7305_v14 = vpop.eup %7304  ;;  %v3034_v41 = vmul.f32 0.5, %v6941_v1 }
 0x5bb   :  { %v6451_v15 = vpop.f32.mrb[40].mxu0  ;;  %v7307_v17 = vpop.eup %7306  ;;  %v3052_v33 = vmul.f32 0.5, %v7305_v14  ;;  %v3033_v14 = vmul.f32 0.5, %v6942_v39 }
 0x5bc   :  { %v6943_v62 = vadd.f32 %v6451_v15, %v8409_v47  ;;  %v2988_v13 = vpop.f32.mrb[41].mxu0  ;;  %v7309_v30 = vpop.eup %7308  ;;  %v3051_v37 = vmul.f32 0.5, %v7307_v17 }
 0x5bd   :  { %v6944_v24 = vadd.f32 %v2988_v13, %v8412_v49  ;;  %v7311_v58 = vpop.eup %7310  ;;  %v3048_v23 = vmul.f32 0.5, %v7309_v30 }
 0x5be   :  { %7320 = vtanh.f32 %v6943_v62  ;;  %v7313_v36 = vpop.eup %7312  ;;  %v3047_v46 = vmul.f32 0.5, %v7311_v58  ;;  %v3064_v62 = vadd.f32 0.5, %v3052_v33 }
 0x5bf   :  { %7322 = vtanh.f32 %v6944_v24  ;;  %v6454_v29 = vpop.f32.mrb[42].mxu0  ;;  %v7315_v40 = vpop.eup %7314  ;;  %v3054_v13 = vmul.f32 0.5, %v7313_v36  ;;  %v3063_v24 = vadd.f32 0.5, %v3051_v37 }
 0x5c0   :  { %v6945_v31 = vadd.f32 %v6454_v29, %v8419_v63  ;;  %v2998_v32 = vpop.f32.mrb[43].mxu0  ;;  %v7317_v27 = vpop.eup %7316  ;;  %v3053_v42 = vmul.f32 0.5, %v7315_v40  ;;  %v3060_v29 = vadd.f32 0.5, %v3048_v23  ;;  %v3076_v30 = vmul.f32 %v3064_v62, %v8638_v11 }
 0x5c1   :  { %v6946_v35 = vadd.f32 %v2998_v32, %v8421_v6  ;;  %v7319_v15 = vpop.eup %7318  ;;  %v3050_v17 = vmul.f32 0.5, %v7317_v27  ;;  %v3059_v32 = vadd.f32 0.5, %v3047_v46  ;;  %v3075_v33 = vmul.f32 %v3063_v24, %v8640_v60 }
 0x5c2   :  { %7324 = vtanh.f32 %v6945_v31  ;;  %v3049_v19 = vmul.f32 0.5, %v7319_v15  ;;  %v3065_v36 = vadd.f32 0.5, %v3053_v42 }
 0x5c3   :  { %7326 = vtanh.f32 %v6946_v35  ;;  %v3066_v35 = vadd.f32 0.5, %v3054_v13  ;;  %v3062_v1 = vadd.f32 0.5, %v3050_v17 }
 0x5c4   :  { %7328 = vtanh.f32 %v3032_v34  ;;  %v3061_v39 = vadd.f32 0.5, %v3049_v19  ;;  %v3077_v46 = vmul.f32 %v3065_v36, %v8648_v16 }
 0x5c5   :  { %7330 = vtanh.f32 %v3031_v38  ;;  %v3078_v27 = vmul.f32 %v3066_v35, %v8646_v25 }
 0x5c6   :  { %7332 = vtanh.f32 %v3034_v41 }
 0x5c7   :  { %7334 = vtanh.f32 %v3033_v14 }
 0x5c8   :  { %v7321_v28 = vpop.eup %7320 }
 0x5c9   :  { %v7323_v31 = vpop.eup %7322  ;;  %v3080_v58 = vmul.f32 %v7321_v28, %v3060_v29 }
 0x5ca   :  { %v3079_v34 = vmul.f32 %v7323_v31, %v3059_v32 }
 0x5cb   :  { %v8777_v37 = vadd.f32 %v3080_v58, %v3076_v30 }
 0x5cc   :  { %v7325_v38 = vpop.eup %7324  ;;  %v8779_v40 = vadd.f32 %v3079_v34, %v3075_v33 }
 0x5cd   :  { %v7327_v23 = vpop.eup %7326  ;;  %7336 = vtanh.f32 %v8777_v37  ;;  %v3082_v11 = vmul.f32 %v7325_v38, %v3062_v1 }
 0x5ce   :  { %7338 = vtanh.f32 %v8779_v40  ;;  %v3081_v60 = vmul.f32 %v7327_v23, %v3061_v39  ;;  %v7329_v15 = vpop.eup %7328 }
 0x5cf   :  { %v8785_v62 = vadd.f32 %v3082_v11, %v3078_v27  ;;  %v7331_v13 = vpop.eup %7330  ;;  %v3056_v24 = vmul.f32 0.5, %v7329_v15 }
 0x5d0   :  { %v8787_v41 = vadd.f32 %v3081_v60, %v3077_v46  ;;  %v7333_v25 = vpop.eup %7332  ;;  %v3055_v42 = vmul.f32 0.5, %v7331_v13 }
 0x5d1   :  { %7340 = vtanh.f32 %v8785_v62  ;;  %v7335_v14 = vpop.eup %7334  ;;  %v3068_v29 = vadd.f32 0.5, %v3056_v24  ;;  %v3058_v17 = vmul.f32 0.5, %v7333_v25 }
 0x5d2   :  { %7342 = vtanh.f32 %v8787_v41  ;;  %v3067_v28 = vadd.f32 0.5, %v3055_v42  ;;  %v3057_v32 = vmul.f32 0.5, %v7335_v14 }
 0x5d3   :  { %v3070_v35 = vadd.f32 0.5, %v3058_v17 }
 0x5d4   :  { %v3069_v33 = vadd.f32 0.5, %v3057_v32 }
 0x5d7   :  { %v7337_v16 = vpop.eup %7336 }
 0x5d8   :  { %v7339_v19 = vpop.eup %7338  ;;  %v3092_v31 = vmul.f32 %v7337_v16, %v3068_v29 }
 0x5d9   :  { %v3091_v30 = vmul.f32 %v7339_v19, %v3067_v28 }
 0x5db   :  { %v7341_v58 = vpop.eup %7340  ;;  %v6781_v36 = vpack.c.bf16 %v3092_v31, %v3091_v30 }
 0x5dc   :  { %v7343_v34 = vpop.eup %7342  ;;  %v3094_v1 = vmul.f32 %v7341_v58, %v3070_v35 }
 0x5dd   :  { %6782 = vmatprep.subr.bf16.mxu1 %v6781_v36  ;;  %v3093_v38 = vmul.f32 %v7343_v34, %v3069_v33 }
 0x5de   :  { %6784 = vmatpush3.bf16.msra.mxu1 %v6781_v36 }
 0x5df   :  { %v6785_v39 = vpack.c.bf16 %v3094_v1, %v3093_v38 }
 0x5e1   :  { %6786 = vmatprep.subr.bf16.mxu1 %v6785_v39 }
 0x5e2   :  { %6788 = vmatpush3.bf16.msra.mxu1 %v6785_v39 }
 0x5e5   :  { %6464 = vmatmul.mubr.msk.f32.vlgmr.msra.gmra.mrb[36].mxu1 %vm1817_vm2, %v8655_v50 }
 0x5e6   :  { %6466 = vmatprep.mubr.msk.f32.mxu1 %vm1817_vm2, %v8662_v55 }
 0x5e9   :  { %6467 = vmatmul.mubr.msk.f32.gmra.mrb[38].mxu1 %vm1817_vm2, %v8669_v48 }
 0x5ea   :  { %6469 = vmatprep.mubr.msk.f32.mxu1 %vm1817_vm2, %v8676_v56 }
 0x5ed   :  { %6470 = vmatmul.mubr.msk.f32.gmra.mrb[40].mxu1 %vm1817_vm2, %v8683_v59 }
 0x5ee   :  { %6472 = vmatprep.mubr.msk.f32.mxu1 %vm1817_vm2, %v8690_v44 }
 0x5f1   :  { %6473 = vmatmul.mubr.msk.f32.gmra.mrb[42].mxu1 %vm1817_vm2, %v8697_v43 }
 0x5f2   :  { %6475 = vmatprep.mubr.msk.f32.mxu1 %vm1817_vm2, %v8704_v52 }
 0x5f5   :  { %6476 = vmatmul.mubr.msk.f32.gmra.mrb[44].mxu1 %vm1817_vm2, %v8711_v61 }
 0x5f6   :  { %6478 = vmatprep.mubr.msk.f32.mxu1 %vm1817_vm2, %v8718_v0 }
 0x5f9   :  { %6479 = vmatmul.mubr.msk.f32.gmra.mrb[46].mxu1 %vm1817_vm2, %v8725_v9 }
 0x5fa   :  { %6481 = vmatprep.mubr.msk.f32.mxu1 %vm1817_vm2, %v8732_v10 }
 0x5fd   :  { %6482 = vmatmul.mubr.msk.f32.gmra.mrb[48].mxu1 %vm1817_vm2, %v8739_v4 }
 0x5fe   :  { %6484 = vmatprep.mubr.msk.f32.mxu1 %vm1817_vm2, %v8746_v54 }
 0x601   :  { %6485 = vmatmul.mubr.msk.f32.gmra.mrb[50].mxu1 %vm1817_vm2, %v8753_v22 }
 0x602   :  { %6527 = vmatprep.mubr.msk.f32.mxu1 %vm1817_vm2, %v8616_v26 }
 0x6b8   :  { %v6465_v23 = vpop.f32.mrb[36].mxu1 }
 0x6b9   :  { %v3177_v27 = vpop.f32.mrb[37].mxu1  ;;  %v6947_v25 = vadd.f32 %v6465_v23, %v8397_v7 }
 0x6ba   :  { %v6948_v42 = vadd.f32 %v3177_v27, %v8393_v3 }
 0x6bb   :  { %v3273_v32 = vmul.f32 0.5, %v6947_v25 }
 0x6bc   :  { %v6468_v11 = vpop.f32.mrb[38].mxu1  ;;  %v3272_v31 = vmul.f32 0.5, %v6948_v42 }
 0x6bd   :  { %v3187_v46 = vpop.f32.mrb[39].mxu1  ;;  %v6949_v19 = vadd.f32 %v6468_v11, %v8399_v8 }
 0x6be   :  { %v6950_v30 = vadd.f32 %v3187_v46, %v8401_v12 }
 0x6bf   :  { %v3275_v34 = vmul.f32 0.5, %v6949_v19 }
 0x6c0   :  { %v6471_v60 = vpop.f32.mrb[40].mxu1  ;;  %v3274_v1 = vmul.f32 0.5, %v6950_v30 }
 0x6c1   :  { %v6951_v15 = vadd.f32 %v6471_v60, %v8395_v5  ;;  %v3197_v13 = vpop.f32.mrb[41].mxu1 }
 0x6c2   :  { %v6952_v24 = vadd.f32 %v3197_v13, %v8391_v2 }
 0x6c3   :  { %v3277_v29 = vmul.f32 0.5, %v6951_v15 }
 0x6c4   :  { %v6474_v14 = vpop.f32.mrb[42].mxu1  ;;  %v3276_v26 = vmul.f32 0.5, %v6952_v24 }
 0x6c5   :  { %v6953_v17 = vadd.f32 %v6474_v14, %v8403_v18  ;;  %v3207_v16 = vpop.f32.mrb[43].mxu1  ;;  %7344 = vtanh.f32 %v3277_v29 }
 0x6c6   :  { %v6954_v28 = vadd.f32 %v3207_v16, %v8405_v20  ;;  %7346 = vtanh.f32 %v3276_v26 }
 0x6c7   :  { %v3279_v58 = vmul.f32 0.5, %v6953_v17  ;;  %7348 = vtanh.f32 %v3273_v32 }
 0x6c8   :  { %v6477_v35 = vpop.f32.mrb[44].mxu1  ;;  %v3278_v36 = vmul.f32 0.5, %v6954_v28  ;;  %7350 = vtanh.f32 %v3272_v31 }
 0x6c9   :  { %v3217_v33 = vpop.f32.mrb[45].mxu1  ;;  %7352 = vtanh.f32 %v3279_v58  ;;  %v6955_v46 = vadd.f32 %v6477_v35, %v8423_v21 }
 0x6ca   :  { %7354 = vtanh.f32 %v3278_v36  ;;  %v6956_v13 = vadd.f32 %v3217_v33, %v8427_v45 }
 0x6cb   :  { %7356 = vtanh.f32 %v3275_v34  ;;  %v3281_v26 = vmul.f32 0.5, %v6955_v46 }
 0x6cc   :  { %v6480_v38 = vpop.f32.mrb[46].mxu1  ;;  %7358 = vtanh.f32 %v3274_v1  ;;  %v3280_v30 = vmul.f32 0.5, %v6956_v13 }
 0x6cd   :  { %v3227_v39 = vpop.f32.mrb[47].mxu1  ;;  %v6957_v28 = vadd.f32 %v6480_v38, %v8437_v53 }
 0x6ce   :  { %v6958_v35 = vadd.f32 %v3227_v39, %v8439_v57 }
 0x6cf   :  { %v7345_v15 = vpop.eup %7344 }
 0x6d0   :  { %v6483_v23 = vpop.f32.mrb[48].mxu1  ;;  %v7347_v24 = vpop.eup %7346  ;;  %v3301_v16 = vmul.f32 0.5, %v7345_v15 }
 0x6d1   :  { %v6959_v27 = vadd.f32 %v6483_v23, %v8409_v47  ;;  %v3237_v11 = vpop.f32.mrb[49].mxu1  ;;  %v7349_v42 = vpop.eup %7348  ;;  %v3300_v31 = vmul.f32 0.5, %v7347_v24 }
 0x6d2   :  { %v6960_v60 = vadd.f32 %v3237_v11, %v8412_v49  ;;  %v7351_v17 = vpop.eup %7350  ;;  %v3297_v33 = vmul.f32 0.5, %v7349_v42  ;;  %v3313_v23 = vadd.f32 0.5, %v3301_v16  ;;  %v3283_v11 = vmul.f32 0.5, %v6957_v28 }
 0x6d3   :  { %7360 = vtanh.f32 %v6959_v27  ;;  %v7353_v19 = vpop.eup %7352  ;;  %v3296_v34 = vmul.f32 0.5, %v7351_v17  ;;  %v3312_v46 = vadd.f32 0.5, %v3300_v31 }
 0x6d4   :  { %7362 = vtanh.f32 %v6960_v60  ;;  %v6486_v25 = vpop.f32.mrb[50].mxu1  ;;  %v7355_v58 = vpop.eup %7354  ;;  %v3303_v27 = vmul.f32 0.5, %v7353_v19  ;;  %v3282_v60 = vmul.f32 0.5, %v6958_v35  ;;  %v3309_v15 = vadd.f32 0.5, %v3297_v33 }
 0x6d5   :  { %v6961_v14 = vadd.f32 %v6486_v25, %v8419_v63  ;;  %v3247_v29 = vpop.f32.mrb[51].mxu1  ;;  %v7357_v36 = vpop.eup %7356  ;;  %v3302_v38 = vmul.f32 0.5, %v7355_v58  ;;  %v3308_v25 = vadd.f32 0.5, %v3296_v34  ;;  %v3325_v42 = vmul.f32 %v3313_v23, %v8777_v37 }
 0x6d6   :  { %v6962_v32 = vadd.f32 %v3247_v29, %v8421_v6  ;;  %v7359_v1 = vpop.eup %7358  ;;  %v3299_v24 = vmul.f32 0.5, %v7357_v36  ;;  %v3315_v29 = vadd.f32 0.5, %v3303_v27  ;;  %v3324_v16 = vmul.f32 %v3312_v46, %v8779_v40 }
 0x6d7   :  { %7364 = vtanh.f32 %v6961_v14  ;;  %v3298_v39 = vmul.f32 0.5, %v7359_v1 }
 0x6d8   :  { %7366 = vtanh.f32 %v6962_v32  ;;  %v3314_v32 = vadd.f32 0.5, %v3302_v38  ;;  %v3311_v28 = vadd.f32 0.5, %v3299_v24  ;;  %v3327_v33 = vmul.f32 %v3315_v29, %v8785_v62 }
 0x6d9   :  { %7368 = vtanh.f32 %v3281_v26 }
 0x6da   :  { %7370 = vtanh.f32 %v3280_v30  ;;  %v3310_v30 = vadd.f32 0.5, %v3298_v39  ;;  %v3326_v36 = vmul.f32 %v3314_v32, %v8787_v41 }
 0x6db   :  { %7372 = vtanh.f32 %v3283_v11 }
 0x6dc   :  { %7374 = vtanh.f32 %v3282_v60 }
 0x6dd   :  { %v7361_v13 = vpop.eup %7360 }
 0x6de   :  { %v7363_v14 = vpop.eup %7362  ;;  %v3329_v17 = vmul.f32 %v7361_v13, %v3309_v15 }
 0x6df   :  { %v3328_v26 = vmul.f32 %v7363_v14, %v3308_v25 }
 0x6e0   :  { %v8841_v19 = vadd.f32 %v3329_v17, %v3325_v42 }
 0x6e1   :  { %v7365_v31 = vpop.eup %7364  ;;  %v8843_v35 = vadd.f32 %v3328_v26, %v3324_v16 }
 0x6e2   :  { %v7367_v58 = vpop.eup %7366  ;;  %7376 = vtanh.f32 %v8841_v19  ;;  %v3331_v37 = vmul.f32 %v7365_v31, %v3311_v28 }
 0x6e3   :  { %7378 = vtanh.f32 %v8843_v35  ;;  %v3330_v40 = vmul.f32 %v7367_v58, %v3310_v30  ;;  %v7369_v34 = vpop.eup %7368 }
 0x6e4   :  { %v8849_v1 = vadd.f32 %v3331_v37, %v3327_v33  ;;  %v7371_v23 = vpop.eup %7370  ;;  %v3305_v11 = vmul.f32 0.5, %v7369_v34 }
 0x6e5   :  { %v8851_v27 = vadd.f32 %v3330_v40, %v3326_v36  ;;  %v7373_v62 = vpop.eup %7372  ;;  %v3304_v46 = vmul.f32 0.5, %v7371_v23 }
 0x6e6   :  { %7380 = vtanh.f32 %v8849_v1  ;;  %v7375_v38 = vpop.eup %7374  ;;  %v3317_v60 = vadd.f32 0.5, %v3305_v11  ;;  %v3307_v15 = vmul.f32 0.5, %v7373_v62 }
 0x6e7   :  { %7382 = vtanh.f32 %v8851_v27  ;;  %v3316_v24 = vadd.f32 0.5, %v3304_v46  ;;  %v3306_v13 = vmul.f32 0.5, %v7375_v38 }
 0x6e8   :  { %v3319_v42 = vadd.f32 0.5, %v3307_v15 }
 0x6e9   :  { %v3318_v17 = vadd.f32 0.5, %v3306_v13 }
 0x6ec   :  { %v7377_v41 = vpop.eup %7376 }
 0x6ed   :  { %v7379_v25 = vpop.eup %7378  ;;  %v3341_v39 = vmul.f32 %v7377_v41, %v3317_v60 }
 0x6ee   :  { %v3340_v14 = vmul.f32 %v7379_v25, %v3316_v24 }
 0x6f0   :  { %v7381_v29 = vpop.eup %7380  ;;  %v6789_v16 = vpack.c.bf16 %v3341_v39, %v3340_v14 }
 0x6f1   :  { %v7383_v32 = vpop.eup %7382  ;;  %v3343_v26 = vmul.f32 %v7381_v29, %v3319_v42 }
 0x6f2   :  { %6790 = vmatprep.subr.bf16.mxu0 %v6789_v16  ;;  %v3342_v28 = vmul.f32 %v7383_v32, %v3318_v17 }
 0x6f3   :  { %6792 = vmatpush3.bf16.msra.mxu0 %v6789_v16 }
 0x6f4   :  { %v6793_v31 = vpack.c.bf16 %v3343_v26, %v3342_v28 }
 0x6f6   :  { %6794 = vmatprep.subr.bf16.mxu0 %v6793_v31 }
 0x6f7   :  { %6796 = vmatpush3.bf16.msra.mxu0 %v6793_v31 }
 0x6fa   :  { %6496 = vmatmul.mubr.msk.f32.vlgmr.msra.gmra.mrb[44].mxu0 %vm1817_vm2, %v8655_v50 }
 0x6fb   :  { %6498 = vmatprep.mubr.msk.f32.mxu0 %vm1817_vm2, %v8662_v55 }
 0x6fe   :  { %6499 = vmatmul.mubr.msk.f32.gmra.mrb[46].mxu0 %vm1817_vm2, %v8669_v48 }
 0x6ff   :  { %6501 = vmatprep.mubr.msk.f32.mxu0 %vm1817_vm2, %v8676_v56 }
 0x702   :  { %6502 = vmatmul.mubr.msk.f32.gmra.mrb[48].mxu0 %vm1817_vm2, %v8683_v59 }
 0x703   :  { %6504 = vmatprep.mubr.msk.f32.mxu0 %vm1817_vm2, %v8690_v44 }
 0x706   :  { %6505 = vmatmul.mubr.msk.f32.gmra.mrb[50].mxu0 %vm1817_vm2, %v8697_v43 }
 0x707   :  { %6507 = vmatprep.mubr.msk.f32.mxu0 %vm1817_vm2, %v8704_v52 }
 0x70a   :  { %6508 = vmatmul.mubr.msk.f32.gmra.mrb[52].mxu0 %vm1817_vm2, %v8711_v61 }
 0x70b   :  { %6510 = vmatprep.mubr.msk.f32.mxu0 %vm1817_vm2, %v8718_v0 }
 0x70e   :  { %6511 = vmatmul.mubr.msk.f32.gmra.mrb[54].mxu0 %vm1817_vm2, %v8725_v9 }
 0x70f   :  { %6513 = vmatprep.mubr.msk.f32.mxu0 %vm1817_vm2, %v8732_v10 }
 0x712   :  { %6514 = vmatmul.mubr.msk.f32.gmra.mrb[56].mxu0 %vm1817_vm2, %v8739_v4 }
 0x713   :  { %6516 = vmatprep.mubr.msk.f32.mxu0 %vm1817_vm2, %v8746_v54 }
 0x716   :  { %6517 = vmatmul.mubr.msk.f32.gmra.mrb[58].mxu0 %vm1817_vm2, %v8753_v22 }
 0x7cd   :  { %v6497_v30 = vpop.f32.mrb[44].mxu0 }
 0x7ce   :  { %v3426_v58 = vpop.f32.mrb[45].mxu0  ;;  %v6963_v11 = vadd.f32 %v6497_v30, %v8397_v7 }
 0x7cf   :  { %v6964_v62 = vadd.f32 %v3426_v58, %v8393_v3 }
 0x7d0   :  { %v3522_v13 = vmul.f32 0.5, %v6963_v11 }
 0x7d1   :  { %v6500_v33 = vpop.f32.mrb[46].mxu0  ;;  %v3521_v39 = vmul.f32 0.5, %v6964_v62 }
 0x7d2   :  { %v3436_v37 = vpop.f32.mrb[47].mxu0  ;;  %v6965_v25 = vadd.f32 %v6500_v33, %v8399_v8 }
 0x7d3   :  { %v6966_v14 = vadd.f32 %v3436_v37, %v8401_v12 }
 0x7d4   :  { %v3524_v32 = vmul.f32 0.5, %v6965_v25 }
 0x7d5   :  { %v6503_v36 = vpop.f32.mrb[48].mxu0  ;;  %v3523_v26 = vmul.f32 0.5, %v6966_v14 }
 0x7d6   :  { %v6967_v40 = vadd.f32 %v6503_v36, %v8395_v5  ;;  %v3446_v34 = vpop.f32.mrb[49].mxu0 }
 0x7d7   :  { %v6968_v23 = vadd.f32 %v3446_v34, %v8391_v2 }
 0x7d8   :  { %v3526_v38 = vmul.f32 0.5, %v6967_v40 }
 0x7d9   :  { %v6506_v46 = vpop.f32.mrb[50].mxu0  ;;  %v3525_v41 = vmul.f32 0.5, %v6968_v23 }
 0x7da   :  { %v6969_v60 = vadd.f32 %v6506_v46, %v8403_v18  ;;  %v3456_v15 = vpop.f32.mrb[51].mxu0  ;;  %7384 = vtanh.f32 %v3526_v38 }
 0x7db   :  { %v6970_v24 = vadd.f32 %v3456_v15, %v8405_v20  ;;  %7386 = vtanh.f32 %v3525_v41 }
 0x7dc   :  { %v3528_v29 = vmul.f32 0.5, %v6969_v60  ;;  %7388 = vtanh.f32 %v3522_v13 }
 0x7dd   :  { %v6509_v42 = vpop.f32.mrb[52].mxu0  ;;  %v3527_v16 = vmul.f32 0.5, %v6970_v24  ;;  %7390 = vtanh.f32 %v3521_v39 }
 0x7de   :  { %v3466_v17 = vpop.f32.mrb[53].mxu0  ;;  %7392 = vtanh.f32 %v3528_v29  ;;  %v6971_v37 = vadd.f32 %v6509_v42, %v8423_v21 }
 0x7df   :  { %7394 = vtanh.f32 %v3527_v16  ;;  %v6972_v34 = vadd.f32 %v3466_v17, %v8427_v45 }
 0x7e0   :  { %7396 = vtanh.f32 %v3524_v32  ;;  %v3530_v41 = vmul.f32 0.5, %v6971_v37 }
 0x7e1   :  { %v6512_v28 = vpop.f32.mrb[54].mxu0  ;;  %7398 = vtanh.f32 %v3523_v26  ;;  %v3529_v14 = vmul.f32 0.5, %v6972_v34 }
 0x7e2   :  { %v3476_v31 = vpop.f32.mrb[55].mxu0  ;;  %v6973_v24 = vadd.f32 %v6512_v28, %v8437_v53 }
 0x7e3   :  { %v6974_v42 = vadd.f32 %v3476_v31, %v8439_v57 }
 0x7e4   :  { %v7385_v40 = vpop.eup %7384 }
 0x7e5   :  { %v6515_v30 = vpop.f32.mrb[56].mxu0  ;;  %v7387_v23 = vpop.eup %7386  ;;  %v3550_v15 = vmul.f32 0.5, %v7385_v40 }
 0x7e6   :  { %v6975_v58 = vadd.f32 %v6515_v30, %v8409_v47  ;;  %v3486_v33 = vpop.f32.mrb[57].mxu0  ;;  %v7389_v62 = vpop.eup %7388  ;;  %v3549_v39 = vmul.f32 0.5, %v7387_v23 }
 0x7e7   :  { %v6976_v36 = vadd.f32 %v3486_v33, %v8412_v49  ;;  %v7391_v60 = vpop.eup %7390  ;;  %v3546_v17 = vmul.f32 0.5, %v7389_v62  ;;  %v3562_v30 = vadd.f32 0.5, %v3550_v15  ;;  %v3532_v33 = vmul.f32 0.5, %v6973_v24 }
 0x7e8   :  { %7400 = vtanh.f32 %v6975_v58  ;;  %v7393_v25 = vpop.eup %7392  ;;  %v3545_v32 = vmul.f32 0.5, %v7391_v60  ;;  %v3561_v37 = vadd.f32 0.5, %v3549_v39 }
 0x7e9   :  { %7402 = vtanh.f32 %v6976_v36  ;;  %v6518_v11 = vpop.f32.mrb[58].mxu0  ;;  %v7395_v29 = vpop.eup %7394  ;;  %v3552_v58 = vmul.f32 0.5, %v7393_v25  ;;  %v3531_v36 = vmul.f32 0.5, %v6974_v42  ;;  %v3558_v40 = vadd.f32 0.5, %v3546_v17 }
 0x7ea   :  { %v6977_v46 = vadd.f32 %v6518_v11, %v8419_v63  ;;  %v3496_v38 = vpop.f32.mrb[59].mxu0  ;;  %v7397_v16 = vpop.eup %7396  ;;  %v3551_v28 = vmul.f32 0.5, %v7395_v29  ;;  %v3557_v11 = vadd.f32 0.5, %v3545_v32  ;;  %v3574_v62 = vmul.f32 %v3562_v30, %v8841_v19 }
 0x7eb   :  { %v6978_v13 = vadd.f32 %v3496_v38, %v8421_v6  ;;  %v7399_v26 = vpop.eup %7398  ;;  %v3548_v23 = vmul.f32 0.5, %v7397_v16  ;;  %v3564_v38 = vadd.f32 0.5, %v3552_v58  ;;  %v3573_v15 = vmul.f32 %v3561_v37, %v8843_v35 }
 0x7ec   :  { %7404 = vtanh.f32 %v6977_v46  ;;  %v3547_v31 = vmul.f32 0.5, %v7399_v26 }
 0x7ed   :  { %7406 = vtanh.f32 %v6978_v13  ;;  %v3563_v13 = vadd.f32 0.5, %v3551_v28  ;;  %v3560_v24 = vadd.f32 0.5, %v3548_v23  ;;  %v3576_v17 = vmul.f32 %v3564_v38, %v8849_v1 }
 0x7ee   :  { %7408 = vtanh.f32 %v3530_v41 }
 0x7ef   :  { %7410 = vtanh.f32 %v3529_v14  ;;  %v3559_v14 = vadd.f32 0.5, %v3547_v31  ;;  %v3575_v16 = vmul.f32 %v3563_v13, %v8851_v27 }
 0x7f0   :  { %7412 = vtanh.f32 %v3532_v33 }
 0x7f1   :  { %7414 = vtanh.f32 %v3531_v36 }
 0x7f2   :  { %v7401_v34 = vpop.eup %7400 }
 0x7f3   :  { %v7403_v46 = vpop.eup %7402  ;;  %v3578_v60 = vmul.f32 %v7401_v34, %v3558_v40 }
 0x7f4   :  { %v3577_v41 = vmul.f32 %v7403_v46, %v3557_v11 }
 0x7f5   :  { %v8903_v25 = vadd.f32 %v3578_v60, %v3574_v62 }
 0x7f6   :  { %v7405_v39 = vpop.eup %7404  ;;  %v8905_v42 = vadd.f32 %v3577_v41, %v3573_v15 }
 0x7f7   :  { %v7407_v29 = vpop.eup %7406  ;;  %7416 = vtanh.f32 %v8903_v25  ;;  %v3580_v19 = vmul.f32 %v7405_v39, %v3560_v24 }
 0x7f8   :  { %7418 = vtanh.f32 %v8905_v42  ;;  %v3579_v35 = vmul.f32 %v7407_v29, %v3559_v14  ;;  %v7409_v32 = vpop.eup %7408 }
 0x7f9   :  { %v8911_v26 = vadd.f32 %v3580_v19, %v3576_v17  ;;  %v7411_v30 = vpop.eup %7410  ;;  %v3554_v33 = vmul.f32 0.5, %v7409_v32 }
 0x7fa   :  { %v8913_v58 = vadd.f32 %v3579_v35, %v3575_v16  ;;  %v7413_v1 = vpop.eup %7412  ;;  %v3553_v37 = vmul.f32 0.5, %v7411_v30 }
 0x7fb   :  { %7420 = vtanh.f32 %v8911_v26  ;;  %v7415_v28 = vpop.eup %7414  ;;  %v3566_v36 = vadd.f32 0.5, %v3554_v33  ;;  %v3556_v40 = vmul.f32 0.5, %v7413_v1 }
 0x7fc   :  { %7422 = vtanh.f32 %v8913_v58  ;;  %v3565_v23 = vadd.f32 0.5, %v3553_v37  ;;  %v3555_v34 = vmul.f32 0.5, %v7415_v28 }
 0x7fd   :  { %v3568_v62 = vadd.f32 0.5, %v3556_v40 }
 0x7fe   :  { %v3567_v60 = vadd.f32 0.5, %v3555_v34 }
 0x801   :  { %v7417_v27 = vpop.eup %7416 }
 0x802   :  { %v7419_v11 = vpop.eup %7418  ;;  %v3590_v31 = vmul.f32 %v7417_v27, %v3566_v36 }
 0x803   :  { %v3589_v46 = vmul.f32 %v7419_v11, %v3565_v23 }
 0x805   :  { %v7421_v38 = vpop.eup %7420  ;;  %v6797_v15 = vpack.c.bf16 %v3590_v31, %v3589_v46 }
 0x806   :  { %v7423_v13 = vpop.eup %7422  ;;  %v3592_v41 = vmul.f32 %v7421_v38, %v3568_v62 }
 0x807   :  { %6798 = vmatprep.subr.bf16.mxu1 %v6797_v15  ;;  %v3591_v24 = vmul.f32 %v7423_v13, %v3567_v60 }
 0x808   :  { %6800 = vmatpush3.bf16.msra.mxu1 %v6797_v15 }
 0x809   :  { %v6801_v39 = vpack.c.bf16 %v3592_v41, %v3591_v24 }
 0x80b   :  { %6802 = vmatprep.subr.bf16.mxu1 %v6801_v39 }
 0x80c   :  { %6804 = vmatpush3.bf16.msra.mxu1 %v6801_v39 }
 0x80f   :  { %6528 = vmatmul.mubr.msk.f32.vlgmr.msra.gmra.mrb[52].mxu1 %vm1817_vm2, %v8655_v50  ;;  %v74_v50 = vld [vmem:[%s9470_s5] sm:$0xff] }
 0x810   :  { %6530 = vmatprep.mubr.msk.f32.mxu1 %vm1817_vm2, %v8662_v55  ;;  %6559 = vmatprep.mubr.msk.f32.mxu0 %vm1817_vm2, %v74_v50 }
 0x813   :  { %6531 = vmatmul.mubr.msk.f32.gmra.mrb[54].mxu1 %vm1817_vm2, %v8669_v48 }
 0x814   :  { %6533 = vmatprep.mubr.msk.f32.mxu1 %vm1817_vm2, %v8676_v56 }
 0x817   :  { %6534 = vmatmul.mubr.msk.f32.gmra.mrb[56].mxu1 %vm1817_vm2, %v8683_v59 }
 0x818   :  { %6536 = vmatprep.mubr.msk.f32.mxu1 %vm1817_vm2, %v8690_v44 }
 0x81b   :  { %6537 = vmatmul.mubr.msk.f32.gmra.mrb[58].mxu1 %vm1817_vm2, %v8697_v43 }
 0x81c   :  { %6539 = vmatprep.mubr.msk.f32.mxu1 %vm1817_vm2, %v8704_v52 }
 0x81f   :  { %6540 = vmatmul.mubr.msk.f32.gmra.mrb[60].mxu1 %vm1817_vm2, %v8711_v61 }
 0x820   :  { %6542 = vmatprep.mubr.msk.f32.mxu1 %vm1817_vm2, %v8718_v0 }
 0x823   :  { %6543 = vmatmul.mubr.msk.f32.gmra.mrb[62].mxu1 %vm1817_vm2, %v8725_v9 }
 0x824   :  { %6545 = vmatprep.mubr.msk.f32.mxu1 %vm1817_vm2, %v8732_v10 }
 0x827   :  { %6546 = vmatmul.mubr.msk.f32.gmra.mrb[64].mxu1 %vm1817_vm2, %v8739_v4 }
 0x828   :  { %6548 = vmatprep.mubr.msk.f32.mxu1 %vm1817_vm2, %v8746_v54 }
 0x82b   :  { %6549 = vmatmul.mubr.msk.f32.gmra.mrb[66].mxu1 %vm1817_vm2, %v8753_v22 }
 0x82c   :  { %6617 = vmatprep.mubr.msk.f32.mxu1 %vm7667_vm5, %v9478_v51 }
 0x8e2   :  { %v6529_v55 = vpop.f32.mrb[52].mxu1 }
 0x8e3   :  { %v3675_v48 = vpop.f32.mrb[53].mxu1  ;;  %v6979_v0 = vadd.f32 %v6529_v55, %v8397_v7 }
 0x8e4   :  { %v6980_v9 = vadd.f32 %v3675_v48, %v8393_v3 }
 0x8e5   :  { %v3771_v17 = vmul.f32 0.5, %v6979_v0 }
 0x8e6   :  { %v6532_v56 = vpop.f32.mrb[54].mxu1  ;;  %v3770_v16 = vmul.f32 0.5, %v6980_v9 }
 0x8e7   :  { %v3685_v59 = vpop.f32.mrb[55].mxu1  ;;  %v6981_v19 = vadd.f32 %v6532_v56, %v8399_v8 }
 0x8e9   :  { %v3773_v32 = vmul.f32 0.5, %v6981_v19 }
 0x8ea   :  { %v6535_v44 = vpop.f32.mrb[56].mxu1 }
 0x8eb   :  { %v6983_v43 = vadd.f32 %v6535_v44, %v8395_v5  ;;  %v3695_v52 = vpop.f32.mrb[57].mxu1  ;;  %v6982_v5 = vadd.f32 %v3685_v59, %v8401_v12 }
 0x8ec   :  { %v6984_v61 = vadd.f32 %v3695_v52, %v8391_v2 }
 0x8ed   :  { %v3775_v4 = vmul.f32 0.5, %v6983_v43 }
 0x8ee   :  { %v6538_v10 = vpop.f32.mrb[58].mxu1  ;;  %v3774_v14 = vmul.f32 0.5, %v6984_v61 }
 0x8ef   :  { %v6985_v54 = vadd.f32 %v6538_v10, %v8403_v18  ;;  %v3705_v22 = vpop.f32.mrb[59].mxu1  ;;  %7424 = vtanh.f32 %v3775_v4  ;;  %v3772_v18 = vmul.f32 0.5, %v6982_v5 }
 0x8f0   :  { %v6986_v29 = vadd.f32 %v3705_v22, %v8405_v20  ;;  %7426 = vtanh.f32 %v3774_v14 }
 0x8f1   :  { %v3777_v2 = vmul.f32 0.5, %v6985_v54  ;;  %7428 = vtanh.f32 %v3771_v17 }
 0x8f2   :  { %v6541_v35 = vpop.f32.mrb[60].mxu1  ;;  %v3776_v3 = vmul.f32 0.5, %v6986_v29  ;;  %7430 = vtanh.f32 %v3770_v16 }
 0x8f3   :  { %v3715_v7 = vpop.f32.mrb[61].mxu1  ;;  %7432 = vtanh.f32 %v3777_v2  ;;  %v6987_v1 = vadd.f32 %v6541_v35, %v8423_v21 }
 0x8f4   :  { %7434 = vtanh.f32 %v3776_v3  ;;  %v6988_v36 = vadd.f32 %v3715_v7, %v8427_v45 }
 0x8f5   :  { %7436 = vtanh.f32 %v3773_v32  ;;  %v3779_v62 = vmul.f32 0.5, %v6987_v1 }
 0x8f6   :  { %v6544_v30 = vpop.f32.mrb[62].mxu1  ;;  %7438 = vtanh.f32 %v3772_v18  ;;  %v3778_v60 = vmul.f32 0.5, %v6988_v36 }
 0x8f7   :  { %v3725_v33 = vpop.f32.mrb[63].mxu1 }
 0x8f8   :  { %v6990_v45 = vadd.f32 %v3725_v33, %v8439_v57 }
 0x8f9   :  { %v7425_v28 = vpop.eup %7424 }
 0x8fa   :  { %v6547_v8 = vpop.f32.mrb[64].mxu1  ;;  %v7427_v40 = vpop.eup %7426  ;;  %v3799_v46 = vmul.f32 0.5, %v7425_v28 }
 0x8fb   :  { %v6991_v20 = vadd.f32 %v6547_v8, %v8409_v47  ;;  %v3735_v12 = vpop.f32.mrb[65].mxu1  ;;  %v7429_v23 = vpop.eup %7428  ;;  %v6989_v47 = vadd.f32 %v6544_v30, %v8437_v53 }
 0x8fc   :  { %v6992_v37 = vadd.f32 %v3735_v12, %v8412_v49  ;;  %v7431_v31 = vpop.eup %7430  ;;  %v3798_v49 = vmul.f32 0.5, %v7427_v40  ;;  %v3795_v13 = vmul.f32 0.5, %v7429_v23  ;;  %v3811_v39 = vadd.f32 0.5, %v3799_v46 }
 0x8fd   :  { %7440 = vtanh.f32 %v6991_v20  ;;  %v7433_v38 = vpop.eup %7432  ;;  %v3794_v24 = vmul.f32 0.5, %v7431_v31  ;;  %v3781_v55 = vmul.f32 0.5, %v6989_v47  ;;  %v3842_v47 = vld [vmem:[%s9466_s1] sm:$0x3] }
 0x8fe   :  { %7442 = vtanh.f32 %v6992_v37  ;;  %v6550_v27 = vpop.f32.mrb[66].mxu1  ;;  %v7435_v15 = vpop.eup %7434  ;;  %v3801_v50 = vmul.f32 0.5, %v7433_v38  ;;  %v3810_v48 = vadd.f32 0.5, %v3798_v49  ;;  %v3807_v56 = vadd.f32 0.5, %v3795_v13  ;;  %v76_v38 = vld [vmem:[%s9470_s5 + $0x10] sm:$0xff]  ;;  %v77_v49 = vld [vmem:[%s9470_s5 + $0x18] sm:$0xff] }
 0x8ff   :  { %v6993_v34 = vadd.f32 %v6550_v27, %v8419_v63  ;;  %v3745_v11 = vpop.f32.mrb[67].mxu1  ;;  %v7437_v41 = vpop.eup %7436  ;;  %v3800_v53 = vmul.f32 0.5, %v7435_v15  ;;  %v3806_v43 = vadd.f32 0.5, %v3794_v24  ;;  %v3823_v61 = vmul.f32 %v3811_v39, %v8903_v25  ;;  %v80_v15 = vld [vmem:[%s9470_s5 + $0x30] sm:$0xff]  ;;  %v81_v13 = vld [vmem:[%s9470_s5 + $0x38] sm:$0xff]  ;;  %v83_v24 = vld [vmem:[%s9470_s5 + $0x48] sm:$0xff] }
 0x900   :  { %v6994_v21 = vadd.f32 %v3745_v11, %v8421_v6  ;;  %v7439_v63 = vpop.eup %7438  ;;  %v3780_v6 = vmul.f32 0.5, %v6990_v45  ;;  %v3797_v59 = vmul.f32 0.5, %v7437_v41  ;;  %v3813_v0 = vadd.f32 0.5, %v3801_v50  ;;  %v79_v45 = vld [vmem:[%s9470_s5 + $0x28] sm:$0xff]  ;;  %v82_v41 = vld [vmem:[%s9470_s5 + $0x40] sm:$0xff]  ;;  %v85_v39 = vld [vmem:[%s9470_s5 + $0x58] sm:$0xff] }
 0x901   :  { %7444 = vtanh.f32 %v6993_v34  ;;  %v3796_v57 = vmul.f32 0.5, %v7439_v63  ;;  %v3822_v10 = vmul.f32 %v3810_v48, %v8905_v42  ;;  %v3812_v4 = vadd.f32 0.5, %v3800_v53  ;;  %v84_v63 = vld [vmem:[%s9470_s5 + $0x50] sm:$0xff]  ;;  %v86_v50 = vld [vmem:[%s9470_s5 + $0x60] sm:$0xff]  ;;  %v89_v53 = vld [vmem:[%s9470_s5 + $0x78] sm:$0xff] }
 0x902   :  { %7446 = vtanh.f32 %v6994_v21  ;;  %v3809_v22 = vadd.f32 0.5, %v3797_v59  ;;  %v3825_v5 = vmul.f32 %v3813_v0, %v8911_v26  ;;  %v75_v21 = vld [vmem:[%s9470_s5 + $0x8] sm:$0xff]  ;;  %v88_v48 = vld [vmem:[%s9470_s5 + $0x70] sm:$0xff]  ;;  %v98_v0 = vld [vmem:[%s9471_s6 + $0x40] sm:$0xff] }
 0x903   :  { %7448 = vtanh.f32 %v3779_v62  ;;  %v3808_v17 = vadd.f32 0.5, %v3796_v57  ;;  %v3824_v35 = vmul.f32 %v3812_v4, %v8913_v58  ;;  %v92_v59 = vld [vmem:[%s9471_s6 + $0x10] sm:$0xff]  ;;  %v95_v57 = vld [vmem:[%s9471_s6 + $0x28] sm:$0xff]  ;;  %v101_v4 = vld [vmem:[%s9471_s6 + $0x58] sm:$0xff] }
 0x904   :  { %7450 = vtanh.f32 %v3778_v60  ;;  %v78_v60 = vld [vmem:[%s9470_s5 + $0x20] sm:$0xff] }
 0x905   :  { %7452 = vtanh.f32 %v3781_v55  ;;  %v87_v55 = vld [vmem:[%s9470_s5 + $0x68] sm:$0xff] }
 0x906   :  { %7454 = vtanh.f32 %v3780_v6  ;;  %v90_v6 = vld [vmem:[%s9471_s6] sm:$0xff] }
 0x907   :  { %v7441_v44 = vpop.eup %7440 }
 0x908   :  { %v7443_v52 = vpop.eup %7442  ;;  %v3827_v9 = vmul.f32 %v7441_v44, %v3807_v56  ;;  %v91_v56 = vld [vmem:[%s9471_s6 + $0x8] sm:$0xff]  ;;  %v93_v44 = vld [vmem:[%s9471_s6 + $0x18] sm:$0xff] }
 0x909   :  { %v3826_v54 = vmul.f32 %v7443_v52, %v3806_v43  ;;  %v94_v43 = vld [vmem:[%s9471_s6 + $0x20] sm:$0xff]  ;;  %v96_v52 = vld [vmem:[%s9471_s6 + $0x30] sm:$0xff] }
 0x90a   :  { %v8969_v14 = vadd.f32 %v3827_v9, %v3823_v61  ;;  %v97_v61 = vld [vmem:[%s9471_s6 + $0x38] sm:$0xff]  ;;  %v99_v9 = vld [vmem:[%s9471_s6 + $0x48] sm:$0xff] }
 0x90b   :  { %v7445_v29 = vpop.eup %7444  ;;  %v8971_v19 = vadd.f32 %v3826_v54, %v3822_v10  ;;  %v100_v10 = vld [vmem:[%s9471_s6 + $0x50] sm:$0xff]  ;;  %v102_v54 = vld [vmem:[%s9471_s6 + $0x60] sm:$0xff] }
 0x90c   :  { %v7447_v16 = vpop.eup %7446  ;;  %7456 = vtanh.f32 %v8969_v14  ;;  %v3829_v25 = vmul.f32 %v7445_v29, %v3809_v22  ;;  %v103_v22 = vld [vmem:[%s9471_s6 + $0x68] sm:$0xff]  ;;  %v104_v29 = vld [vmem:[%s9471_s6 + $0x70] sm:$0xff] }
 0x90d   :  { %7458 = vtanh.f32 %v8971_v19  ;;  %v3828_v42 = vmul.f32 %v7447_v16, %v3808_v17  ;;  %v7449_v2 = vpop.eup %7448  ;;  %v105_v17 = vld [vmem:[%s9471_s6 + $0x78] sm:$0xff]  ;;  %v9479_v16 = vmov 0.0|0.0  }
 0x90e   :  { %v8977_v7 = vadd.f32 %v3829_v25, %v3825_v5  ;;  %v7451_v3 = vpop.eup %7450  ;;  %v3803_v18 = vmul.f32 0.5, %v7449_v2  ;;  %6813 = vmatprep.subr.bf16.mxu1 %v9479_v16  ;;  %v243_v5 = vpop.permute.xlu1 %242 }
 0x90f   :  { %v8979_v32 = vadd.f32 %v3828_v42, %v3824_v35  ;;  %v7453_v26 = vpop.eup %7452  ;;  %v3802_v30 = vmul.f32 0.5, %v7451_v3  ;;  %v238_v25 = vpop.permute.xlu0 %237 }
 0x910   :  { %7460 = vtanh.f32 %v8977_v7  ;;  %v7455_v33 = vpop.eup %7454  ;;  %v3815_v8 = vadd.f32 0.5, %v3803_v18  ;;  %v3805_v20 = vmul.f32 0.5, %v7453_v26 }
 0x911   :  { %7462 = vtanh.f32 %v8979_v32  ;;  %v3814_v12 = vadd.f32 0.5, %v3802_v30  ;;  %v3804_v1 = vmul.f32 0.5, %v7455_v33 }
 0x912   :  { %v3817_v40 = vadd.f32 0.5, %v3805_v20  ;;  %v263_v35 = vpop.permute.xlu1 %262 }
 0x913   :  { %v3816_v23 = vadd.f32 0.5, %v3804_v1  ;;  %v258_v42 = vpop.permute.xlu0 %257 }
 0x916   :  { %v7457_v58 = vpop.eup %7456  ;;  %v253_v2 = vpop.permute.xlu1 %252 }
 0x917   :  { %v7459_v37 = vpop.eup %7458  ;;  %v3839_v28 = vmul.f32 %v7457_v58, %v3815_v8  ;;  %v248_v3 = vpop.permute.xlu0 %247 }
 0x918   :  { %v3838_v36 = vmul.f32 %v7459_v37, %v3814_v12 }
 0x91a   :  { %v7461_v27 = vpop.eup %7460  ;;  %v6805_v34 = vpack.c.bf16 %v3839_v28, %v3838_v36  ;;  %v273_v33 = vpop.permute.xlu1 %272 }
 0x91b   :  { %v7463_v11 = vpop.eup %7462  ;;  %v3841_v31 = vmul.f32 %v7461_v27, %v3817_v40  ;;  %v268_v20 = vpop.permute.xlu0 %267 }
 0x91c   :  { %6806 = vmatprep.subr.bf16.mxu0 %v6805_v34  ;;  %v3840_v46 = vmul.f32 %v7463_v11, %v3816_v23 }
 0x91d   :  { %6808 = vmatpush3.bf16.msra.mxu0 %v6805_v34 }
 0x91e   :  { %v6809_v62 = vpack.c.bf16 %v3841_v31, %v3840_v46  ;;  %v303_v28 = vpop.permute.xlu1 %302 }
 0x91f   :  { %v298_v40 = vpop.permute.xlu0 %297 }
 0x920   :  { %6810 = vmatprep.subr.bf16.mxu0 %v6809_v62 }
 0x921   :  { %6812 = vmatpush3.bf16.msra.mxu0 %v6809_v62 }
 0x922   :  { %6583 = vmatprep.subr.msk.mxu0 %vm4085_vm3, %v3842_v47 }
 0x924   :  { %6560 = vmatmul.mubr.msk.f32.vlgmr.msra.gmra.mrb[64].mxu0 %vm1817_vm2, %v75_v21 }
 0x925   :  { %6562 = vmatprep.mubr.msk.f32.mxu0 %vm1817_vm2, %v76_v38  ;;  %6584 = vmatpush3.msk.msra.mxu0 %vm4085_vm3, %v3842_v47 }
 0x926   :  { %6841 = vmatprep.subr.bf16.mxu0 %v9479_v16 }
 0x928   :  { %6563 = vmatmul.mubr.msk.f32.gmra.mrb[66].mxu0 %vm1817_vm2, %v77_v49 }
 0x929   :  { %6565 = vmatprep.mubr.msk.f32.mxu0 %vm1817_vm2, %v78_v60 }
 0x92c   :  { %6566 = vmatmul.mubr.msk.f32.gmra.mrb[68].mxu0 %vm1817_vm2, %v79_v45  ;;  %v313_v45 = vpop.permute.xlu1 %312 }
 0x92d   :  { %6568 = vmatprep.mubr.msk.f32.mxu0 %vm1817_vm2, %v80_v15 }
 0x930   :  { %6569 = vmatmul.mubr.msk.f32.gmra.mrb[70].mxu0 %vm1817_vm2, %v81_v13 }
 0x931   :  { %6571 = vmatprep.mubr.msk.f32.mxu0 %vm1817_vm2, %v82_v41  ;;  %v308_v41 = vpop.permute.xlu0 %307 }
 0x934   :  { %6572 = vmatmul.mubr.msk.f32.gmra.mrb[72].mxu0 %vm1817_vm2, %v83_v24 }
 0x935   :  { %6574 = vmatprep.mubr.msk.f32.mxu0 %vm1817_vm2, %v84_v63 }
 0x938   :  { %6575 = vmatmul.mubr.msk.f32.gmra.mrb[74].mxu0 %vm1817_vm2, %v85_v39 }
 0x939   :  { %6577 = vmatprep.mubr.msk.f32.mxu0 %vm1817_vm2, %v86_v50 }
 0x93c   :  { %6578 = vmatmul.mubr.msk.f32.gmra.mrb[76].mxu0 %vm1817_vm2, %v87_v55 }
 0x93d   :  { %6580 = vmatprep.mubr.msk.f32.mxu0 %vm1817_vm2, %v88_v48  ;;  %v283_v48 = vpop.permute.xlu1 %282 }
 0x940   :  { %6581 = vmatmul.mubr.msk.f32.gmra.mrb[78].mxu0 %vm1817_vm2, %v89_v53  ;;  %v278_v53 = vpop.permute.xlu0 %277 }
 0x941   :  { %6585 = vmatprep.mubr.msk.f32.mxu0 %vm4036_vm4, %v90_v6 }
 0x944   :  { %6586 = vmatmul.mubr.msk.f32.vlgmr.msra.gmra.mrb[64].mxu0 %vm4036_vm4, %v91_v56 }
 0x945   :  { %6588 = vmatprep.mubr.msk.f32.mxu0 %vm4036_vm4, %v92_v59 }
 0x948   :  { %6589 = vmatmul.mubr.msk.f32.gmra.mrb[66].mxu0 %vm4036_vm4, %v93_v44 }
 0x949   :  { %6591 = vmatprep.mubr.msk.f32.mxu0 %vm4036_vm4, %v94_v43 }
 0x94c   :  { %6592 = vmatmul.mubr.msk.f32.gmra.mrb[68].mxu0 %vm4036_vm4, %v95_v57 }
 0x94d   :  { %6594 = vmatprep.mubr.msk.f32.mxu0 %vm4036_vm4, %v96_v52 }
 0x950   :  { %6595 = vmatmul.mubr.msk.f32.gmra.mrb[70].mxu0 %vm4036_vm4, %v97_v61 }
 0x951   :  { %6597 = vmatprep.mubr.msk.f32.mxu0 %vm4036_vm4, %v98_v0 }
 0x954   :  { %6598 = vmatmul.mubr.msk.f32.gmra.mrb[72].mxu0 %vm4036_vm4, %v99_v9 }
 0x955   :  { %6600 = vmatprep.mubr.msk.f32.mxu0 %vm4036_vm4, %v100_v10  ;;  %v293_v10 = vpop.permute.xlu1 %292 }
 0x958   :  { %6601 = vmatmul.mubr.msk.f32.gmra.mrb[74].mxu0 %vm4036_vm4, %v101_v4 }
 0x959   :  { %6603 = vmatprep.mubr.msk.f32.mxu0 %vm4036_vm4, %v102_v54 }
 0x95c   :  { %6604 = vmatmul.mubr.msk.f32.gmra.mrb[76].mxu0 %vm4036_vm4, %v103_v22 }
 0x95d   :  { %6606 = vmatprep.mubr.msk.f32.mxu0 %vm4036_vm4, %v104_v29  ;;  %v288_v29 = vpop.permute.xlu0 %287 }
 0x960   :  { %6607 = vmatmul.mubr.msk.f32.gmra.mrb[78].mxu0 %vm4036_vm4, %v105_v17 }
 0x961   :  { %6703 = vmatprep.mubr.msk.f32.mxu0 %vm7667_vm5, %v9478_v51 }
 0xa17   :  { %v6587_v18 = vpop.f32.mrb[64].mxu0 }
 0xa18   :  { %v4155_v26 = vpop.f32.mrb[65].mxu0  ;;  %v4235_v36 = vadd.f32 %v6587_v18, %v243_v5 }
 0xa19   :  { %v4234_v27 = vadd.f32 %v4155_v26, %v238_v25 }
 0xa1a   :  { %v4251_v47 = vmul.f32 0.5, %v4235_v36 }
 0xa1b   :  { %v6590_v30 = vpop.f32.mrb[66].mxu0  ;;  %v4250_v38 = vmul.f32 0.5, %v4234_v27 }
 0xa1c   :  { %v4165_v8 = vpop.f32.mrb[67].mxu0  ;;  %v4237_v21 = vadd.f32 %v6590_v30, %v253_v2 }
 0xa1d   :  { %v4236_v49 = vadd.f32 %v4165_v8, %v248_v3 }
 0xa1e   :  { %v4253_v63 = vmul.f32 0.5, %v4237_v21 }
 0xa1f   :  { %v6593_v58 = vpop.f32.mrb[68].mxu0  ;;  %v4252_v39 = vmul.f32 0.5, %v4236_v49 }
 0xa20   :  { %v4239_v12 = vadd.f32 %v6593_v58, %v263_v35  ;;  %v4175_v1 = vpop.f32.mrb[69].mxu0 }
 0xa21   :  { %v4238_v37 = vadd.f32 %v4175_v1, %v258_v42 }
 0xa22   :  { %v4255_v34 = vmul.f32 0.5, %v4239_v12 }
 0xa23   :  { %v6596_v23 = vpop.f32.mrb[70].mxu0  ;;  %v4254_v46 = vmul.f32 0.5, %v4238_v37 }
 0xa24   :  { %v4241_v11 = vadd.f32 %v6596_v23, %v273_v33  ;;  %v4185_v31 = vpop.f32.mrb[71].mxu0  ;;  %7464 = vtanh.f32 %v4255_v34 }
 0xa25   :  { %v4240_v62 = vadd.f32 %v4185_v31, %v268_v20  ;;  %7466 = vtanh.f32 %v4254_v46 }
 0xa26   :  { %v4257_v15 = vmul.f32 0.5, %v4241_v11  ;;  %7468 = vtanh.f32 %v4251_v47 }
 0xa27   :  { %v6599_v60 = vpop.f32.mrb[72].mxu0  ;;  %v4256_v24 = vmul.f32 0.5, %v4240_v62  ;;  %7470 = vtanh.f32 %v4250_v38 }
 0xa28   :  { %v4195_v13 = vpop.f32.mrb[73].mxu0  ;;  %7472 = vtanh.f32 %v4257_v15  ;;  %v4243_v44 = vadd.f32 %v6599_v60, %v283_v48 }
 0xa29   :  { %7474 = vtanh.f32 %v4256_v24  ;;  %v4242_v52 = vadd.f32 %v4195_v13, %v278_v53 }
 0xa2a   :  { %7476 = vtanh.f32 %v4253_v63  ;;  %v4259_v5 = vmul.f32 0.5, %v4243_v44 }
 0xa2b   :  { %v6602_v50 = vpop.f32.mrb[74].mxu0  ;;  %7478 = vtanh.f32 %v4252_v39  ;;  %v4258_v3 = vmul.f32 0.5, %v4242_v52 }
 0xa2c   :  { %v4205_v55 = vpop.f32.mrb[75].mxu0  ;;  %v4245_v25 = vadd.f32 %v6602_v50, %v293_v10 }
 0xa2d   :  { %v4244_v18 = vadd.f32 %v4205_v55, %v288_v29 }
 0xa2e   :  { %v7465_v57 = vpop.eup %7464  ;;  %v4261_v1 = vmul.f32 0.5, %v4245_v25 }
 0xa2f   :  { %v6605_v6 = vpop.f32.mrb[76].mxu0  ;;  %v7467_v61 = vpop.eup %7466  ;;  %v4279_v17 = vmul.f32 0.5, %v7465_v57  ;;  %v4260_v36 = vmul.f32 0.5, %v4244_v18  ;;  %v9165_v18 = vld [vmem:[%s9473_s8 + $0x18] sm:$0xff] }
 0xa30   :  { %v4247_v56 = vadd.f32 %v6605_v6, %v303_v28  ;;  %v4215_v59 = vpop.f32.mrb[77].mxu0  ;;  %v7469_v9 = vpop.eup %7468  ;;  %v4278_v2 = vmul.f32 0.5, %v7467_v61 }
 0xa31   :  { %v4246_v43 = vadd.f32 %v4215_v59, %v298_v40  ;;  %v7471_v22 = vpop.eup %7470  ;;  %v4275_v30 = vmul.f32 0.5, %v7469_v9  ;;  %v4291_v58 = vadd.f32 0.5, %v4279_v17 }
 0xa32   :  { %7480 = vtanh.f32 %v4247_v56  ;;  %v7473_v42 = vpop.eup %7472  ;;  %v4274_v8 = vmul.f32 0.5, %v7471_v22  ;;  %v4290_v37 = vadd.f32 0.5, %v4278_v2  ;;  %v9150_v2 = vld [vmem:[%s9473_s8 + $0x8] sm:$0xff] }
 0xa33   :  { %7482 = vtanh.f32 %v4246_v43  ;;  %v6608_v0 = vpop.f32.mrb[78].mxu0  ;;  %v7475_v26 = vpop.eup %7474  ;;  %v4281_v12 = vmul.f32 0.5, %v7473_v42  ;;  %v4287_v40 = vadd.f32 0.5, %v4275_v30  ;;  %v4303_v46 = vmul.f32 %v4291_v58, %v8969_v14  ;;  %v9141_v42 = vld [vmem:[%s9473_s8] sm:$0xff]  ;;  %v9179_v30 = vld [vmem:[%s9473_s8 + $0x28] sm:$0xff] }
 0xa34   :  { %v4249_v4 = vadd.f32 %v6608_v0, %v313_v45  ;;  %v4225_v54 = vpop.f32.mrb[79].mxu0  ;;  %v7477_v33 = vpop.eup %7476  ;;  %v4280_v28 = vmul.f32 0.5, %v7475_v26  ;;  %v4286_v34 = vadd.f32 0.5, %v4274_v8  ;;  %v4302_v21 = vmul.f32 %v4290_v37, %v8971_v19  ;;  %v9170_v26 = vld [vmem:[%s9473_s8 + $0x20] sm:$0xff]  ;;  %v9193_v8 = vld [vmem:[%s9473_s8 + $0x38] sm:$0xff]  ;;  %v9207_v58 = vld [vmem:[%s9473_s8 + $0x48] sm:$0xff] }
 0xa35   :  { %v4248_v35 = vadd.f32 %v4225_v54, %v308_v41  ;;  %v7479_v20 = vpop.eup %7478  ;;  %v4277_v27 = vmul.f32 0.5, %v7477_v33  ;;  %v4293_v62 = vadd.f32 0.5, %v4281_v12  ;;  %v9184_v33 = vld [vmem:[%s9473_s8 + $0x30] sm:$0xff]  ;;  %v9226_v37 = vld [vmem:[%s9473_s8 + $0x60] sm:$0xff] }
 0xa36   :  { %7484 = vtanh.f32 %v4249_v4  ;;  %v4276_v11 = vmul.f32 0.5, %v7479_v20  ;;  %v4292_v38 = vadd.f32 0.5, %v4280_v28  ;;  %v9198_v20 = vld [vmem:[%s9473_s8 + $0x40] sm:$0xff]  ;;  %v9212_v12 = vld [vmem:[%s9473_s8 + $0x50] sm:$0xff]  ;;  %v9235_v28 = vld [vmem:[%s9473_s8 + $0x68] sm:$0xff] }
 0xa37   :  { %7486 = vtanh.f32 %v4248_v35  ;;  %v4289_v60 = vadd.f32 0.5, %v4277_v27  ;;  %v4305_v63 = vmul.f32 %v4293_v62, %v8977_v7  ;;  %v9136_v35 = vld [vmem:[%s9475_s10] sm:$0x3]  ;;  %v9255_v27 = vpop.permute.xlu0 %333 }
 0xa38   :  { %7488 = vtanh.f32 %v4259_v5  ;;  %v4288_v13 = vadd.f32 0.5, %v4276_v11  ;;  %v4304_v39 = vmul.f32 %v4292_v38, %v8979_v32 }
 0xa39   :  { %7490 = vtanh.f32 %v4258_v3  ;;  %v9155_v3 = vld [vmem:[%s9473_s8 + $0x10] sm:$0xff] }
 0xa3a   :  { %7492 = vtanh.f32 %v4261_v1  ;;  %v9221_v1 = vld [vmem:[%s9473_s8 + $0x58] sm:$0xff] }
 0xa3b   :  { %7494 = vtanh.f32 %v4260_v36  ;;  %v9240_v36 = vld [vmem:[%s9473_s8 + $0x70] sm:$0xff] }
 0xa3c   :  { %v7481_v23 = vpop.eup %7480 }
 0xa3d   :  { %v7483_v31 = vpop.eup %7482  ;;  %v4307_v47 = vmul.f32 %v7481_v23, %v4287_v40  ;;  %v9249_v40 = vld [vmem:[%s9473_s8 + $0x78] sm:$0xff]  ;;  %v9257_v23 = vpop.permute.xlu0 %353  ;;  %s7668_s8 = smov [#allocation3]  }
 0xa3e   :  { %v4306_v49 = vmul.f32 %v7483_v31, %v4286_v34  ;;  %s5316_s17 = sshll.u32 %s7668_s8, 4  ;;  %s5317_s17 = int_to_ptr.vmem [resolvable:$true] %s5316_s17 }
 0xa3f   :  { %v9118_v45 = vadd.f32 %v4307_v47, %v4303_v46  ;;  %s7640_s10 = scalar_lea.vmem %s5317_s17, 128  ;;  %p7645_p1 = scmp.lt.s32.totalorder %s5317_s17, %s5317_s17 }
 0xa40   :  { %v7485_v15 = vpop.eup %7484  ;;  %v9120_v41 = vadd.f32 %v4306_v49, %v4302_v21  ;;  %v9271_v21 = vpop.permute.xlu1 %338  ;;  %p7641_p0 = scmp.ne.s32.totalorder %s5317_s17, %s7640_s10  ;;  %p7646_p2 = scmp.lt.s32.totalorder %s7640_s10, %s7640_s10 }
 0xa41   :  { %v7487_v24 = vpop.eup %7486  ;;  %7496 = vtanh.f32 %v9118_v45  ;;  %v4309_v14 = vmul.f32 %v7485_v15, %v4289_v60  ;;  %v9259_v34 = vpop.permute.xlu0 %343 }
 0xa42   :  { %7498 = vtanh.f32 %v9120_v41  ;;  %v4308_v19 = vmul.f32 %v7487_v24, %v4288_v13  ;;  %v7489_v50 = vpop.eup %7488  ;;  %p7647_p3 = por %p7646_p2, %p7645_p1 }
 0xa43   :  { %v9126_v55 = vadd.f32 %v4309_v14, %v4305_v63  ;;  %v7491_v48 = vpop.eup %7490  ;;  %v4283_v6 = vmul.f32 0.5, %v7489_v50 }
 0xa44   :  { %v9128_v53 = vadd.f32 %v4308_v19, %v4304_v39  ;;  %v7493_v7 = vpop.eup %7492  ;;  %v4282_v56 = vmul.f32 0.5, %v7491_v48  ;;  %v9275_v60 = vpop.permute.xlu1 %358  ;;  %p7648_p4 = pnand %p7647_p3, %p7641_p0 }
 0xa45   :  { %7500 = vtanh.f32 %v9126_v55  ;;  %v7495_v59 = vpop.eup %7494  ;;  %v4295_v44 = vadd.f32 0.5, %v4283_v6  ;;  %v4285_v43 = vmul.f32 0.5, %v7493_v7  ;;  %v9261_v11 = vpop.permute.xlu0 %363 }
 0xa46   :  { %7502 = vtanh.f32 %v9128_v53  ;;  %v4294_v57 = vadd.f32 0.5, %v4282_v56  ;;  %v4284_v52 = vmul.f32 0.5, %v7495_v59 }
 0xa47   :  { %v4297_v10 = vadd.f32 0.5, %v4285_v43 }
 0xa48   :  { %v4296_v54 = vadd.f32 0.5, %v4284_v52  ;;  %v9278_v24 = vpop.permute.xlu1 %348 }
 0xa49   :  { %v9263_v31 = vpop.permute.xlu0 %393 }
 0xa4b   :  { %v7497_v32 = vpop.eup %7496 }
 0xa4c   :  { %v7499_v61 = vpop.eup %7498  ;;  %v4319_v0 = vmul.f32 %v7497_v32, %v4295_v44  ;;  %v9280_v19 = vpop.permute.xlu1 %368 }
 0xa4d   :  { %v4318_v9 = vmul.f32 %v7499_v61, %v4294_v57  ;;  %v9265_v46 = vpop.permute.xlu0 %403 }
 0xa4e   :  { %9484 = vst [vmem:[#allocation6_spill] sm:$0xff] %v9265_v46 }
 0xa4f   :  { %v7501_v4 = vpop.eup %7500  ;;  %v6814_v22 = vpack.c.bf16 %v4319_v0, %v4318_v9 }
 0xa50   :  { %v7503_v29 = vpop.eup %7502  ;;  %v4321_v17 = vmul.f32 %v7501_v4, %v4297_v10  ;;  %v9284_v59 = vpop.permute.xlu1 %398 }
 0xa51   :  { %6815 = vmatpush3.bf16.msra.mxu1 %v6814_v22  ;;  %v4320_v5 = vmul.f32 %v7503_v29, %v4296_v54  ;;  %v9267_v62 = vpop.permute.xlu0 %373 }
 0xa52   :  { %6816 = vmatprep.subr.bf16.mxu1 %v9479_v16 }
 0xa53   :  { %v6817_v25 = vpack.c.bf16 %v4321_v17, %v4320_v5 }
 0xa54   :  { %v9292_v17 = vpop.permute.xlu1 %408 }
 0xa55   :  { %6818 = vmatpush3.bf16.msra.mxu1 %v6817_v25  ;;  %v9269_v47 = vpop.permute.xlu0 %383 }
 0xa56   :  { %6820 = vmatprep.subr.bf16.mxu1 %v6814_v22 }
 0xa58   :  { %6618 = vmatmul.mubr.msk.f32.vlgmr.msra.gmra.mrb[68].mxu1 %vm1817_vm2, %v9136_v35 }
 0xa59   :  { %6822 = vmatpush3.bf16.msra.mxu1 %v6814_v22  ;;  %6628 = vmatprep.mubr.msk.f32.mxu1 %vm1817_vm2, %v9141_v42  ;;  %v9273_v38 = vpop.permute.xlu0 %414 }
 0xa5a   :  { %6824 = vmatprep.subr.bf16.mxu1 %v6817_v25 }
 0xa5d   :  { %6826 = vmatpush3.bf16.msra.mxu1 %v6817_v25 }
 0xa5e   :  { %6827 = vmatprep.subr.bf16.mxu1 %v9479_v16 }
 0xa60   :  { %6629 = vmatmul.mubr.msk.f32.vlgmr.msra.gmra.mrb[70].mxu1 %vm1817_vm2, %v9150_v2 }
 0xa61   :  { %6631 = vmatprep.mubr.msk.f32.mxu1 %vm1817_vm2, %v9155_v3 }
 0xa64   :  { %6632 = vmatmul.mubr.msk.f32.gmra.mrb[72].mxu1 %vm1817_vm2, %v9165_v18 }
 0xa65   :  { %6634 = vmatprep.mubr.msk.f32.mxu1 %vm1817_vm2, %v9170_v26 }
 0xa68   :  { %6635 = vmatmul.mubr.msk.f32.gmra.mrb[74].mxu1 %vm1817_vm2, %v9179_v30 }
 0xa69   :  { %6637 = vmatprep.mubr.msk.f32.mxu1 %vm1817_vm2, %v9184_v33 }
 0xa6c   :  { %6638 = vmatmul.mubr.msk.f32.gmra.mrb[76].mxu1 %vm1817_vm2, %v9193_v8 }
 0xa6d   :  { %6640 = vmatprep.mubr.msk.f32.mxu1 %vm1817_vm2, %v9198_v20 }
 0xa70   :  { %6641 = vmatmul.mubr.msk.f32.gmra.mrb[78].mxu1 %vm1817_vm2, %v9207_v58 }
 0xa71   :  { %6643 = vmatprep.mubr.msk.f32.mxu1 %vm1817_vm2, %v9212_v12 }
 0xa74   :  { %6644 = vmatmul.mubr.msk.f32.gmra.mrb[80].mxu1 %vm1817_vm2, %v9221_v1 }
 0xa75   :  { %6646 = vmatprep.mubr.msk.f32.mxu1 %vm1817_vm2, %v9226_v37 }
 0xa78   :  { %6647 = vmatmul.mubr.msk.f32.gmra.mrb[82].mxu1 %vm1817_vm2, %v9235_v28 }
 0xa79   :  { %6649 = vmatprep.mubr.msk.f32.mxu1 %vm1817_vm2, %v9240_v36 }
 0xa7c   :  { %6650 = vmatmul.mubr.msk.f32.gmra.mrb[84].mxu1 %vm1817_vm2, %v9249_v40 }
 0xa7d   :  { %6660 = vmatprep.mubr.msk.f32.mxu1 %vm7667_vm5, %v9478_v51 }
 0xb2b   :  { %v4391_v49 = vpop.f32.mrb[68].mxu1 }
 0xb2c   :  { %v4392_v15 = vadd.f32 %v4391_v49, %v9273_v38  ;;  %v6619_v13 = vpop.f32.mrb[69].mxu1 }
 0xb2e   :  { %4395 = vst [vmem:[#allocation3] sm:$0x3] %v4392_v15 }
 0xb33   :  { %v6630_v63 = vpop.f32.mrb[70].mxu1 }
 0xb34   :  { %v4510_v14 = vpop.f32.mrb[71].mxu1  ;;  %v4516_v44 = vadd.f32 %v6630_v63, %v9271_v21 }
 0xb35   :  { %v4511_v43 = vadd.f32 %v4510_v14, %v9255_v27 }
 0xb36   :  { %v4590_v10 = vmul.f32 0.5, %v4516_v44 }
 0xb37   :  { %v6633_v39 = vpop.f32.mrb[72].mxu1  ;;  %v4589_v54 = vmul.f32 0.5, %v4511_v43 }
 0xb38   :  { %v4520_v50 = vpop.f32.mrb[73].mxu1  ;;  %v4526_v4 = vadd.f32 %v6633_v39, %v9278_v24  ;;  %v9294_v39 = vpop.permute.xlu1 %378 }
 0xb39   :  { %v4521_v22 = vadd.f32 %v4520_v50, %v9259_v34 }
 0xb3a   :  { %v4592_v15 = vmul.f32 0.5, %v4526_v4 }
 0xb3b   :  { %v6636_v48 = vpop.f32.mrb[74].mxu1  ;;  %v4591_v13 = vmul.f32 0.5, %v4521_v22 }
 0xb3c   :  { %v4536_v6 = vadd.f32 %v6636_v48, %v9275_v60  ;;  %v4530_v7 = vpop.f32.mrb[75].mxu1 }
 0xb3d   :  { %v4531_v56 = vadd.f32 %v4530_v7, %v9257_v23 }
 0xb3e   :  { %v4594_v57 = vmul.f32 0.5, %v4536_v6 }
 0xb3f   :  { %v6639_v32 = vpop.f32.mrb[76].mxu1  ;;  %v4593_v0 = vmul.f32 0.5, %v4531_v56 }
 0xb40   :  { %v4546_v52 = vadd.f32 %v6639_v32, %v9280_v19  ;;  %v4540_v61 = vpop.f32.mrb[77].mxu1  ;;  %7504 = vtanh.f32 %v4594_v57 }
 0xb41   :  { %v4541_v9 = vadd.f32 %v4540_v61, %v9261_v11  ;;  %7506 = vtanh.f32 %v4593_v0  ;;  %v9300_v61 = vpop.permute.xlu1 %388 }
 0xb42   :  { %v4596_v5 = vmul.f32 0.5, %v4546_v52  ;;  %7508 = vtanh.f32 %v4590_v10  ;;  %9485 = vst [vmem:[#allocation7_spill] sm:$0xff] %v9300_v61 }
 0xb43   :  { %v6642_v29 = vpop.f32.mrb[78].mxu1  ;;  %v4595_v49 = vmul.f32 0.5, %v4541_v9  ;;  %7510 = vtanh.f32 %v4589_v54 }
 0xb44   :  { %v4550_v25 = vpop.f32.mrb[79].mxu1  ;;  %7512 = vtanh.f32 %v4596_v5  ;;  %v4556_v7 = vadd.f32 %v6642_v29, %v9294_v39 }
 0xb45   :  { %7514 = vtanh.f32 %v4595_v49  ;;  %v4551_v43 = vadd.f32 %v4550_v25, %v9267_v62 }
 0xb46   :  { %7516 = vtanh.f32 %v4592_v15  ;;  %v4598_v54 = vmul.f32 0.5, %v4556_v7 }
 0xb47   :  { %v6645_v63 = vpop.f32.mrb[80].mxu1  ;;  %7518 = vtanh.f32 %v4591_v13  ;;  %v4597_v25 = vmul.f32 0.5, %v4551_v43 }
 0xb48   :  { %v4560_v14 = vpop.f32.mrb[81].mxu1  ;;  %v4566_v22 = vadd.f32 %v6645_v63, %v9300_v61 }
 0xb49   :  { %v4561_v15 = vadd.f32 %v4560_v14, %v9269_v47 }
 0xb4a   :  { %v7505_v44 = vpop.eup %7504  ;;  %v4600_v7 = vmul.f32 0.5, %v4566_v22 }
 0xb4b   :  { %v6648_v50 = vpop.f32.mrb[82].mxu1  ;;  %v7507_v32 = vpop.eup %7506  ;;  %v4618_v4 = vmul.f32 0.5, %v7505_v44 }
 0xb4c   :  { %v4576_v48 = vadd.f32 %v6648_v50, %v9284_v59  ;;  %v4570_v6 = vpop.f32.mrb[83].mxu1  ;;  %v7509_v52 = vpop.eup %7508  ;;  %v4617_v49 = vmul.f32 0.5, %v7507_v32 }
 0xb4d   :  { %v4571_v56 = vadd.f32 %v4570_v6, %v9263_v31  ;;  %v7511_v10 = vpop.eup %7510  ;;  %v4614_v50 = vmul.f32 0.5, %v7509_v52 }
 0xb4e   :  { %7520 = vtanh.f32 %v4576_v48  ;;  %v7513_v5 = vpop.eup %7512  ;;  %v4613_v6 = vmul.f32 0.5, %v7511_v10  ;;  %v4629_v44 = vadd.f32 0.5, %v4617_v49 }
 0xb4f   :  { %7522 = vtanh.f32 %v4571_v56  ;;  %v6651_v57 = vpop.f32.mrb[84].mxu1  ;;  %v7515_v13 = vpop.eup %7514  ;;  %v4620_v51 = vmul.f32 0.5, %v7513_v5  ;;  %v4626_v16 = vadd.f32 0.5, %v4614_v50 }
 0xb50   :  { %v4586_v0 = vadd.f32 %v6651_v57, %v9292_v17  ;;  %v4580_v9 = vpop.f32.mrb[85].mxu1  ;;  %v7517_v48 = vpop.eup %7516  ;;  %v4630_v57 = vadd.f32 0.5, %v4618_v4  ;;  %v4619_v63 = vmul.f32 0.5, %v7515_v13  ;;  %v4641_v4 = vmul.f32 %v4629_v44, %v9120_v41 }
 0xb51   :  { %v4581_v29 = vadd.f32 %v4580_v9, %v9265_v46  ;;  %v7519_v56 = vpop.eup %7518  ;;  %v4599_v9 = vmul.f32 0.5, %v4561_v15  ;;  %v4616_v32 = vmul.f32 0.5, %v7517_v48  ;;  %v4625_v46 = vadd.f32 0.5, %v4613_v6 }
 0xb52   :  { %7524 = vtanh.f32 %v4586_v0  ;;  %v4615_v14 = vmul.f32 0.5, %v7519_v56  ;;  %v4642_v52 = vmul.f32 %v4630_v57, %v9118_v45  ;;  %v4631_v5 = vadd.f32 0.5, %v4619_v63 }
 0xb53   :  { %7526 = vtanh.f32 %v4581_v29  ;;  %v4632_v29 = vadd.f32 0.5, %v4620_v51  ;;  %v4628_v22 = vadd.f32 0.5, %v4616_v32 }
 0xb54   :  { %7528 = vtanh.f32 %v4598_v54  ;;  %v4627_v15 = vadd.f32 0.5, %v4615_v14 }
 0xb55   :  { %7530 = vtanh.f32 %v4597_v25  ;;  %v4644_v48 = vmul.f32 %v4632_v29, %v9126_v55 }
 0xb56   :  { %7532 = vtanh.f32 %v4600_v7 }
 0xb57   :  { %7534 = vtanh.f32 %v4599_v9 }
 0xb58   :  { %v7521_v43 = vpop.eup %7520 }
 0xb59   :  { %v7523_v0 = vpop.eup %7522  ;;  %v4646_v10 = vmul.f32 %v7521_v43, %v4626_v16  ;;  %v4643_v16 = vmul.f32 %v4631_v5, %v9128_v53 }
 0xb5a   :  { %v4645_v54 = vmul.f32 %v7523_v0, %v4625_v46 }
 0xb5b   :  { %v9308_v49 = vadd.f32 %v4646_v10, %v4642_v52 }
 0xb5c   :  { %v7525_v25 = vpop.eup %7524  ;;  %v9310_v13 = vadd.f32 %v4645_v54, %v4641_v4 }
 0xb5d   :  { %v7527_v50 = vpop.eup %7526  ;;  %7536 = vtanh.f32 %v9308_v49  ;;  %v4648_v51 = vmul.f32 %v7525_v25, %v4628_v22 }
 0xb5e   :  { %7538 = vtanh.f32 %v9310_v13  ;;  %v4647_v45 = vmul.f32 %v7527_v50, %v4627_v15  ;;  %v7529_v41 = vpop.eup %7528  ;;  %v9486_v15 = vmov 0.0|0.0  }
 0xb5f   :  { %v9316_v46 = vadd.f32 %v4648_v51, %v4644_v48  ;;  %v7531_v6 = vpop.eup %7530  ;;  %v4622_v57 = vmul.f32 0.5, %v7529_v41  ;;  %v9487_v48 = vmov 0.0  }
 0xb60   :  { %v9318_v56 = vadd.f32 %v4647_v45, %v4643_v16  ;;  %v7533_v55 = vpop.eup %7532  ;;  %v4621_v7 = vmul.f32 0.5, %v7531_v6 }
 0xb61   :  { %7540 = vtanh.f32 %v9316_v46  ;;  %v7535_v44 = vpop.eup %7534  ;;  %v4634_v63 = vadd.f32 0.5, %v4622_v57  ;;  %v4624_v9 = vmul.f32 0.5, %v7533_v55 }
 0xb62   :  { %7542 = vtanh.f32 %v9318_v56  ;;  %v4633_v32 = vadd.f32 0.5, %v4621_v7  ;;  %v4623_v43 = vmul.f32 0.5, %v7535_v44 }
 0xb63   :  { %v4636_v29 = vadd.f32 0.5, %v4624_v9 }
 0xb64   :  { %v4635_v4 = vadd.f32 0.5, %v4623_v43 }
 0xb67   :  { %v7537_v53 = vpop.eup %7536 }
 0xb68   :  { %v7539_v14 = vpop.eup %7538  ;;  %v4658_v0 = vmul.f32 %v7537_v53, %v4634_v63 }
 0xb69   :  { %v4657_v52 = vmul.f32 %v7539_v14, %v4633_v32 }
 0xb6b   :  { %v7541_v10 = vpop.eup %7540  ;;  %v6828_v5 = vpack.c.bf16 %v4658_v0, %v4657_v52 }
 0xb6c   :  { %v7543_v54 = vpop.eup %7542  ;;  %v4660_v22 = vmul.f32 %v7541_v10, %v4636_v29 }
 0xb6d   :  { %6829 = vmatpush3.bf16.msra.mxu1 %v6828_v5  ;;  %v4659_v25 = vmul.f32 %v7543_v54, %v4635_v4 }
 0xb6e   :  { %6830 = vmatprep.subr.bf16.mxu1 %v9486_v15 }
 0xb6f   :  { %v6831_v50 = vpack.c.bf16 %v4660_v22, %v4659_v25 }
 0xb71   :  { %6832 = vmatpush3.bf16.msra.mxu1 %v6831_v50 }
 0xb72   :  { %6834 = vmatprep.subr.bf16.mxu1 %v6828_v5 }
 0xb74   :  { %6661 = vmatmul.mubr.msk.f32.vlgmr.msra.gmra.mrb[86].mxu1 %vm1817_vm2, %v9136_v35 }
 0xb75   :  { %6836 = vmatpush3.bf16.msra.mxu1 %v6828_v5  ;;  %6671 = vmatprep.mubr.msk.f32.mxu1 %vm1817_vm2, %v9141_v42 }
 0xb76   :  { %6838 = vmatprep.subr.bf16.mxu1 %v6831_v50 }
 0xb79   :  { %6840 = vmatpush3.bf16.msra.mxu1 %v6831_v50 }
 0xb7a   :  { %6855 = vmatprep.subr.bf16.mxu1 %v9486_v15 }
 0xb7c   :  { %6672 = vmatmul.mubr.msk.f32.vlgmr.msra.gmra.mrb[88].mxu1 %vm1817_vm2, %v9150_v2 }
 0xb7d   :  { %6674 = vmatprep.mubr.msk.f32.mxu1 %vm1817_vm2, %v9155_v3 }
 0xb80   :  { %6675 = vmatmul.mubr.msk.f32.gmra.mrb[90].mxu1 %vm1817_vm2, %v9165_v18 }
 0xb81   :  { %6677 = vmatprep.mubr.msk.f32.mxu1 %vm1817_vm2, %v9170_v26 }
 0xb84   :  { %6678 = vmatmul.mubr.msk.f32.gmra.mrb[92].mxu1 %vm1817_vm2, %v9179_v30 }
 0xb85   :  { %6680 = vmatprep.mubr.msk.f32.mxu1 %vm1817_vm2, %v9184_v33 }
 0xb88   :  { %6681 = vmatmul.mubr.msk.f32.gmra.mrb[94].mxu1 %vm1817_vm2, %v9193_v8 }
 0xb89   :  { %6683 = vmatprep.mubr.msk.f32.mxu1 %vm1817_vm2, %v9198_v20 }
 0xb8c   :  { %6684 = vmatmul.mubr.msk.f32.gmra.mrb[96].mxu1 %vm1817_vm2, %v9207_v58 }
 0xb8d   :  { %6686 = vmatprep.mubr.msk.f32.mxu1 %vm1817_vm2, %v9212_v12 }
 0xb90   :  { %6687 = vmatmul.mubr.msk.f32.gmra.mrb[98].mxu1 %vm1817_vm2, %v9221_v1 }
 0xb91   :  { %6689 = vmatprep.mubr.msk.f32.mxu1 %vm1817_vm2, %v9226_v37 }
 0xb94   :  { %6690 = vmatmul.mubr.msk.f32.gmra.mrb[100].mxu1 %vm1817_vm2, %v9235_v28 }
 0xb95   :  { %6692 = vmatprep.mubr.msk.f32.mxu1 %vm1817_vm2, %v9240_v36 }
 0xb98   :  { %6693 = vmatmul.mubr.msk.f32.gmra.mrb[102].mxu1 %vm1817_vm2, %v9249_v40 }
 0xb99   :  { %6746 = vmatprep.mubr.msk.f32.mxu1 %vm7667_vm5, %v9487_v48 }
 0xc47   :  { %v4727_v51 = vpop.f32.mrb[86].mxu1 }
 0xc48   :  { %v4728_v16 = vadd.f32 %v4727_v51, %v9273_v38  ;;  %v6662_v45 = vpop.f32.mrb[87].mxu1 }
 0xc4a   :  { %4732 = vst [vmem:[#allocation3 + $0x2] sm:$0x3] %v4728_v16 }
 0xc4f   :  { %v6673_v41 = vpop.f32.mrb[88].mxu1 }
 0xc50   :  { %v4799_v6 = vpop.f32.mrb[89].mxu1  ;;  %v4805_v53 = vadd.f32 %v6673_v41, %v9271_v21 }
 0xc51   :  { %v4800_v32 = vadd.f32 %v4799_v6, %v9255_v27 }
 0xc52   :  { %v4879_v4 = vmul.f32 0.5, %v4805_v53 }
 0xc53   :  { %v6676_v57 = vpop.f32.mrb[90].mxu1  ;;  %v4878_v54 = vmul.f32 0.5, %v4800_v32 }
 0xc54   :  { %v4809_v55 = vpop.f32.mrb[91].mxu1  ;;  %v4815_v5 = vadd.f32 %v6676_v57, %v9278_v24 }
 0xc55   :  { %v4810_v22 = vadd.f32 %v4809_v55, %v9259_v34 }
 0xc56   :  { %v4881_v16 = vmul.f32 0.5, %v4815_v5 }
 0xc57   :  { %v6679_v7 = vpop.f32.mrb[92].mxu1  ;;  %v4880_v45 = vmul.f32 0.5, %v4810_v22 }
 0xc58   :  { %v4825_v44 = vadd.f32 %v6679_v7, %v9275_v60  ;;  %v4819_v63 = vpop.f32.mrb[93].mxu1 }
 0xc59   :  { %v4820_v9 = vadd.f32 %v4819_v63, %v9257_v23 }
 0xc5a   :  { %v4883_v14 = vmul.f32 0.5, %v4825_v44 }
 0xc5b   :  { %v6682_v43 = vpop.f32.mrb[94].mxu1  ;;  %v4882_v29 = vmul.f32 0.5, %v4820_v9 }
 0xc5c   :  { %v4835_v0 = vadd.f32 %v6682_v43, %v9280_v19  ;;  %v4829_v52 = vpop.f32.mrb[95].mxu1  ;;  %7544 = vtanh.f32 %v4883_v14 }
 0xc5d   :  { %v4830_v10 = vadd.f32 %v4829_v52, %v9261_v11  ;;  %7546 = vtanh.f32 %v4882_v29 }
 0xc5e   :  { %v4885_v50 = vmul.f32 0.5, %v4835_v0  ;;  %7548 = vtanh.f32 %v4879_v4 }
 0xc5f   :  { %v6685_v25 = vpop.f32.mrb[96].mxu1  ;;  %v4884_v51 = vmul.f32 0.5, %v4830_v10  ;;  %7550 = vtanh.f32 %v4878_v54  ;;  %v9488_v54 = vld [vmem:[#allocation6_spill] sm:$0xff] }
 0xc60   :  { %v4839_v48 = vpop.f32.mrb[97].mxu1  ;;  %7552 = vtanh.f32 %v4885_v50  ;;  %v4845_v44 = vadd.f32 %v6685_v25, %v9294_v39 }
 0xc61   :  { %7554 = vtanh.f32 %v4884_v51  ;;  %v4840_v53 = vadd.f32 %v4839_v48, %v9267_v62 }
 0xc62   :  { %7556 = vtanh.f32 %v4881_v16  ;;  %v4887_v4 = vmul.f32 0.5, %v4845_v44 }
 0xc63   :  { %v6688_v41 = vpop.f32.mrb[98].mxu1  ;;  %7558 = vtanh.f32 %v4880_v45  ;;  %v4886_v51 = vmul.f32 0.5, %v4840_v53 }
 0xc64   :  { %v4849_v6 = vpop.f32.mrb[99].mxu1  ;;  %v4855_v5 = vadd.f32 %v6688_v41, %v9300_v61 }
 0xc65   :  { %v4850_v48 = vadd.f32 %v4849_v6, %v9269_v47 }
 0xc66   :  { %v7545_v9 = vpop.eup %7544  ;;  %v4889_v44 = vmul.f32 0.5, %v4855_v5 }
 0xc67   :  { %v6691_v57 = vpop.f32.mrb[100].mxu1  ;;  %v7547_v32 = vpop.eup %7546  ;;  %v4907_v10 = vmul.f32 0.5, %v7545_v9 }
 0xc68   :  { %v4865_v7 = vadd.f32 %v6691_v57, %v9284_v59  ;;  %v4859_v55 = vpop.f32.mrb[101].mxu1  ;;  %v7549_v14 = vpop.eup %7548  ;;  %v4906_v50 = vmul.f32 0.5, %v7547_v32 }
 0xc69   :  { %v4860_v63 = vadd.f32 %v4859_v55, %v9263_v31  ;;  %v7551_v29 = vpop.eup %7550  ;;  %v4903_v45 = vmul.f32 0.5, %v7549_v14 }
 0xc6a   :  { %7560 = vtanh.f32 %v4865_v7  ;;  %v7553_v25 = vpop.eup %7552  ;;  %v4902_v7 = vmul.f32 0.5, %v7551_v29  ;;  %v4918_v9 = vadd.f32 0.5, %v4906_v50 }
 0xc6b   :  { %7562 = vtanh.f32 %v4860_v63  ;;  %v6694_v43 = vpop.f32.mrb[102].mxu1  ;;  %v7555_v16 = vpop.eup %7554  ;;  %v4919_v63 = vadd.f32 0.5, %v4907_v10 }
 0xc6c   :  { %v4875_v0 = vadd.f32 %v6694_v43, %v9292_v17  ;;  %v4869_v52 = vpop.f32.mrb[103].mxu1  ;;  %v7557_v57 = vpop.eup %7556  ;;  %v4909_v43 = vmul.f32 0.5, %v7553_v25  ;;  %v4908_v41 = vmul.f32 0.5, %v7555_v16  ;;  %v4914_v61 = vadd.f32 0.5, %v4902_v7 }
 0xc6d   :  { %v4870_v22 = vadd.f32 %v4869_v52, %v9488_v54  ;;  %v7559_v55 = vpop.eup %7558  ;;  %v4888_v52 = vmul.f32 0.5, %v4850_v48  ;;  %v4915_v54 = vadd.f32 0.5, %v4903_v45  ;;  %v4905_v32 = vmul.f32 0.5, %v7557_v57 }
 0xc6e   :  { %7564 = vtanh.f32 %v4875_v0  ;;  %v4904_v6 = vmul.f32 0.5, %v7559_v55  ;;  %v4931_v14 = vmul.f32 %v4919_v63, %v9308_v49  ;;  %v4930_v10 = vmul.f32 %v4918_v9, %v9310_v13 }
 0xc6f   :  { %7566 = vtanh.f32 %v4870_v22  ;;  %v4921_v22 = vadd.f32 0.5, %v4909_v43  ;;  %v4920_v25 = vadd.f32 0.5, %v4908_v41  ;;  %v4917_v5 = vadd.f32 0.5, %v4905_v32 }
 0xc70   :  { %7568 = vtanh.f32 %v4887_v4  ;;  %v4916_v48 = vadd.f32 0.5, %v4904_v6 }
 0xc71   :  { %7570 = vtanh.f32 %v4886_v51  ;;  %v4933_v57 = vmul.f32 %v4921_v22, %v9316_v46 }
 0xc72   :  { %7572 = vtanh.f32 %v4889_v44 }
 0xc73   :  { %7574 = vtanh.f32 %v4888_v52 }
 0xc74   :  { %v7561_v53 = vpop.eup %7560 }
 0xc75   :  { %v7563_v0 = vpop.eup %7562  ;;  %v4935_v29 = vmul.f32 %v7561_v53, %v4915_v54  ;;  %v4932_v54 = vmul.f32 %v4920_v25, %v9318_v56 }
 0xc76   :  { %v4934_v4 = vmul.f32 %v7563_v0, %v4914_v61 }
 0xc77   :  { %v9379_v50 = vadd.f32 %v4935_v29, %v4931_v14 }
 0xc78   :  { %v7565_v51 = vpop.eup %7564  ;;  %v9381_v16 = vadd.f32 %v4934_v4, %v4930_v10 }
 0xc79   :  { %v7567_v45 = vpop.eup %7566  ;;  %7576 = vtanh.f32 %v9379_v50  ;;  %v4937_v49 = vmul.f32 %v7565_v51, %v4917_v5 }
 0xc7a   :  { %7578 = vtanh.f32 %v9381_v16  ;;  %v4936_v13 = vmul.f32 %v7567_v45, %v4916_v48  ;;  %v7569_v7 = vpop.eup %7568 }
 0xc7b   :  { %v9387_v61 = vadd.f32 %v4937_v49, %v4933_v57  ;;  %v7571_v55 = vpop.eup %7570  ;;  %v4911_v43 = vmul.f32 0.5, %v7569_v7 }
 0xc7c   :  { %v9389_v63 = vadd.f32 %v4936_v13, %v4932_v54  ;;  %v7573_v46 = vpop.eup %7572  ;;  %v4910_v44 = vmul.f32 0.5, %v7571_v55 }
 0xc7d   :  { %7580 = vtanh.f32 %v9387_v61  ;;  %v7575_v9 = vpop.eup %7574  ;;  %v4923_v41 = vadd.f32 0.5, %v4911_v43  ;;  %v4913_v52 = vmul.f32 0.5, %v7573_v46 }
 0xc7e   :  { %7582 = vtanh.f32 %v9389_v63  ;;  %v4922_v32 = vadd.f32 0.5, %v4910_v44  ;;  %v4912_v53 = vmul.f32 0.5, %v7575_v9 }
 0xc7f   :  { %v4925_v22 = vadd.f32 0.5, %v4913_v52 }
 0xc80   :  { %v4924_v10 = vadd.f32 0.5, %v4912_v53 }
 0xc83   :  { %v7577_v56 = vpop.eup %7576 }
 0xc84   :  { %v7579_v6 = vpop.eup %7578  ;;  %v4947_v0 = vmul.f32 %v7577_v56, %v4923_v41 }
 0xc85   :  { %v4946_v14 = vmul.f32 %v7579_v6, %v4922_v32 }
 0xc87   :  { %v7581_v29 = vpop.eup %7580  ;;  %v6842_v25 = vpack.c.bf16 %v4947_v0, %v4946_v14 }
 0xc88   :  { %v7583_v4 = vpop.eup %7582  ;;  %v4949_v5 = vmul.f32 %v7581_v29, %v4925_v22 }
 0xc89   :  { %6843 = vmatpush3.bf16.msra.mxu0 %v6842_v25  ;;  %v4948_v51 = vmul.f32 %v7583_v4, %v4924_v10  ;;  %v9490_v4 = vld [vmem:[#allocation6_spill] sm:$0xff] }
 0xc8a   :  { %6844 = vmatprep.subr.bf16.mxu0 %v9486_v15 }
 0xc8b   :  { %v6845_v48 = vpack.c.bf16 %v4949_v5, %v4948_v51 }
 0xc8d   :  { %6846 = vmatpush3.bf16.msra.mxu0 %v6845_v48 }
 0xc8e   :  { %6848 = vmatprep.subr.bf16.mxu0 %v6842_v25 }
 0xc90   :  { %6704 = vmatmul.mubr.msk.f32.vlgmr.msra.gmra.mrb[80].mxu0 %vm1817_vm2, %v9136_v35 }
 0xc91   :  { %6850 = vmatpush3.bf16.msra.mxu0 %v6842_v25  ;;  %6714 = vmatprep.mubr.msk.f32.mxu0 %vm1817_vm2, %v9141_v42 }
 0xc92   :  { %6852 = vmatprep.subr.bf16.mxu0 %v6845_v48 }
 0xc95   :  { %6854 = vmatpush3.bf16.msra.mxu0 %v6845_v48 }
 0xc98   :  { %6715 = vmatmul.mubr.msk.f32.vlgmr.msra.gmra.mrb[82].mxu0 %vm1817_vm2, %v9150_v2 }
 0xc99   :  { %6717 = vmatprep.mubr.msk.f32.mxu0 %vm1817_vm2, %v9155_v3 }
 0xc9c   :  { %6718 = vmatmul.mubr.msk.f32.gmra.mrb[84].mxu0 %vm1817_vm2, %v9165_v18 }
 0xc9d   :  { %6720 = vmatprep.mubr.msk.f32.mxu0 %vm1817_vm2, %v9170_v26 }
 0xca0   :  { %6721 = vmatmul.mubr.msk.f32.gmra.mrb[86].mxu0 %vm1817_vm2, %v9179_v30 }
 0xca1   :  { %6723 = vmatprep.mubr.msk.f32.mxu0 %vm1817_vm2, %v9184_v33 }
 0xca4   :  { %6724 = vmatmul.mubr.msk.f32.gmra.mrb[88].mxu0 %vm1817_vm2, %v9193_v8 }
 0xca5   :  { %6726 = vmatprep.mubr.msk.f32.mxu0 %vm1817_vm2, %v9198_v20 }
 0xca8   :  { %6727 = vmatmul.mubr.msk.f32.gmra.mrb[90].mxu0 %vm1817_vm2, %v9207_v58 }
 0xca9   :  { %6729 = vmatprep.mubr.msk.f32.mxu0 %vm1817_vm2, %v9212_v12 }
 0xcac   :  { %6730 = vmatmul.mubr.msk.f32.gmra.mrb[92].mxu0 %vm1817_vm2, %v9221_v1 }
 0xcad   :  { %6732 = vmatprep.mubr.msk.f32.mxu0 %vm1817_vm2, %v9226_v37 }
 0xcb0   :  { %6733 = vmatmul.mubr.msk.f32.gmra.mrb[94].mxu0 %vm1817_vm2, %v9235_v28 }
 0xcb1   :  { %6735 = vmatprep.mubr.msk.f32.mxu0 %vm1817_vm2, %v9240_v36 }
 0xcb4   :  { %6736 = vmatmul.mubr.msk.f32.gmra.mrb[96].mxu0 %vm1817_vm2, %v9249_v40 }
 0xd63   :  { %v5016_v42 = vpop.f32.mrb[80].mxu0 }
 0xd64   :  { %v5017_v2 = vadd.f32 %v5016_v42, %v9273_v38  ;;  %v6705_v3 = vpop.f32.mrb[81].mxu0 }
 0xd66   :  { %5021 = vst [vmem:[#allocation3 + $0x4] sm:$0x3] %v5017_v2 }
 0xd6b   :  { %v6716_v18 = vpop.f32.mrb[82].mxu0 }
 0xd6c   :  { %v5088_v26 = vpop.f32.mrb[83].mxu0  ;;  %v5094_v1 = vadd.f32 %v6716_v18, %v9271_v21 }
 0xd6d   :  { %v5089_v37 = vadd.f32 %v5088_v26, %v9255_v27 }
 0xd6e   :  { %v5168_v54 = vmul.f32 0.5, %v5094_v1 }
 0xd6f   :  { %v6719_v30 = vpop.f32.mrb[84].mxu0  ;;  %v5167_v7 = vmul.f32 0.5, %v5089_v37 }
 0xd70   :  { %v5098_v33 = vpop.f32.mrb[85].mxu0  ;;  %v5104_v13 = vadd.f32 %v6719_v30, %v9278_v24 }
 0xd72   :  { %v5170_v43 = vmul.f32 0.5, %v5104_v13 }
 0xd73   :  { %v6722_v8 = vpop.f32.mrb[86].mxu0 }
 0xd74   :  { %v5114_v20 = vadd.f32 %v6722_v8, %v9275_v60  ;;  %v5108_v58 = vpop.f32.mrb[87].mxu0  ;;  %v5099_v60 = vadd.f32 %v5098_v33, %v9259_v34 }
 0xd75   :  { %v5109_v12 = vadd.f32 %v5108_v58, %v9257_v23 }
 0xd76   :  { %v5172_v36 = vmul.f32 0.5, %v5114_v20 }
 0xd77   :  { %v6725_v28 = vpop.f32.mrb[88].mxu0  ;;  %v5171_v57 = vmul.f32 0.5, %v5109_v12 }
 0xd78   :  { %v5124_v40 = vadd.f32 %v6725_v28, %v9280_v19  ;;  %v5118_v45 = vpop.f32.mrb[89].mxu0  ;;  %7584 = vtanh.f32 %v5172_v36  ;;  %v5169_v19 = vmul.f32 0.5, %v5099_v60 }
 0xd79   :  { %v5119_v49 = vadd.f32 %v5118_v45, %v9261_v11  ;;  %7586 = vtanh.f32 %v5171_v57 }
 0xd7a   :  { %v5174_v23 = vmul.f32 0.5, %v5124_v40  ;;  %7588 = vtanh.f32 %v5168_v54 }
 0xd7b   :  { %v6728_v55 = vpop.f32.mrb[90].mxu0  ;;  %v5173_v27 = vmul.f32 0.5, %v5119_v49  ;;  %7590 = vtanh.f32 %v5167_v7 }
 0xd7c   :  { %v5128_v21 = vpop.f32.mrb[91].mxu0  ;;  %7592 = vtanh.f32 %v5174_v23  ;;  %v5134_v9 = vadd.f32 %v6728_v55, %v9294_v39 }
 0xd7d   :  { %7594 = vtanh.f32 %v5173_v27  ;;  %v5129_v56 = vadd.f32 %v5128_v21, %v9267_v62 }
 0xd7e   :  { %7596 = vtanh.f32 %v5170_v43  ;;  %v5176_v10 = vmul.f32 0.5, %v5134_v9 }
 0xd7f   :  { %v6731_v46 = vpop.f32.mrb[92].mxu0  ;;  %7598 = vtanh.f32 %v5169_v19  ;;  %v5175_v51 = vmul.f32 0.5, %v5129_v56 }
 0xd80   :  { %v5138_v44 = vpop.f32.mrb[93].mxu0 }
 0xd81   :  { %v5139_v62 = vadd.f32 %v5138_v44, %v9269_v47 }
 0xd82   :  { %v7585_v52 = vpop.eup %7584 }
 0xd83   :  { %v6734_v11 = vpop.f32.mrb[94].mxu0  ;;  %v7587_v32 = vpop.eup %7586  ;;  %v5196_v29 = vmul.f32 0.5, %v7585_v52  ;;  %v5177_v20 = vmul.f32 0.5, %v5139_v62 }
 0xd84   :  { %v5154_v24 = vadd.f32 %v6734_v11, %v9284_v59  ;;  %v5148_v34 = vpop.f32.mrb[95].mxu0  ;;  %v7589_v6 = vpop.eup %7588  ;;  %v9489_v59 = vld [vmem:[#allocation7_spill] sm:$0xff] }
 0xd85   :  { %v5149_v41 = vadd.f32 %v5148_v34, %v9263_v31  ;;  %v7591_v22 = vpop.eup %7590  ;;  %v5144_v25 = vadd.f32 %v6731_v46, %v9489_v59  ;;  %v5195_v31 = vmul.f32 0.5, %v7587_v32  ;;  %v5192_v42 = vmul.f32 0.5, %v7589_v6 }
 0xd86   :  { %7600 = vtanh.f32 %v5154_v24  ;;  %v7593_v5 = vpop.eup %7592  ;;  %v5191_v3 = vmul.f32 0.5, %v7591_v22  ;;  %v5208_v18 = vadd.f32 0.5, %v5196_v29 }
 0xd87   :  { %7602 = vtanh.f32 %v5149_v41  ;;  %v6737_v53 = vpop.f32.mrb[96].mxu0  ;;  %v7595_v48 = vpop.eup %7594  ;;  %v5198_v26 = vmul.f32 0.5, %v7593_v5  ;;  %v5178_v30 = vmul.f32 0.5, %v5144_v25  ;;  %v5207_v33 = vadd.f32 0.5, %v5195_v31 }
 0xd88   :  { %v5164_v0 = vadd.f32 %v6737_v53, %v9292_v17  ;;  %v5158_v14 = vpop.f32.mrb[97].mxu0  ;;  %v7597_v2 = vpop.eup %7596  ;;  %v5197_v8 = vmul.f32 0.5, %v7595_v48  ;;  %v5204_v58 = vadd.f32 0.5, %v5192_v42  ;;  %v5203_v37 = vadd.f32 0.5, %v5191_v3 }
 0xd89   :  { %v5159_v39 = vadd.f32 %v5158_v14, %v9490_v4  ;;  %v7599_v17 = vpop.eup %7598  ;;  %v5194_v12 = vmul.f32 0.5, %v7597_v2  ;;  %v5220_v36 = vmul.f32 %v5208_v18, %v9379_v50  ;;  %v5210_v40 = vadd.f32 0.5, %v5198_v26 }
 0xd8a   :  { %7604 = vtanh.f32 %v5164_v0  ;;  %v5193_v47 = vmul.f32 0.5, %v7599_v17  ;;  %v5219_v57 = vmul.f32 %v5207_v33, %v9381_v16  ;;  %v5209_v49 = vadd.f32 0.5, %v5197_v8 }
 0xd8b   :  { %7606 = vtanh.f32 %v5159_v39  ;;  %v5206_v13 = vadd.f32 0.5, %v5194_v12  ;;  %v5222_v27 = vmul.f32 %v5210_v40, %v9387_v61 }
 0xd8c   :  { %7608 = vtanh.f32 %v5176_v10  ;;  %v5205_v55 = vadd.f32 0.5, %v5193_v47  ;;  %v5221_v50 = vmul.f32 %v5209_v49, %v9389_v63 }
 0xd8d   :  { %7610 = vtanh.f32 %v5175_v51 }
 0xd8e   :  { %7612 = vtanh.f32 %v5178_v30 }
 0xd8f   :  { %7614 = vtanh.f32 %v5177_v20 }
 0xd90   :  { %v7601_v1 = vpop.eup %7600 }
 0xd91   :  { %v7603_v28 = vpop.eup %7602  ;;  %v5224_v45 = vmul.f32 %v7601_v1, %v5204_v58 }
 0xd92   :  { %v5223_v54 = vmul.f32 %v7603_v28, %v5203_v37 }
 0xd93   :  { %v5228_v7 = vadd.f32 %v5224_v45, %v5220_v36 }
 0xd94   :  { %v7605_v60 = vpop.eup %7604  ;;  %v5227_v23 = vadd.f32 %v5223_v54, %v5219_v57 }
 0xd95   :  { %v7607_v21 = vpop.eup %7606  ;;  %7616 = vtanh.f32 %v5228_v7  ;;  %v5226_v43 = vmul.f32 %v7605_v60, %v5206_v13 }
 0xd96   :  { %7618 = vtanh.f32 %v5227_v23  ;;  %v5225_v19 = vmul.f32 %v7607_v21, %v5205_v55  ;;  %v7609_v46 = vpop.eup %7608 }
 0xd97   :  { %v5230_v44 = vadd.f32 %v5226_v43, %v5222_v27  ;;  %v7611_v16 = vpop.eup %7610  ;;  %v5200_v24 = vmul.f32 0.5, %v7609_v46 }
 0xd98   :  { %v5229_v11 = vadd.f32 %v5225_v19, %v5221_v50  ;;  %v7613_v34 = vpop.eup %7612  ;;  %v5199_v9 = vmul.f32 0.5, %v7611_v16 }
 0xd99   :  { %7620 = vtanh.f32 %v5230_v44  ;;  %v7615_v41 = vpop.eup %7614  ;;  %v5212_v52 = vadd.f32 0.5, %v5200_v24  ;;  %v5202_v56 = vmul.f32 0.5, %v7613_v34 }
 0xd9a   :  { %7622 = vtanh.f32 %v5229_v11  ;;  %v5211_v61 = vadd.f32 0.5, %v5199_v9  ;;  %v5201_v53 = vmul.f32 0.5, %v7615_v41 }
 0xd9b   :  { %v5214_v14 = vadd.f32 0.5, %v5202_v56 }
 0xd9c   :  { %v5213_v29 = vadd.f32 0.5, %v5201_v53 }
 0xd9f   :  { %v7617_v32 = vpop.eup %7616 }
 0xda0   :  { %v7619_v6 = vpop.eup %7618  ;;  %v5236_v0 = vmul.f32 %v7617_v32, %v5212_v52 }
 0xda1   :  { %v5235_v63 = vmul.f32 %v7619_v6, %v5211_v61 }
 0xda3   :  { %v7621_v22 = vpop.eup %7620  ;;  %v6856_v10 = vpack.c.bf16 %v5236_v0, %v5235_v63 }
 0xda4   :  { %v7623_v59 = vpop.eup %7622  ;;  %v5238_v25 = vmul.f32 %v7621_v22, %v5214_v14 }
 0xda5   :  { %6857 = vmatpush3.bf16.msra.mxu1 %v6856_v10  ;;  %v5237_v4 = vmul.f32 %v7623_v59, %v5213_v29 }
 0xda6   :  { %6858 = vmatprep.subr.bf16.mxu1 %v9486_v15 }
 0xda7   :  { %v6859_v39 = vpack.c.bf16 %v5238_v25, %v5237_v4 }
 0xda9   :  { %6860 = vmatpush3.bf16.msra.mxu1 %v6859_v39 }
 0xdac   :  { %6747 = vmatmul.mubr.msk.f32.vlgmr.msra.gmra.mrb[104].mxu1 %vm1817_vm2, %v9136_v35 }
 0xe7f   :  { %v5305_v5 = vpop.f32.mrb[104].mxu1 }
 0xe80   :  { %v5306_v31 = vadd.f32 %v5305_v5, %v9273_v38  ;;  %v6748_v51 = vpop.f32.mrb[105].mxu1 }
 0xe82   :  { %5310 = vst [vmem:[#allocation3 + $0x6] sm:$0x3] %v5306_v31 }
 0xe83   :  { %7651 = shalt.err (!%p7648_p4)
}
 0xe84   :  { %s7652_s7 = scalar_lea.hbm %s9477_s12, 128 }
 0xe85   :  { %p7653_p5 = scmp.ne.s32.totalorder %s9477_s12, %s7652_s7  ;;  %p7656_p6 = scmp.lt.u32.totalorder %s7652_s7, %s9477_s12 }
 0xe87   :  { %p7658_p7 = pnand %p7656_p6, %p7653_p5 }
 0xe89   :  { %7661 = shalt.err (!%p7658_p7)
}
 0xe8a   :  { %s7669_s23 = smov 32   ;;  %s7670_s4 = smov 2  }
 0xe8b   :  { %5322 = dma.vmem_to_hbm [thread:$0]  %s5317_s17, 128, %s9477_s12, [#allocation4], %s7669_s23, %s7669_s23, %s7670_s4  }
 0xe8c   :  { %7662 = dma.done.wait [#allocation4], 128  }
 0xe8d   :  { %7663 = vsyncadd [#allocation4], 4294967168 }
 0xe8e   :  { %5326 = vsyncpa [#allocation4], 1 }

</bundles_post_ra>
